<compile_context>
chip_gen: v5e
topology: v5e:2x2
jax: 0.10.0
libtpu: 0.0.40
codegen_flags: <defaults>
</compile_context>

<pallas_src>
import functools
import math

import jax
import jax.numpy as jnp
from jax.experimental import pallas as pl
from jax.experimental.pallas import tpu as pltpu


HP = 128           # hidden / feature width padded to full 128-lane vregs
HP2 = 2 * HP       # width of the merged (Wa | Wb) first-layer weights
OUT_PAD = HP       # padded width of the final node-feature output


def _silu(v):
    return v * jax.nn.sigmoid(v)


def _vmem_specs(n):
    return [pl.BlockSpec(memory_space=pltpu.MemorySpace.VMEM) for _ in range(n)]


# ---------------------------------------------------------------------------
# fused forward kernel (whole EGNN equivariant path in one pallas_call)
# ---------------------------------------------------------------------------
def _egnn_fused_kernel(n_blocks, n_gcl, norm_constant, layout,
                       h_ref, x_ref, r_ref, c_ref, rt_ref, nmask_ref, emask_ref,
                       wbig_ref, wsq_ref, wsm_ref, h_out_ref, x_out_ref):
    f32 = jnp.float32
    big_off, sq_off, sm_off = layout['big'], layout['sq'], layout['sm']

    def mm(a, b):
        return jnp.dot(a, b, preferred_element_type=f32)

    # Static-offset views into the packed weight buffers (static slices: free).
    def big(name):                       # [HP, 2*HP] merged (Wa | Wb)
        o = big_off[name]
        return wbig_ref[o:o + HP, :]

    def sq(name, rows=HP):               # [rows, HP] square-ish matrices
        o = sq_off[name]
        return wsq_ref[o:o + rows, :]

    def sm(name, rows=1):                # [rows, HP] biases / tiny rows
        o = sm_off[name]
        return wsm_ref[o:o + rows, :]

    h = h_ref[...]                       # [N, HP]  lane-padded node feats
    x = x_ref[...]                       # [N, HP]  lane-padded coords (cols 3.. are 0)
    R = r_ref[...]                       # [E, N]   one-hot rows
    C = c_ref[...]                       # [E, N]   one-hot cols
    RT = rt_ref[...]                     # [N, E]   == R.T
    D = R - C                            # (R - C) @ x == x[row] - x[col]

    # Hoisted mask broadcasts (reused everywhere; not re-emitted per iteration).
    nmask_b = jnp.broadcast_to(nmask_ref[...], (h.shape[0], HP))
    emask_b = jnp.broadcast_to(emask_ref[...], (R.shape[0], HP))

    # EGNN.forward: squared distances from the *initial* coordinates.
    diff0 = mm(D, x)
    dist0 = jnp.sum(diff0 * diff0, axis=1, keepdims=True)       # [E, 1]

    # embedding_in : Linear-SiLU-Linear-SiLU
    h = _silu(mm(h, sq('ei_w1')) + sm('ei_b1'))
    h = _silu(mm(h, sq('ei_w2')) + sm('ei_b2'))

    for b in range(n_blocks):
        # EquivariantBlock: coord2diff on the *current* coordinates.
        if b == 0:
            diff, radial = diff0, dist0                          # x unchanged yet
        else:
            diff = mm(D, x)
            radial = jnp.sum(diff * diff, axis=1, keepdims=True)
        inv = pl.reciprocal(jnp.sqrt(radial + 1e-8) + norm_constant, approx=True)
        cdiff = diff * inv

        for g in range(n_gcl):
            p = f'b{b}g{g}_'
            # edge MLP first layer: one [N,HP]x[HP,2HP] matmul (fills 256-wide
            # MXU), gathered to edges via R/C; [E,2] edge-attr term as two VPU
            # broadcast MACs.
            wc = sm(p + 'we1c', 2)
            eattr = radial * wc[0:1, :] + dist0 * wc[1:2, :]
            hw = mm(h, big(p + 'we1ab'))                         # [N, 2HP]
            m = _silu(mm(R, hw[:, :HP]) + mm(C, hw[:, HP:])
                      + eattr + sm(p + 'be1'))
            m = _silu(mm(m, sq(p + 'we2')) + sm(p + 'be2'))
            m = m * emask_b
            # unsorted_segment_sum over rows ('sum' agg; 1/norm folded in wn1ab)
            agg = mm(RT, m)
            # node MLP first layer as a single K=2*HP matmul
            hn = jnp.concatenate([h, agg], axis=1)               # [N, 2HP]
            upd = mm(_silu(mm(hn, sq(p + 'wn1ab', HP2)) + sm(p + 'bn1')),
                     sq(p + 'wn2')) + sm(p + 'bn2')
            h = (h + upd) * nmask_b

        # EquivariantUpdate (coord MLP + segment sum; 1/norm folded in w3)
        p = f'b{b}e_'
        wc = sm(p + 'w1c', 2)
        eattr = radial * wc[0:1, :] + dist0 * wc[1:2, :]
        hw = mm(h, big(p + 'w1ab'))
        t = _silu(mm(R, hw[:, :HP]) + mm(C, hw[:, HP:]) + eattr + sm(p + 'b1'))
        t = _silu(mm(t, sq(p + 'w2')) + sm(p + 'b2'))
        phi = jnp.sum(t * sm(p + 'w3'), axis=1, keepdims=True)   # N=1 matmul -> lane reduce
        trans = cdiff * phi * emask_b
        x = (x + mm(RT, trans)) * nmask_b
        h = h * nmask_b

    # embedding_out : Linear-SiLU-Linear, then final node mask (EGNN.forward)
    h = _silu(mm(h, sq('eo_w1')) + sm('eo_b1'))
    h = mm(h, sq('eo_w2')) + sm('eo_b2')
    h_out_ref[...] = h * nmask_b
    x_out_ref[...] = x


def egnn_forward_pallas(weights, h, x, R, C, RT, node_mask, edge_mask, *,
                        n_blocks, n_gcl, out_nf, layout, norm_constant=1.0):
    w_big, w_sq, w_sm = weights
    N = h.shape[0]
    # Lane-dense inputs (padded lanes are exactly 0 and stay 0 in-kernel).
    h_pad = jnp.pad(jnp.asarray(h, jnp.float32), ((0, 0), (0, HP - h.shape[1])))
    x_pad = jnp.pad(jnp.asarray(x, jnp.float32), ((0, 0), (0, HP - x.shape[1])))
    kernel = functools.partial(_egnn_fused_kernel, n_blocks, n_gcl,
                               float(norm_constant), layout)
    h_out, x_out = pl.pallas_call(
        kernel,
        out_shape=(jax.ShapeDtypeStruct((N, OUT_PAD), jnp.float32),
                   jax.ShapeDtypeStruct((N, HP), jnp.float32)),
        in_specs=_vmem_specs(10),
        out_specs=tuple(_vmem_specs(2)),
        compiler_params=pltpu.CompilerParams(vmem_limit_bytes=32 * 1024 * 1024),
    )(h_pad, x_pad, R, C, RT, node_mask, edge_mask, w_big, w_sq, w_sm)
    return h_out[:, :out_nf], x_out[:, :3], None  # (h_3d, x, pred_adjs=None)


# ---------------------------------------------------------------------------
# parameter prep: pad to 128 lanes, merge Wa|Wb and [wn1a;wn1b], fold 1/norm,
# and pack everything into THREE flat buffers with a static offset layout
# ---------------------------------------------------------------------------
def prep_params(params, normalization_factor=100.0):
    f32 = jnp.float32
    nf = float(normalization_factor)

    def pad_rc(w, rows, cols):
        w = jnp.asarray(w, f32)
        return jnp.pad(w, ((0, rows - w.shape[0]), (0, cols - w.shape[1])))

    H = params['emb_in'][2].shape[0]
    out_nf = params['emb_out'][2].shape[1]
    n_blocks = len(params['blocks'])
    n_gcl = len(params['blocks'][0]['gcls'])

    big_chunks, big_off = [], {}
    sq_chunks, sq_off = [], {}
    sm_chunks, sm_off = [], {}

    def add(chunks, offs, name, mat):
        offs[name] = sum(c.shape[0] for c in chunks)
        chunks.append(mat)

    def add_big(name, wa, wb):       # merged first-layer weights [HP, 2HP]
        add(big_chunks, big_off, name,
            jnp.concatenate([pad_rc(wa, HP, HP), pad_rc(wb, HP, HP)], axis=1))

    def add_sq(name, w, rows=HP):
        add(sq_chunks, sq_off, name, pad_rc(w, rows, HP))

    def add_sm(name, w):             # each small entry padded to an 8-row tile
        add(sm_chunks, sm_off, name, pad_rc(w, 8, HP))

    w1, b1, w2, b2 = params['emb_in']
    add_sq('ei_w1', w1)
    add_sq('ei_w2', w2)
    add_sm('ei_b1', b1)
    add_sm('ei_b2', b2)

    for bi, blk in enumerate(params['blocks']):
        for gi, g in enumerate(blk['gcls']):
            p = f'b{bi}g{gi}_'
            we1, wn1 = g['we1'], g['wn1']
            add_big(p + 'we1ab', we1[:H], we1[H:2 * H])
            add_sm(p + 'we1c', we1[2 * H:])
            add_sm(p + 'be1', g['be1'])
            add_sq(p + 'we2', g['we2'])
            add_sm(p + 'be2', g['be2'])
            # node MLP: stack [wn1a ; wn1b/nf] along rows -> one K=2*HP matmul
            wn1ab = jnp.concatenate([pad_rc(wn1[:H], HP, HP),
                                     pad_rc(wn1[H:] / nf, HP, HP)], axis=0)
            add(sq_chunks, sq_off, p + 'wn1ab', wn1ab)
            add_sm(p + 'bn1', g['bn1'])
            add_sq(p + 'wn2', g['wn2'])
            add_sm(p + 'bn2', g['bn2'])
        eq = blk['equiv']
        p = f'b{bi}e_'
        w1 = eq['w1']
        add_big(p + 'w1ab', w1[:H], w1[H:2 * H])
        add_sm(p + 'w1c', w1[2 * H:])
        add_sm(p + 'b1', eq['b1'])
        add_sq(p + 'w2', eq['w2'])
        add_sm(p + 'b2', eq['b2'])
        add_sm(p + 'w3', (eq['w3'] / nf).T)   # fold 1/normalization_factor

    w1, b1, w2, b2 = params['emb_out']
    add_sq('eo_w1', w1)
    add_sq('eo_w2', w2)           # out_nf lanes zero-padded to OUT_PAD
    add_sm('eo_b1', b1)
    add_sm('eo_b2', b2)

    weights = (jnp.concatenate(big_chunks, axis=0),
               jnp.concatenate(sq_chunks, axis=0),
               jnp.concatenate(sm_chunks, axis=0))
    layout = dict(big=big_off, sq=sq_off, sm=sm_off)
    cfg = dict(n_blocks=n_blocks, n_gcl=n_gcl, out_nf=out_nf, layout=layout)
    return weights, cfg


# ---------------------------------------------------------------------------
# pure-JAX reference (unpadded/unfolded params; indexing + segment_sum)
# ---------------------------------------------------------------------------
def egnn_forward_ref(params, h, x, rows, cols, node_mask, edge_mask,
                     norm_constant=1.0, normalization_factor=100.0):
    N = h.shape[0]

    def c2d(xx, nc):
        diff = xx[rows] - xx[cols]
        radial = jnp.sum(diff ** 2, axis=1, keepdims=True)
        norm = jnp.sqrt(radial + 1e-8)
        return radial, diff / (norm + nc)

    def seg_sum(data):
        return jax.ops.segment_sum(data, rows, num_segments=N)

    dist0, _ = c2d(x, 1.0)
    w1, b1, w2, b2 = params['emb_in']
    h = _silu(_silu(h @ w1 + b1) @ w2 + b2)
    for blk in params['blocks']:
        radial, cdiff = c2d(x, norm_constant)
        eattr = jnp.concatenate([radial, dist0], axis=1)
        for g in blk['gcls']:
            inp = jnp.concatenate([h[rows], h[cols], eattr], axis=1)
            m = _silu(inp @ g['we1'] + g['be1'])
            m = _silu(m @ g['we2'] + g['be2'])
            m = m * edge_mask
            agg = seg_sum(m) / normalization_factor
            nin = jnp.concatenate([h, agg], axis=1)
            h = (h + (_silu(nin @ g['wn1'] + g['bn1']) @ g['wn2'] + g['bn2'])) * node_mask
        eq = blk['equiv']
        inp = jnp.concatenate([h[rows], h[cols], eattr], axis=1)
        t = _silu(inp @ eq['w1'] + eq['b1'])
        t = _silu(t @ eq['w2'] + eq['b2'])
        phi = t @ eq['w3']
        trans = cdiff * phi * edge_mask
        x = (x + seg_sum(trans) / normalization_factor) * node_mask
        h = h * node_mask
    w1, b1, w2, b2 = params['emb_out']
    h = (_silu(h @ w1 + b1) @ w2 + b2) * node_mask
    return h, x, None


# ---------------------------------------------------------------------------
# deterministic parameter init (PyTorch-Linear-style uniform; xavier coord head)
# ---------------------------------------------------------------------------
def _init_linear(key, fan_in, fan_out):
    kw, kb = jax.random.split(key)
    bound = 1.0 / math.sqrt(fan_in)
    w = jax.random.uniform(kw, (fan_in, fan_out), jnp.float32, -bound, bound)
    b = jax.random.uniform(kb, (1, fan_out), jnp.float32, -bound, bound)
    return w, b


def _init_xavier(key, fan_in, fan_out, gain):
    bound = gain * math.sqrt(6.0 / (fan_in + fan_out))
    return jax.random.uniform(key, (fan_in, fan_out), jnp.float32, -bound, bound)


def init_params(key, in_node_nf, hidden_nf, n_blocks, n_gcl_per_block,
                edge_feat_nf=2, out_node_nf=None):
    out_node_nf = in_node_nf if out_node_nf is None else out_node_nf
    H = hidden_nf
    keys = iter(jax.random.split(key, 128))
    nk = lambda: next(keys)
    emb_in = (*_init_linear(nk(), in_node_nf, H), *_init_linear(nk(), H, H))
    emb_out = (*_init_linear(nk(), H, H), *_init_linear(nk(), H, out_node_nf))
    blocks = []
    for _ in range(n_blocks):
        gcls = []
        for _ in range(n_gcl_per_block):
            we1, be1 = _init_linear(nk(), 2 * H + edge_feat_nf, H)
            we2, be2 = _init_linear(nk(), H, H)
            wn1, bn1 = _init_linear(nk(), 2 * H, H)
            wn2, bn2 = _init_linear(nk(), H, H)
            gcls.append(dict(we1=we1, be1=be1, we2=we2, be2=be2,
                             wn1=wn1, bn1=bn1, wn2=wn2, bn2=bn2))
        w1, b1 = _init_linear(nk(), 2 * H + edge_feat_nf, H)
        w2, b2 = _init_linear(nk(), H, H)
        w3 = _init_xavier(nk(), H, 1, gain=0.001)     # final bias-free coord layer
        blocks.append(dict(gcls=gcls, equiv=dict(w1=w1, b1=b1, w2=w2, b2=b2, w3=w3)))
    return dict(emb_in=emb_in, emb_out=emb_out, blocks=blocks)


# ---------------------------------------------------------------------------
# main
# ---------------------------------------------------------------------------
if __name__ == "__main__":
    bs, n_nodes = 2, 4
    N = bs * n_nodes
    in_node_nf = 6
    hidden_nf = 32
    n_blocks = 2          # EGNNetwork blocks
    n_gcl_per_block = 2   # GCLs per EquivariantBlock

    # fully-connected edges (i != j) within each graph
    rows_l, cols_l = [], []
    for b in range(bs):
        for i in range(n_nodes):
            for j in range(n_nodes):
                if i != j:
                    rows_l.append(b * n_nodes + i)
                    cols_l.append(b * n_nodes + j)
    rows = jnp.array(rows_l, dtype=jnp.int32)
    cols = jnp.array(cols_l, dtype=jnp.int32)
    R = jax.nn.one_hot(rows, N, dtype=jnp.float32)   # [E, N]
    C = jax.nn.one_hot(cols, N, dtype=jnp.float32)   # [E, N]
    RT = jnp.asarray(R.T)                            # [N, E]

    key = jax.random.PRNGKey(0)
    kh, kx, kp = jax.random.split(key, 3)
    h0 = jax.random.normal(kh, (N, in_node_nf), jnp.float32)
    x0 = jax.random.normal(kx, (N, 3), jnp.float32)

    # mask out the last node of the second graph (and its edges)
    node_mask = jnp.ones((N, 1), jnp.float32).at[N - 1, 0].set(0.0)
    edge_mask = node_mask[rows] * node_mask[cols]    # [E, 1]

    params = init_params(kp, in_node_nf, hidden_nf,
                         n_blocks=n_blocks, n_gcl_per_block=n_gcl_per_block)
    weights, cfg = prep_params(params, normalization_factor=100.0)

    fwd = jax.jit(functools.partial(egnn_forward_pallas, norm_constant=1.0, **cfg))
    h_pal, x_pal, _ = fwd(weights, h0, x0, R, C, RT, node_mask, edge_mask)
    jax.block_until_ready((h_pal, x_pal))

    # sanity check vs pure-JAX reference (raw, unpadded, unfolded params).
    # 1e-3 tolerance covers the EUP approximate-reciprocal drift on cdiff and
    # MXU default-precision accumulation-order differences; the data path is
    # otherwise algebraically exact vs the reference.
    h_rf, x_rf, _ = egnn_forward_ref(params, h0, x0, rows, cols,
                                     node_mask, edge_mask)
    jax.block_until_ready((h_rf, x_rf))
    dh = float(jnp.max(jnp.abs(h_pal - h_rf)))
    dx = float(jnp.max(jnp.abs(x_pal - x_rf)))
    assert dh < 1e-3 and dx < 1e-3, (dh, dx)

    print("KERNEL_OK")
</pallas_src>

<mosaic_0001>
module attributes {stable_mosaic.version = 11 : i64} {
  func.func @_egnn_fused_kernel(%arg0: memref<8x128xf32, #tpu.memory_space<vmem>>, %arg1: memref<8x128xf32, #tpu.memory_space<vmem>>, %arg2: memref<24x8xf32, #tpu.memory_space<vmem>>, %arg3: memref<24x8xf32, #tpu.memory_space<vmem>>, %arg4: memref<8x24xf32, #tpu.memory_space<vmem>>, %arg5: memref<8x1xf32, #tpu.memory_space<vmem>>, %arg6: memref<24x1xf32, #tpu.memory_space<vmem>>, %arg7: memref<768x256xf32, #tpu.memory_space<vmem>>, %arg8: memref<2816x128xf32, #tpu.memory_space<vmem>>, %arg9: memref<256x128xf32, #tpu.memory_space<vmem>>, %arg10: memref<8x128xf32, #tpu.memory_space<vmem>>, %arg11: memref<8x128xf32, #tpu.memory_space<vmem>>) attributes {dimension_semantics = [], scalar_prefetch = 0 : i64, scratch_operands = 0 : i64, tpu.core_type = #tpu.core_type<tc>} {
    %c0 = arith.constant 0 : index
    %c0_0 = arith.constant 0 : index
    %0 = vector.load %arg0[%c0, %c0_0] : memref<8x128xf32, #tpu.memory_space<vmem>>, vector<8x128xf32>
    %c0_1 = arith.constant 0 : index
    %c0_2 = arith.constant 0 : index
    %1 = vector.load %arg1[%c0_1, %c0_2] : memref<8x128xf32, #tpu.memory_space<vmem>>, vector<8x128xf32>
    %c0_3 = arith.constant 0 : index
    %c0_4 = arith.constant 0 : index
    %2 = vector.load %arg2[%c0_3, %c0_4] : memref<24x8xf32, #tpu.memory_space<vmem>>, vector<24x8xf32>
    %c0_5 = arith.constant 0 : index
    %c0_6 = arith.constant 0 : index
    %3 = vector.load %arg3[%c0_5, %c0_6] : memref<24x8xf32, #tpu.memory_space<vmem>>, vector<24x8xf32>
    %c0_7 = arith.constant 0 : index
    %c0_8 = arith.constant 0 : index
    %4 = vector.load %arg4[%c0_7, %c0_8] : memref<8x24xf32, #tpu.memory_space<vmem>>, vector<8x24xf32>
    %5 = arith.subf %2, %3 : vector<24x8xf32>
    %c0_9 = arith.constant 0 : index
    %c0_10 = arith.constant 0 : index
    %6 = vector.load %arg5[%c0_9, %c0_10] : memref<8x1xf32, #tpu.memory_space<vmem>>, vector<8x1xf32>
    %7 = vector.shape_cast %6 : vector<8x1xf32> to vector<8x1xf32>
    %8 = vector.broadcast %7 : vector<8x1xf32> to vector<8x128xf32>
    %c0_11 = arith.constant 0 : index
    %c0_12 = arith.constant 0 : index
    %9 = vector.load %arg6[%c0_11, %c0_12] : memref<24x1xf32, #tpu.memory_space<vmem>>, vector<24x1xf32>
    %10 = vector.shape_cast %9 : vector<24x1xf32> to vector<24x1xf32>
    %11 = vector.broadcast %10 : vector<24x1xf32> to vector<24x128xf32>
    %cst = arith.constant dense<0.000000e+00> : vector<24x128xf32>
    %12 = tpu.matmul %5, %1, %cst {dimension_numbers = #tpu.dot_dimension_numbers<[1], [0], [0], [1], [0, 0, 1, 1], [], []>} : vector<24x8xf32>, vector<8x128xf32>, vector<24x128xf32> -> vector<24x128xf32>
    %13 = arith.mulf %12, %12 : vector<24x128xf32>
    %cst_13 = arith.constant dense<0.000000e+00> : vector<24xf32>
    %14 = vector.multi_reduction <add>, %13, %cst_13 [1] : vector<24x128xf32> to vector<24xf32>
    %15 = vector.shape_cast %14 : vector<24xf32> to vector<24x1xf32>
    %c0_14 = arith.constant 0 : index
    %c0_15 = arith.constant 0 : index
    %16 = vector.load %arg8[%c0_14, %c0_15] : memref<2816x128xf32, #tpu.memory_space<vmem>>, vector<128x128xf32>
    %cst_16 = arith.constant dense<0.000000e+00> : vector<8x128xf32>
    %17 = tpu.matmul %0, %16, %cst_16 {dimension_numbers = #tpu.dot_dimension_numbers<[1], [0], [0], [1], [0, 0, 1, 1], [], []>} : vector<8x128xf32>, vector<128x128xf32>, vector<8x128xf32> -> vector<8x128xf32>
    %c0_17 = arith.constant 0 : index
    %c0_18 = arith.constant 0 : index
    %18 = vector.load %arg9[%c0_17, %c0_18] : memref<256x128xf32, #tpu.memory_space<vmem>>, vector<1x128xf32>
    %19 = vector.broadcast %18 : vector<1x128xf32> to vector<8x128xf32>
    %20 = arith.addf %17, %19 : vector<8x128xf32>
    %21 = arith.negf %20 : vector<8x128xf32>
    %22 = math.exp %21 : vector<8x128xf32>
    %cst_19 = arith.constant 1.000000e+00 : f32
    %23 = vector.broadcast %cst_19 : f32 to vector<8x128xf32>
    %24 = arith.addf %23, %22 : vector<8x128xf32>
    %25 = arith.divf %23, %24 : vector<8x128xf32>
    %26 = arith.mulf %20, %25 : vector<8x128xf32>
    %c128 = arith.constant 128 : index
    %c0_20 = arith.constant 0 : index
    %27 = vector.load %arg8[%c128, %c0_20] : memref<2816x128xf32, #tpu.memory_space<vmem>>, vector<128x128xf32>
    %cst_21 = arith.constant dense<0.000000e+00> : vector<8x128xf32>
    %28 = tpu.matmul %26, %27, %cst_21 {dimension_numbers = #tpu.dot_dimension_numbers<[1], [0], [0], [1], [0, 0, 1, 1], [], []>} : vector<8x128xf32>, vector<128x128xf32>, vector<8x128xf32> -> vector<8x128xf32>
    %c8 = arith.constant 8 : index
    %c0_22 = arith.constant 0 : index
    %29 = vector.load %arg9[%c8, %c0_22] : memref<256x128xf32, #tpu.memory_space<vmem>>, vector<1x128xf32>
    %30 = vector.broadcast %29 : vector<1x128xf32> to vector<8x128xf32>
    %31 = arith.addf %28, %30 : vector<8x128xf32>
    %32 = arith.negf %31 : vector<8x128xf32>
    %33 = math.exp %32 : vector<8x128xf32>
    %cst_23 = arith.constant 1.000000e+00 : f32
    %34 = vector.broadcast %cst_23 : f32 to vector<8x128xf32>
    %35 = arith.addf %34, %33 : vector<8x128xf32>
    %36 = arith.divf %34, %35 : vector<8x128xf32>
    %37 = arith.mulf %31, %36 : vector<8x128xf32>
    %cst_24 = arith.constant 9.99999993E-9 : f32
    %38 = vector.broadcast %cst_24 : f32 to vector<24x1xf32>
    %39 = arith.addf %15, %38 : vector<24x1xf32>
    %40 = math.sqrt %39 : vector<24x1xf32>
    %cst_25 = arith.constant 1.000000e+00 : f32
    %41 = vector.broadcast %cst_25 : f32 to vector<24x1xf32>
    %42 = arith.addf %40, %41 : vector<24x1xf32>
    %43 = tpu.reciprocal %42 {approx = true} : vector<24x1xf32> -> vector<24x1xf32>
    %44 = vector.broadcast %43 : vector<24x1xf32> to vector<24x128xf32>
    %45 = arith.mulf %12, %44 : vector<24x128xf32>
    %c16 = arith.constant 16 : index
    %c0_26 = arith.constant 0 : index
    %46 = vector.load %arg9[%c16, %c0_26] : memref<256x128xf32, #tpu.memory_space<vmem>>, vector<2x128xf32>
    %47 = vector.extract_strided_slice %46 {offsets = [0, 0], sizes = [1, 128], strides = [1, 1]} : vector<2x128xf32> to vector<1x128xf32>
    %48 = vector.broadcast %15 : vector<24x1xf32> to vector<24x128xf32>
    %49 = vector.broadcast %47 : vector<1x128xf32> to vector<24x128xf32>
    %50 = arith.mulf %48, %49 : vector<24x128xf32>
    %51 = vector.extract_strided_slice %46 {offsets = [1, 0], sizes = [1, 128], strides = [1, 1]} : vector<2x128xf32> to vector<1x128xf32>
    %52 = vector.broadcast %15 : vector<24x1xf32> to vector<24x128xf32>
    %53 = vector.broadcast %51 : vector<1x128xf32> to vector<24x128xf32>
    %54 = arith.mulf %52, %53 : vector<24x128xf32>
    %55 = arith.addf %50, %54 : vector<24x128xf32>
    %c0_27 = arith.constant 0 : index
    %c0_28 = arith.constant 0 : index
    %56 = vector.load %arg7[%c0_27, %c0_28] : memref<768x256xf32, #tpu.memory_space<vmem>>, vector<128x256xf32>
    %cst_29 = arith.constant dense<0.000000e+00> : vector<8x256xf32>
    %57 = tpu.matmul %37, %56, %cst_29 {dimension_numbers = #tpu.dot_dimension_numbers<[1], [0], [0], [1], [0, 0, 1, 1], [], []>} : vector<8x128xf32>, vector<128x256xf32>, vector<8x256xf32> -> vector<8x256xf32>
    %58 = vector.extract_strided_slice %57 {offsets = [0, 0], sizes = [8, 128], strides = [1, 1]} : vector<8x256xf32> to vector<8x128xf32>
    %cst_30 = arith.constant dense<0.000000e+00> : vector<24x128xf32>
    %59 = tpu.matmul %2, %58, %cst_30 {dimension_numbers = #tpu.dot_dimension_numbers<[1], [0], [0], [1], [0, 0, 1, 1], [], []>} : vector<24x8xf32>, vector<8x128xf32>, vector<24x128xf32> -> vector<24x128xf32>
    %60 = vector.extract_strided_slice %57 {offsets = [0, 128], sizes = [8, 128], strides = [1, 1]} : vector<8x256xf32> to vector<8x128xf32>
    %cst_31 = arith.constant dense<0.000000e+00> : vector<24x128xf32>
    %61 = tpu.matmul %3, %60, %cst_31 {dimension_numbers = #tpu.dot_dimension_numbers<[1], [0], [0], [1], [0, 0, 1, 1], [], []>} : vector<24x8xf32>, vector<8x128xf32>, vector<24x128xf32> -> vector<24x128xf32>
    %62 = arith.addf %59, %61 : vector<24x128xf32>
    %63 = arith.addf %62, %55 : vector<24x128xf32>
    %c24 = arith.constant 24 : index
    %c0_32 = arith.constant 0 : index
    %64 = vector.load %arg9[%c24, %c0_32] : memref<256x128xf32, #tpu.memory_space<vmem>>, vector<1x128xf32>
    %65 = vector.broadcast %64 : vector<1x128xf32> to vector<24x128xf32>
    %66 = arith.addf %63, %65 : vector<24x128xf32>
    %67 = arith.negf %66 : vector<24x128xf32>
    %68 = math.exp %67 : vector<24x128xf32>
    %cst_33 = arith.constant 1.000000e+00 : f32
    %69 = vector.broadcast %cst_33 : f32 to vector<24x128xf32>
    %70 = arith.addf %69, %68 : vector<24x128xf32>
    %71 = arith.divf %69, %70 : vector<24x128xf32>
    %72 = arith.mulf %66, %71 : vector<24x128xf32>
    %c256 = arith.constant 256 : index
    %c0_34 = arith.constant 0 : index
    %73 = vector.load %arg8[%c256, %c0_34] : memref<2816x128xf32, #tpu.memory_space<vmem>>, vector<128x128xf32>
    %cst_35 = arith.constant dense<0.000000e+00> : vector<24x128xf32>
    %74 = tpu.matmul %72, %73, %cst_35 {dimension_numbers = #tpu.dot_dimension_numbers<[1], [0], [0], [1], [0, 0, 1, 1], [], []>} : vector<24x128xf32>, vector<128x128xf32>, vector<24x128xf32> -> vector<24x128xf32>
    %c32 = arith.constant 32 : index
    %c0_36 = arith.constant 0 : index
    %75 = vector.load %arg9[%c32, %c0_36] : memref<256x128xf32, #tpu.memory_space<vmem>>, vector<1x128xf32>
    %76 = vector.broadcast %75 : vector<1x128xf32> to vector<24x128xf32>
    %77 = arith.addf %74, %76 : vector<24x128xf32>
    %78 = arith.negf %77 : vector<24x128xf32>
    %79 = math.exp %78 : vector<24x128xf32>
    %cst_37 = arith.constant 1.000000e+00 : f32
    %80 = vector.broadcast %cst_37 : f32 to vector<24x128xf32>
    %81 = arith.addf %80, %79 : vector<24x128xf32>
    %82 = arith.divf %80, %81 : vector<24x128xf32>
    %83 = arith.mulf %77, %82 : vector<24x128xf32>
    %84 = arith.mulf %83, %11 : vector<24x128xf32>
    %cst_38 = arith.constant dense<0.000000e+00> : vector<8x128xf32>
    %85 = tpu.matmul %4, %84, %cst_38 {dimension_numbers = #tpu.dot_dimension_numbers<[1], [0], [0], [1], [0, 0, 1, 1], [], []>} : vector<8x24xf32>, vector<24x128xf32>, vector<8x128xf32> -> vector<8x128xf32>
    %86 = tpu.concatenate %37, %85 in 1 : vector<8x128xf32>, vector<8x128xf32> -> vector<8x256xf32>
    %c384 = arith.constant 384 : index
    %c0_39 = arith.constant 0 : index
    %87 = vector.load %arg8[%c384, %c0_39] : memref<2816x128xf32, #tpu.memory_space<vmem>>, vector<256x128xf32>
    %cst_40 = arith.constant dense<0.000000e+00> : vector<8x128xf32>
    %88 = tpu.matmul %86, %87, %cst_40 {dimension_numbers = #tpu.dot_dimension_numbers<[1], [0], [0], [1], [0, 0, 1, 1], [], []>} : vector<8x256xf32>, vector<256x128xf32>, vector<8x128xf32> -> vector<8x128xf32>
    %c40 = arith.constant 40 : index
    %c0_41 = arith.constant 0 : index
    %89 = vector.load %arg9[%c40, %c0_41] : memref<256x128xf32, #tpu.memory_space<vmem>>, vector<1x128xf32>
    %90 = vector.broadcast %89 : vector<1x128xf32> to vector<8x128xf32>
    %91 = arith.addf %88, %90 : vector<8x128xf32>
    %92 = arith.negf %91 : vector<8x128xf32>
    %93 = math.exp %92 : vector<8x128xf32>
    %cst_42 = arith.constant 1.000000e+00 : f32
    %94 = vector.broadcast %cst_42 : f32 to vector<8x128xf32>
    %95 = arith.addf %94, %93 : vector<8x128xf32>
    %96 = arith.divf %94, %95 : vector<8x128xf32>
    %97 = arith.mulf %91, %96 : vector<8x128xf32>
    %c640 = arith.constant 640 : index
    %c0_43 = arith.constant 0 : index
    %98 = vector.load %arg8[%c640, %c0_43] : memref<2816x128xf32, #tpu.memory_space<vmem>>, vector<128x128xf32>
    %cst_44 = arith.constant dense<0.000000e+00> : vector<8x128xf32>
    %99 = tpu.matmul %97, %98, %cst_44 {dimension_numbers = #tpu.dot_dimension_numbers<[1], [0], [0], [1], [0, 0, 1, 1], [], []>} : vector<8x128xf32>, vector<128x128xf32>, vector<8x128xf32> -> vector<8x128xf32>
    %c48 = arith.constant 48 : index
    %c0_45 = arith.constant 0 : index
    %100 = vector.load %arg9[%c48, %c0_45] : memref<256x128xf32, #tpu.memory_space<vmem>>, vector<1x128xf32>
    %101 = vector.broadcast %100 : vector<1x128xf32> to vector<8x128xf32>
    %102 = arith.addf %99, %101 : vector<8x128xf32>
    %103 = arith.addf %37, %102 : vector<8x128xf32>
    %104 = arith.mulf %103, %8 : vector<8x128xf32>
    %c56 = arith.constant 56 : index
    %c0_46 = arith.constant 0 : index
    %105 = vector.load %arg9[%c56, %c0_46] : memref<256x128xf32, #tpu.memory_space<vmem>>, vector<2x128xf32>
    %106 = vector.extract_strided_slice %105 {offsets = [0, 0], sizes = [1, 128], strides = [1, 1]} : vector<2x128xf32> to vector<1x128xf32>
    %107 = vector.broadcast %15 : vector<24x1xf32> to vector<24x128xf32>
    %108 = vector.broadcast %106 : vector<1x128xf32> to vector<24x128xf32>
    %109 = arith.mulf %107, %108 : vector<24x128xf32>
    %110 = vector.extract_strided_slice %105 {offsets = [1, 0], sizes = [1, 128], strides = [1, 1]} : vector<2x128xf32> to vector<1x128xf32>
    %111 = vector.broadcast %15 : vector<24x1xf32> to vector<24x128xf32>
    %112 = vector.broadcast %110 : vector<1x128xf32> to vector<24x128xf32>
    %113 = arith.mulf %111, %112 : vector<24x128xf32>
    %114 = arith.addf %109, %113 : vector<24x128xf32>
    %c128_47 = arith.constant 128 : index
    %c0_48 = arith.constant 0 : index
    %115 = vector.load %arg7[%c128_47, %c0_48] : memref<768x256xf32, #tpu.memory_space<vmem>>, vector<128x256xf32>
    %cst_49 = arith.constant dense<0.000000e+00> : vector<8x256xf32>
    %116 = tpu.matmul %104, %115, %cst_49 {dimension_numbers = #tpu.dot_dimension_numbers<[1], [0], [0], [1], [0, 0, 1, 1], [], []>} : vector<8x128xf32>, vector<128x256xf32>, vector<8x256xf32> -> vector<8x256xf32>
    %117 = vector.extract_strided_slice %116 {offsets = [0, 0], sizes = [8, 128], strides = [1, 1]} : vector<8x256xf32> to vector<8x128xf32>
    %cst_50 = arith.constant dense<0.000000e+00> : vector<24x128xf32>
    %118 = tpu.matmul %2, %117, %cst_50 {dimension_numbers = #tpu.dot_dimension_numbers<[1], [0], [0], [1], [0, 0, 1, 1], [], []>} : vector<24x8xf32>, vector<8x128xf32>, vector<24x128xf32> -> vector<24x128xf32>
    %119 = vector.extract_strided_slice %116 {offsets = [0, 128], sizes = [8, 128], strides = [1, 1]} : vector<8x256xf32> to vector<8x128xf32>
    %cst_51 = arith.constant dense<0.000000e+00> : vector<24x128xf32>
    %120 = tpu.matmul %3, %119, %cst_51 {dimension_numbers = #tpu.dot_dimension_numbers<[1], [0], [0], [1], [0, 0, 1, 1], [], []>} : vector<24x8xf32>, vector<8x128xf32>, vector<24x128xf32> -> vector<24x128xf32>
    %121 = arith.addf %118, %120 : vector<24x128xf32>
    %122 = arith.addf %121, %114 : vector<24x128xf32>
    %c64 = arith.constant 64 : index
    %c0_52 = arith.constant 0 : index
    %123 = vector.load %arg9[%c64, %c0_52] : memref<256x128xf32, #tpu.memory_space<vmem>>, vector<1x128xf32>
    %124 = vector.broadcast %123 : vector<1x128xf32> to vector<24x128xf32>
    %125 = arith.addf %122, %124 : vector<24x128xf32>
    %126 = arith.negf %125 : vector<24x128xf32>
    %127 = math.exp %126 : vector<24x128xf32>
    %cst_53 = arith.constant 1.000000e+00 : f32
    %128 = vector.broadcast %cst_53 : f32 to vector<24x128xf32>
    %129 = arith.addf %128, %127 : vector<24x128xf32>
    %130 = arith.divf %128, %129 : vector<24x128xf32>
    %131 = arith.mulf %125, %130 : vector<24x128xf32>
    %c768 = arith.constant 768 : index
    %c0_54 = arith.constant 0 : index
    %132 = vector.load %arg8[%c768, %c0_54] : memref<2816x128xf32, #tpu.memory_space<vmem>>, vector<128x128xf32>
    %cst_55 = arith.constant dense<0.000000e+00> : vector<24x128xf32>
    %133 = tpu.matmul %131, %132, %cst_55 {dimension_numbers = #tpu.dot_dimension_numbers<[1], [0], [0], [1], [0, 0, 1, 1], [], []>} : vector<24x128xf32>, vector<128x128xf32>, vector<24x128xf32> -> vector<24x128xf32>
    %c72 = arith.constant 72 : index
    %c0_56 = arith.constant 0 : index
    %134 = vector.load %arg9[%c72, %c0_56] : memref<256x128xf32, #tpu.memory_space<vmem>>, vector<1x128xf32>
    %135 = vector.broadcast %134 : vector<1x128xf32> to vector<24x128xf32>
    %136 = arith.addf %133, %135 : vector<24x128xf32>
    %137 = arith.negf %136 : vector<24x128xf32>
    %138 = math.exp %137 : vector<24x128xf32>
    %cst_57 = arith.constant 1.000000e+00 : f32
    %139 = vector.broadcast %cst_57 : f32 to vector<24x128xf32>
    %140 = arith.addf %139, %138 : vector<24x128xf32>
    %141 = arith.divf %139, %140 : vector<24x128xf32>
    %142 = arith.mulf %136, %141 : vector<24x128xf32>
    %143 = arith.mulf %142, %11 : vector<24x128xf32>
    %cst_58 = arith.constant dense<0.000000e+00> : vector<8x128xf32>
    %144 = tpu.matmul %4, %143, %cst_58 {dimension_numbers = #tpu.dot_dimension_numbers<[1], [0], [0], [1], [0, 0, 1, 1], [], []>} : vector<8x24xf32>, vector<24x128xf32>, vector<8x128xf32> -> vector<8x128xf32>
    %145 = tpu.concatenate %104, %144 in 1 : vector<8x128xf32>, vector<8x128xf32> -> vector<8x256xf32>
    %c896 = arith.constant 896 : index
    %c0_59 = arith.constant 0 : index
    %146 = vector.load %arg8[%c896, %c0_59] : memref<2816x128xf32, #tpu.memory_space<vmem>>, vector<256x128xf32>
    %cst_60 = arith.constant dense<0.000000e+00> : vector<8x128xf32>
    %147 = tpu.matmul %145, %146, %cst_60 {dimension_numbers = #tpu.dot_dimension_numbers<[1], [0], [0], [1], [0, 0, 1, 1], [], []>} : vector<8x256xf32>, vector<256x128xf32>, vector<8x128xf32> -> vector<8x128xf32>
    %c80 = arith.constant 80 : index
    %c0_61 = arith.constant 0 : index
    %148 = vector.load %arg9[%c80, %c0_61] : memref<256x128xf32, #tpu.memory_space<vmem>>, vector<1x128xf32>
    %149 = vector.broadcast %148 : vector<1x128xf32> to vector<8x128xf32>
    %150 = arith.addf %147, %149 : vector<8x128xf32>
    %151 = arith.negf %150 : vector<8x128xf32>
    %152 = math.exp %151 : vector<8x128xf32>
    %cst_62 = arith.constant 1.000000e+00 : f32
    %153 = vector.broadcast %cst_62 : f32 to vector<8x128xf32>
    %154 = arith.addf %153, %152 : vector<8x128xf32>
    %155 = arith.divf %153, %154 : vector<8x128xf32>
    %156 = arith.mulf %150, %155 : vector<8x128xf32>
    %c1152 = arith.constant 1152 : index
    %c0_63 = arith.constant 0 : index
    %157 = vector.load %arg8[%c1152, %c0_63] : memref<2816x128xf32, #tpu.memory_space<vmem>>, vector<128x128xf32>
    %cst_64 = arith.constant dense<0.000000e+00> : vector<8x128xf32>
    %158 = tpu.matmul %156, %157, %cst_64 {dimension_numbers = #tpu.dot_dimension_numbers<[1], [0], [0], [1], [0, 0, 1, 1], [], []>} : vector<8x128xf32>, vector<128x128xf32>, vector<8x128xf32> -> vector<8x128xf32>
    %c88 = arith.constant 88 : index
    %c0_65 = arith.constant 0 : index
    %159 = vector.load %arg9[%c88, %c0_65] : memref<256x128xf32, #tpu.memory_space<vmem>>, vector<1x128xf32>
    %160 = vector.broadcast %159 : vector<1x128xf32> to vector<8x128xf32>
    %161 = arith.addf %158, %160 : vector<8x128xf32>
    %162 = arith.addf %104, %161 : vector<8x128xf32>
    %163 = arith.mulf %162, %8 : vector<8x128xf32>
    %c96 = arith.constant 96 : index
    %c0_66 = arith.constant 0 : index
    %164 = vector.load %arg9[%c96, %c0_66] : memref<256x128xf32, #tpu.memory_space<vmem>>, vector<2x128xf32>
    %165 = vector.extract_strided_slice %164 {offsets = [0, 0], sizes = [1, 128], strides = [1, 1]} : vector<2x128xf32> to vector<1x128xf32>
    %166 = vector.broadcast %15 : vector<24x1xf32> to vector<24x128xf32>
    %167 = vector.broadcast %165 : vector<1x128xf32> to vector<24x128xf32>
    %168 = arith.mulf %166, %167 : vector<24x128xf32>
    %169 = vector.extract_strided_slice %164 {offsets = [1, 0], sizes = [1, 128], strides = [1, 1]} : vector<2x128xf32> to vector<1x128xf32>
    %170 = vector.broadcast %15 : vector<24x1xf32> to vector<24x128xf32>
    %171 = vector.broadcast %169 : vector<1x128xf32> to vector<24x128xf32>
    %172 = arith.mulf %170, %171 : vector<24x128xf32>
    %173 = arith.addf %168, %172 : vector<24x128xf32>
    %c256_67 = arith.constant 256 : index
    %c0_68 = arith.constant 0 : index
    %174 = vector.load %arg7[%c256_67, %c0_68] : memref<768x256xf32, #tpu.memory_space<vmem>>, vector<128x256xf32>
    %cst_69 = arith.constant dense<0.000000e+00> : vector<8x256xf32>
    %175 = tpu.matmul %163, %174, %cst_69 {dimension_numbers = #tpu.dot_dimension_numbers<[1], [0], [0], [1], [0, 0, 1, 1], [], []>} : vector<8x128xf32>, vector<128x256xf32>, vector<8x256xf32> -> vector<8x256xf32>
    %176 = vector.extract_strided_slice %175 {offsets = [0, 0], sizes = [8, 128], strides = [1, 1]} : vector<8x256xf32> to vector<8x128xf32>
    %cst_70 = arith.constant dense<0.000000e+00> : vector<24x128xf32>
    %177 = tpu.matmul %2, %176, %cst_70 {dimension_numbers = #tpu.dot_dimension_numbers<[1], [0], [0], [1], [0, 0, 1, 1], [], []>} : vector<24x8xf32>, vector<8x128xf32>, vector<24x128xf32> -> vector<24x128xf32>
    %178 = vector.extract_strided_slice %175 {offsets = [0, 128], sizes = [8, 128], strides = [1, 1]} : vector<8x256xf32> to vector<8x128xf32>
    %cst_71 = arith.constant dense<0.000000e+00> : vector<24x128xf32>
    %179 = tpu.matmul %3, %178, %cst_71 {dimension_numbers = #tpu.dot_dimension_numbers<[1], [0], [0], [1], [0, 0, 1, 1], [], []>} : vector<24x8xf32>, vector<8x128xf32>, vector<24x128xf32> -> vector<24x128xf32>
    %180 = arith.addf %177, %179 : vector<24x128xf32>
    %181 = arith.addf %180, %173 : vector<24x128xf32>
    %c104 = arith.constant 104 : index
    %c0_72 = arith.constant 0 : index
    %182 = vector.load %arg9[%c104, %c0_72] : memref<256x128xf32, #tpu.memory_space<vmem>>, vector<1x128xf32>
    %183 = vector.broadcast %182 : vector<1x128xf32> to vector<24x128xf32>
    %184 = arith.addf %181, %183 : vector<24x128xf32>
    %185 = arith.negf %184 : vector<24x128xf32>
    %186 = math.exp %185 : vector<24x128xf32>
    %cst_73 = arith.constant 1.000000e+00 : f32
    %187 = vector.broadcast %cst_73 : f32 to vector<24x128xf32>
    %188 = arith.addf %187, %186 : vector<24x128xf32>
    %189 = arith.divf %187, %188 : vector<24x128xf32>
    %190 = arith.mulf %184, %189 : vector<24x128xf32>
    %c1280 = arith.constant 1280 : index
    %c0_74 = arith.constant 0 : index
    %191 = vector.load %arg8[%c1280, %c0_74] : memref<2816x128xf32, #tpu.memory_space<vmem>>, vector<128x128xf32>
    %cst_75 = arith.constant dense<0.000000e+00> : vector<24x128xf32>
    %192 = tpu.matmul %190, %191, %cst_75 {dimension_numbers = #tpu.dot_dimension_numbers<[1], [0], [0], [1], [0, 0, 1, 1], [], []>} : vector<24x128xf32>, vector<128x128xf32>, vector<24x128xf32> -> vector<24x128xf32>
    %c112 = arith.constant 112 : index
    %c0_76 = arith.constant 0 : index
    %193 = vector.load %arg9[%c112, %c0_76] : memref<256x128xf32, #tpu.memory_space<vmem>>, vector<1x128xf32>
    %194 = vector.broadcast %193 : vector<1x128xf32> to vector<24x128xf32>
    %195 = arith.addf %192, %194 : vector<24x128xf32>
    %196 = arith.negf %195 : vector<24x128xf32>
    %197 = math.exp %196 : vector<24x128xf32>
    %cst_77 = arith.constant 1.000000e+00 : f32
    %198 = vector.broadcast %cst_77 : f32 to vector<24x128xf32>
    %199 = arith.addf %198, %197 : vector<24x128xf32>
    %200 = arith.divf %198, %199 : vector<24x128xf32>
    %201 = arith.mulf %195, %200 : vector<24x128xf32>
    %c120 = arith.constant 120 : index
    %c0_78 = arith.constant 0 : index
    %202 = vector.load %arg9[%c120, %c0_78] : memref<256x128xf32, #tpu.memory_space<vmem>>, vector<1x128xf32>
    %203 = vector.broadcast %202 : vector<1x128xf32> to vector<24x128xf32>
    %204 = arith.mulf %201, %203 : vector<24x128xf32>
    %cst_79 = arith.constant dense<0.000000e+00> : vector<24xf32>
    %205 = vector.multi_reduction <add>, %204, %cst_79 [1] : vector<24x128xf32> to vector<24xf32>
    %206 = vector.shape_cast %205 : vector<24xf32> to vector<24x1xf32>
    %207 = vector.broadcast %206 : vector<24x1xf32> to vector<24x128xf32>
    %208 = arith.mulf %45, %207 : vector<24x128xf32>
    %209 = arith.mulf %208, %11 : vector<24x128xf32>
    %cst_80 = arith.constant dense<0.000000e+00> : vector<8x128xf32>
    %210 = tpu.matmul %4, %209, %cst_80 {dimension_numbers = #tpu.dot_dimension_numbers<[1], [0], [0], [1], [0, 0, 1, 1], [], []>} : vector<8x24xf32>, vector<24x128xf32>, vector<8x128xf32> -> vector<8x128xf32>
    %211 = arith.addf %1, %210 : vector<8x128xf32>
    %212 = arith.mulf %211, %8 : vector<8x128xf32>
    %213 = arith.mulf %163, %8 : vector<8x128xf32>
    %cst_81 = arith.constant dense<0.000000e+00> : vector<24x128xf32>
    %214 = tpu.matmul %5, %212, %cst_81 {dimension_numbers = #tpu.dot_dimension_numbers<[1], [0], [0], [1], [0, 0, 1, 1], [], []>} : vector<24x8xf32>, vector<8x128xf32>, vector<24x128xf32> -> vector<24x128xf32>
    %215 = arith.mulf %214, %214 : vector<24x128xf32>
    %cst_82 = arith.constant dense<0.000000e+00> : vector<24xf32>
    %216 = vector.multi_reduction <add>, %215, %cst_82 [1] : vector<24x128xf32> to vector<24xf32>
    %217 = vector.shape_cast %216 : vector<24xf32> to vector<24x1xf32>
    %cst_83 = arith.constant 9.99999993E-9 : f32
    %218 = vector.broadcast %cst_83 : f32 to vector<24x1xf32>
    %219 = arith.addf %217, %218 : vector<24x1xf32>
    %220 = math.sqrt %219 : vector<24x1xf32>
    %cst_84 = arith.constant 1.000000e+00 : f32
    %221 = vector.broadcast %cst_84 : f32 to vector<24x1xf32>
    %222 = arith.addf %220, %221 : vector<24x1xf32>
    %223 = tpu.reciprocal %222 {approx = true} : vector<24x1xf32> -> vector<24x1xf32>
    %224 = vector.broadcast %223 : vector<24x1xf32> to vector<24x128xf32>
    %225 = arith.mulf %214, %224 : vector<24x128xf32>
    %c128_85 = arith.constant 128 : index
    %c0_86 = arith.constant 0 : index
    %226 = vector.load %arg9[%c128_85, %c0_86] : memref<256x128xf32, #tpu.memory_space<vmem>>, vector<2x128xf32>
    %227 = vector.extract_strided_slice %226 {offsets = [0, 0], sizes = [1, 128], strides = [1, 1]} : vector<2x128xf32> to vector<1x128xf32>
    %228 = vector.broadcast %217 : vector<24x1xf32> to vector<24x128xf32>
    %229 = vector.broadcast %227 : vector<1x128xf32> to vector<24x128xf32>
    %230 = arith.mulf %228, %229 : vector<24x128xf32>
    %231 = vector.extract_strided_slice %226 {offsets = [1, 0], sizes = [1, 128], strides = [1, 1]} : vector<2x128xf32> to vector<1x128xf32>
    %232 = vector.broadcast %15 : vector<24x1xf32> to vector<24x128xf32>
    %233 = vector.broadcast %231 : vector<1x128xf32> to vector<24x128xf32>
    %234 = arith.mulf %232, %233 : vector<24x128xf32>
    %235 = arith.addf %230, %234 : vector<24x128xf32>
    %c384_87 = arith.constant 384 : index
    %c0_88 = arith.constant 0 : index
    %236 = vector.load %arg7[%c384_87, %c0_88] : memref<768x256xf32, #tpu.memory_space<vmem>>, vector<128x256xf32>
    %cst_89 = arith.constant dense<0.000000e+00> : vector<8x256xf32>
    %237 = tpu.matmul %213, %236, %cst_89 {dimension_numbers = #tpu.dot_dimension_numbers<[1], [0], [0], [1], [0, 0, 1, 1], [], []>} : vector<8x128xf32>, vector<128x256xf32>, vector<8x256xf32> -> vector<8x256xf32>
    %238 = vector.extract_strided_slice %237 {offsets = [0, 0], sizes = [8, 128], strides = [1, 1]} : vector<8x256xf32> to vector<8x128xf32>
    %cst_90 = arith.constant dense<0.000000e+00> : vector<24x128xf32>
    %239 = tpu.matmul %2, %238, %cst_90 {dimension_numbers = #tpu.dot_dimension_numbers<[1], [0], [0], [1], [0, 0, 1, 1], [], []>} : vector<24x8xf32>, vector<8x128xf32>, vector<24x128xf32> -> vector<24x128xf32>
    %240 = vector.extract_strided_slice %237 {offsets = [0, 128], sizes = [8, 128], strides = [1, 1]} : vector<8x256xf32> to vector<8x128xf32>
    %cst_91 = arith.constant dense<0.000000e+00> : vector<24x128xf32>
    %241 = tpu.matmul %3, %240, %cst_91 {dimension_numbers = #tpu.dot_dimension_numbers<[1], [0], [0], [1], [0, 0, 1, 1], [], []>} : vector<24x8xf32>, vector<8x128xf32>, vector<24x128xf32> -> vector<24x128xf32>
    %242 = arith.addf %239, %241 : vector<24x128xf32>
    %243 = arith.addf %242, %235 : vector<24x128xf32>
    %c136 = arith.constant 136 : index
    %c0_92 = arith.constant 0 : index
    %244 = vector.load %arg9[%c136, %c0_92] : memref<256x128xf32, #tpu.memory_space<vmem>>, vector<1x128xf32>
    %245 = vector.broadcast %244 : vector<1x128xf32> to vector<24x128xf32>
    %246 = arith.addf %243, %245 : vector<24x128xf32>
    %247 = arith.negf %246 : vector<24x128xf32>
    %248 = math.exp %247 : vector<24x128xf32>
    %cst_93 = arith.constant 1.000000e+00 : f32
    %249 = vector.broadcast %cst_93 : f32 to vector<24x128xf32>
    %250 = arith.addf %249, %248 : vector<24x128xf32>
    %251 = arith.divf %249, %250 : vector<24x128xf32>
    %252 = arith.mulf %246, %251 : vector<24x128xf32>
    %c1408 = arith.constant 1408 : index
    %c0_94 = arith.constant 0 : index
    %253 = vector.load %arg8[%c1408, %c0_94] : memref<2816x128xf32, #tpu.memory_space<vmem>>, vector<128x128xf32>
    %cst_95 = arith.constant dense<0.000000e+00> : vector<24x128xf32>
    %254 = tpu.matmul %252, %253, %cst_95 {dimension_numbers = #tpu.dot_dimension_numbers<[1], [0], [0], [1], [0, 0, 1, 1], [], []>} : vector<24x128xf32>, vector<128x128xf32>, vector<24x128xf32> -> vector<24x128xf32>
    %c144 = arith.constant 144 : index
    %c0_96 = arith.constant 0 : index
    %255 = vector.load %arg9[%c144, %c0_96] : memref<256x128xf32, #tpu.memory_space<vmem>>, vector<1x128xf32>
    %256 = vector.broadcast %255 : vector<1x128xf32> to vector<24x128xf32>
    %257 = arith.addf %254, %256 : vector<24x128xf32>
    %258 = arith.negf %257 : vector<24x128xf32>
    %259 = math.exp %258 : vector<24x128xf32>
    %cst_97 = arith.constant 1.000000e+00 : f32
    %260 = vector.broadcast %cst_97 : f32 to vector<24x128xf32>
    %261 = arith.addf %260, %259 : vector<24x128xf32>
    %262 = arith.divf %260, %261 : vector<24x128xf32>
    %263 = arith.mulf %257, %262 : vector<24x128xf32>
    %264 = arith.mulf %263, %11 : vector<24x128xf32>
    %cst_98 = arith.constant dense<0.000000e+00> : vector<8x128xf32>
    %265 = tpu.matmul %4, %264, %cst_98 {dimension_numbers = #tpu.dot_dimension_numbers<[1], [0], [0], [1], [0, 0, 1, 1], [], []>} : vector<8x24xf32>, vector<24x128xf32>, vector<8x128xf32> -> vector<8x128xf32>
    %266 = tpu.concatenate %213, %265 in 1 : vector<8x128xf32>, vector<8x128xf32> -> vector<8x256xf32>
    %c1536 = arith.constant 1536 : index
    %c0_99 = arith.constant 0 : index
    %267 = vector.load %arg8[%c1536, %c0_99] : memref<2816x128xf32, #tpu.memory_space<vmem>>, vector<256x128xf32>
    %cst_100 = arith.constant dense<0.000000e+00> : vector<8x128xf32>
    %268 = tpu.matmul %266, %267, %cst_100 {dimension_numbers = #tpu.dot_dimension_numbers<[1], [0], [0], [1], [0, 0, 1, 1], [], []>} : vector<8x256xf32>, vector<256x128xf32>, vector<8x128xf32> -> vector<8x128xf32>
    %c152 = arith.constant 152 : index
    %c0_101 = arith.constant 0 : index
    %269 = vector.load %arg9[%c152, %c0_101] : memref<256x128xf32, #tpu.memory_space<vmem>>, vector<1x128xf32>
    %270 = vector.broadcast %269 : vector<1x128xf32> to vector<8x128xf32>
    %271 = arith.addf %268, %270 : vector<8x128xf32>
    %272 = arith.negf %271 : vector<8x128xf32>
    %273 = math.exp %272 : vector<8x128xf32>
    %cst_102 = arith.constant 1.000000e+00 : f32
    %274 = vector.broadcast %cst_102 : f32 to vector<8x128xf32>
    %275 = arith.addf %274, %273 : vector<8x128xf32>
    %276 = arith.divf %274, %275 : vector<8x128xf32>
    %277 = arith.mulf %271, %276 : vector<8x128xf32>
    %c1792 = arith.constant 1792 : index
    %c0_103 = arith.constant 0 : index
    %278 = vector.load %arg8[%c1792, %c0_103] : memref<2816x128xf32, #tpu.memory_space<vmem>>, vector<128x128xf32>
    %cst_104 = arith.constant dense<0.000000e+00> : vector<8x128xf32>
    %279 = tpu.matmul %277, %278, %cst_104 {dimension_numbers = #tpu.dot_dimension_numbers<[1], [0], [0], [1], [0, 0, 1, 1], [], []>} : vector<8x128xf32>, vector<128x128xf32>, vector<8x128xf32> -> vector<8x128xf32>
    %c160 = arith.constant 160 : index
    %c0_105 = arith.constant 0 : index
    %280 = vector.load %arg9[%c160, %c0_105] : memref<256x128xf32, #tpu.memory_space<vmem>>, vector<1x128xf32>
    %281 = vector.broadcast %280 : vector<1x128xf32> to vector<8x128xf32>
    %282 = arith.addf %279, %281 : vector<8x128xf32>
    %283 = arith.addf %213, %282 : vector<8x128xf32>
    %284 = arith.mulf %283, %8 : vector<8x128xf32>
    %c168 = arith.constant 168 : index
    %c0_106 = arith.constant 0 : index
    %285 = vector.load %arg9[%c168, %c0_106] : memref<256x128xf32, #tpu.memory_space<vmem>>, vector<2x128xf32>
    %286 = vector.extract_strided_slice %285 {offsets = [0, 0], sizes = [1, 128], strides = [1, 1]} : vector<2x128xf32> to vector<1x128xf32>
    %287 = vector.broadcast %217 : vector<24x1xf32> to vector<24x128xf32>
    %288 = vector.broadcast %286 : vector<1x128xf32> to vector<24x128xf32>
    %289 = arith.mulf %287, %288 : vector<24x128xf32>
    %290 = vector.extract_strided_slice %285 {offsets = [1, 0], sizes = [1, 128], strides = [1, 1]} : vector<2x128xf32> to vector<1x128xf32>
    %291 = vector.broadcast %15 : vector<24x1xf32> to vector<24x128xf32>
    %292 = vector.broadcast %290 : vector<1x128xf32> to vector<24x128xf32>
    %293 = arith.mulf %291, %292 : vector<24x128xf32>
    %294 = arith.addf %289, %293 : vector<24x128xf32>
    %c512 = arith.constant 512 : index
    %c0_107 = arith.constant 0 : index
    %295 = vector.load %arg7[%c512, %c0_107] : memref<768x256xf32, #tpu.memory_space<vmem>>, vector<128x256xf32>
    %cst_108 = arith.constant dense<0.000000e+00> : vector<8x256xf32>
    %296 = tpu.matmul %284, %295, %cst_108 {dimension_numbers = #tpu.dot_dimension_numbers<[1], [0], [0], [1], [0, 0, 1, 1], [], []>} : vector<8x128xf32>, vector<128x256xf32>, vector<8x256xf32> -> vector<8x256xf32>
    %297 = vector.extract_strided_slice %296 {offsets = [0, 0], sizes = [8, 128], strides = [1, 1]} : vector<8x256xf32> to vector<8x128xf32>
    %cst_109 = arith.constant dense<0.000000e+00> : vector<24x128xf32>
    %298 = tpu.matmul %2, %297, %cst_109 {dimension_numbers = #tpu.dot_dimension_numbers<[1], [0], [0], [1], [0, 0, 1, 1], [], []>} : vector<24x8xf32>, vector<8x128xf32>, vector<24x128xf32> -> vector<24x128xf32>
    %299 = vector.extract_strided_slice %296 {offsets = [0, 128], sizes = [8, 128], strides = [1, 1]} : vector<8x256xf32> to vector<8x128xf32>
    %cst_110 = arith.constant dense<0.000000e+00> : vector<24x128xf32>
    %300 = tpu.matmul %3, %299, %cst_110 {dimension_numbers = #tpu.dot_dimension_numbers<[1], [0], [0], [1], [0, 0, 1, 1], [], []>} : vector<24x8xf32>, vector<8x128xf32>, vector<24x128xf32> -> vector<24x128xf32>
    %301 = arith.addf %298, %300 : vector<24x128xf32>
    %302 = arith.addf %301, %294 : vector<24x128xf32>
    %c176 = arith.constant 176 : index
    %c0_111 = arith.constant 0 : index
    %303 = vector.load %arg9[%c176, %c0_111] : memref<256x128xf32, #tpu.memory_space<vmem>>, vector<1x128xf32>
    %304 = vector.broadcast %303 : vector<1x128xf32> to vector<24x128xf32>
    %305 = arith.addf %302, %304 : vector<24x128xf32>
    %306 = arith.negf %305 : vector<24x128xf32>
    %307 = math.exp %306 : vector<24x128xf32>
    %cst_112 = arith.constant 1.000000e+00 : f32
    %308 = vector.broadcast %cst_112 : f32 to vector<24x128xf32>
    %309 = arith.addf %308, %307 : vector<24x128xf32>
    %310 = arith.divf %308, %309 : vector<24x128xf32>
    %311 = arith.mulf %305, %310 : vector<24x128xf32>
    %c1920 = arith.constant 1920 : index
    %c0_113 = arith.constant 0 : index
    %312 = vector.load %arg8[%c1920, %c0_113] : memref<2816x128xf32, #tpu.memory_space<vmem>>, vector<128x128xf32>
    %cst_114 = arith.constant dense<0.000000e+00> : vector<24x128xf32>
    %313 = tpu.matmul %311, %312, %cst_114 {dimension_numbers = #tpu.dot_dimension_numbers<[1], [0], [0], [1], [0, 0, 1, 1], [], []>} : vector<24x128xf32>, vector<128x128xf32>, vector<24x128xf32> -> vector<24x128xf32>
    %c184 = arith.constant 184 : index
    %c0_115 = arith.constant 0 : index
    %314 = vector.load %arg9[%c184, %c0_115] : memref<256x128xf32, #tpu.memory_space<vmem>>, vector<1x128xf32>
    %315 = vector.broadcast %314 : vector<1x128xf32> to vector<24x128xf32>
    %316 = arith.addf %313, %315 : vector<24x128xf32>
    %317 = arith.negf %316 : vector<24x128xf32>
    %318 = math.exp %317 : vector<24x128xf32>
    %cst_116 = arith.constant 1.000000e+00 : f32
    %319 = vector.broadcast %cst_116 : f32 to vector<24x128xf32>
    %320 = arith.addf %319, %318 : vector<24x128xf32>
    %321 = arith.divf %319, %320 : vector<24x128xf32>
    %322 = arith.mulf %316, %321 : vector<24x128xf32>
    %323 = arith.mulf %322, %11 : vector<24x128xf32>
    %cst_117 = arith.constant dense<0.000000e+00> : vector<8x128xf32>
    %324 = tpu.matmul %4, %323, %cst_117 {dimension_numbers = #tpu.dot_dimension_numbers<[1], [0], [0], [1], [0, 0, 1, 1], [], []>} : vector<8x24xf32>, vector<24x128xf32>, vector<8x128xf32> -> vector<8x128xf32>
    %325 = tpu.concatenate %284, %324 in 1 : vector<8x128xf32>, vector<8x128xf32> -> vector<8x256xf32>
    %c2048 = arith.constant 2048 : index
    %c0_118 = arith.constant 0 : index
    %326 = vector.load %arg8[%c2048, %c0_118] : memref<2816x128xf32, #tpu.memory_space<vmem>>, vector<256x128xf32>
    %cst_119 = arith.constant dense<0.000000e+00> : vector<8x128xf32>
    %327 = tpu.matmul %325, %326, %cst_119 {dimension_numbers = #tpu.dot_dimension_numbers<[1], [0], [0], [1], [0, 0, 1, 1], [], []>} : vector<8x256xf32>, vector<256x128xf32>, vector<8x128xf32> -> vector<8x128xf32>
    %c192 = arith.constant 192 : index
    %c0_120 = arith.constant 0 : index
    %328 = vector.load %arg9[%c192, %c0_120] : memref<256x128xf32, #tpu.memory_space<vmem>>, vector<1x128xf32>
    %329 = vector.broadcast %328 : vector<1x128xf32> to vector<8x128xf32>
    %330 = arith.addf %327, %329 : vector<8x128xf32>
    %331 = arith.negf %330 : vector<8x128xf32>
    %332 = math.exp %331 : vector<8x128xf32>
    %cst_121 = arith.constant 1.000000e+00 : f32
    %333 = vector.broadcast %cst_121 : f32 to vector<8x128xf32>
    %334 = arith.addf %333, %332 : vector<8x128xf32>
    %335 = arith.divf %333, %334 : vector<8x128xf32>
    %336 = arith.mulf %330, %335 : vector<8x128xf32>
    %c2304 = arith.constant 2304 : index
    %c0_122 = arith.constant 0 : index
    %337 = vector.load %arg8[%c2304, %c0_122] : memref<2816x128xf32, #tpu.memory_space<vmem>>, vector<128x128xf32>
    %cst_123 = arith.constant dense<0.000000e+00> : vector<8x128xf32>
    %338 = tpu.matmul %336, %337, %cst_123 {dimension_numbers = #tpu.dot_dimension_numbers<[1], [0], [0], [1], [0, 0, 1, 1], [], []>} : vector<8x128xf32>, vector<128x128xf32>, vector<8x128xf32> -> vector<8x128xf32>
    %c200 = arith.constant 200 : index
    %c0_124 = arith.constant 0 : index
    %339 = vector.load %arg9[%c200, %c0_124] : memref<256x128xf32, #tpu.memory_space<vmem>>, vector<1x128xf32>
    %340 = vector.broadcast %339 : vector<1x128xf32> to vector<8x128xf32>
    %341 = arith.addf %338, %340 : vector<8x128xf32>
    %342 = arith.addf %284, %341 : vector<8x128xf32>
    %343 = arith.mulf %342, %8 : vector<8x128xf32>
    %c208 = arith.constant 208 : index
    %c0_125 = arith.constant 0 : index
    %344 = vector.load %arg9[%c208, %c0_125] : memref<256x128xf32, #tpu.memory_space<vmem>>, vector<2x128xf32>
    %345 = vector.extract_strided_slice %344 {offsets = [0, 0], sizes = [1, 128], strides = [1, 1]} : vector<2x128xf32> to vector<1x128xf32>
    %346 = vector.broadcast %217 : vector<24x1xf32> to vector<24x128xf32>
    %347 = vector.broadcast %345 : vector<1x128xf32> to vector<24x128xf32>
    %348 = arith.mulf %346, %347 : vector<24x128xf32>
    %349 = vector.extract_strided_slice %344 {offsets = [1, 0], sizes = [1, 128], strides = [1, 1]} : vector<2x128xf32> to vector<1x128xf32>
    %350 = vector.broadcast %15 : vector<24x1xf32> to vector<24x128xf32>
    %351 = vector.broadcast %349 : vector<1x128xf32> to vector<24x128xf32>
    %352 = arith.mulf %350, %351 : vector<24x128xf32>
    %353 = arith.addf %348, %352 : vector<24x128xf32>
    %c640_126 = arith.constant 640 : index
    %c0_127 = arith.constant 0 : index
    %354 = vector.load %arg7[%c640_126, %c0_127] : memref<768x256xf32, #tpu.memory_space<vmem>>, vector<128x256xf32>
    %cst_128 = arith.constant dense<0.000000e+00> : vector<8x256xf32>
    %355 = tpu.matmul %343, %354, %cst_128 {dimension_numbers = #tpu.dot_dimension_numbers<[1], [0], [0], [1], [0, 0, 1, 1], [], []>} : vector<8x128xf32>, vector<128x256xf32>, vector<8x256xf32> -> vector<8x256xf32>
    %356 = vector.extract_strided_slice %355 {offsets = [0, 0], sizes = [8, 128], strides = [1, 1]} : vector<8x256xf32> to vector<8x128xf32>
    %cst_129 = arith.constant dense<0.000000e+00> : vector<24x128xf32>
    %357 = tpu.matmul %2, %356, %cst_129 {dimension_numbers = #tpu.dot_dimension_numbers<[1], [0], [0], [1], [0, 0, 1, 1], [], []>} : vector<24x8xf32>, vector<8x128xf32>, vector<24x128xf32> -> vector<24x128xf32>
    %358 = vector.extract_strided_slice %355 {offsets = [0, 128], sizes = [8, 128], strides = [1, 1]} : vector<8x256xf32> to vector<8x128xf32>
    %cst_130 = arith.constant dense<0.000000e+00> : vector<24x128xf32>
    %359 = tpu.matmul %3, %358, %cst_130 {dimension_numbers = #tpu.dot_dimension_numbers<[1], [0], [0], [1], [0, 0, 1, 1], [], []>} : vector<24x8xf32>, vector<8x128xf32>, vector<24x128xf32> -> vector<24x128xf32>
    %360 = arith.addf %357, %359 : vector<24x128xf32>
    %361 = arith.addf %360, %353 : vector<24x128xf32>
    %c216 = arith.constant 216 : index
    %c0_131 = arith.constant 0 : index
    %362 = vector.load %arg9[%c216, %c0_131] : memref<256x128xf32, #tpu.memory_space<vmem>>, vector<1x128xf32>
    %363 = vector.broadcast %362 : vector<1x128xf32> to vector<24x128xf32>
    %364 = arith.addf %361, %363 : vector<24x128xf32>
    %365 = arith.negf %364 : vector<24x128xf32>
    %366 = math.exp %365 : vector<24x128xf32>
    %cst_132 = arith.constant 1.000000e+00 : f32
    %367 = vector.broadcast %cst_132 : f32 to vector<24x128xf32>
    %368 = arith.addf %367, %366 : vector<24x128xf32>
    %369 = arith.divf %367, %368 : vector<24x128xf32>
    %370 = arith.mulf %364, %369 : vector<24x128xf32>
    %c2432 = arith.constant 2432 : index
    %c0_133 = arith.constant 0 : index
    %371 = vector.load %arg8[%c2432, %c0_133] : memref<2816x128xf32, #tpu.memory_space<vmem>>, vector<128x128xf32>
    %cst_134 = arith.constant dense<0.000000e+00> : vector<24x128xf32>
    %372 = tpu.matmul %370, %371, %cst_134 {dimension_numbers = #tpu.dot_dimension_numbers<[1], [0], [0], [1], [0, 0, 1, 1], [], []>} : vector<24x128xf32>, vector<128x128xf32>, vector<24x128xf32> -> vector<24x128xf32>
    %c224 = arith.constant 224 : index
    %c0_135 = arith.constant 0 : index
    %373 = vector.load %arg9[%c224, %c0_135] : memref<256x128xf32, #tpu.memory_space<vmem>>, vector<1x128xf32>
    %374 = vector.broadcast %373 : vector<1x128xf32> to vector<24x128xf32>
    %375 = arith.addf %372, %374 : vector<24x128xf32>
    %376 = arith.negf %375 : vector<24x128xf32>
    %377 = math.exp %376 : vector<24x128xf32>
    %cst_136 = arith.constant 1.000000e+00 : f32
    %378 = vector.broadcast %cst_136 : f32 to vector<24x128xf32>
    %379 = arith.addf %378, %377 : vector<24x128xf32>
    %380 = arith.divf %378, %379 : vector<24x128xf32>
    %381 = arith.mulf %375, %380 : vector<24x128xf32>
    %c232 = arith.constant 232 : index
    %c0_137 = arith.constant 0 : index
    %382 = vector.load %arg9[%c232, %c0_137] : memref<256x128xf32, #tpu.memory_space<vmem>>, vector<1x128xf32>
    %383 = vector.broadcast %382 : vector<1x128xf32> to vector<24x128xf32>
    %384 = arith.mulf %381, %383 : vector<24x128xf32>
    %cst_138 = arith.constant dense<0.000000e+00> : vector<24xf32>
    %385 = vector.multi_reduction <add>, %384, %cst_138 [1] : vector<24x128xf32> to vector<24xf32>
    %386 = vector.shape_cast %385 : vector<24xf32> to vector<24x1xf32>
    %387 = vector.broadcast %386 : vector<24x1xf32> to vector<24x128xf32>
    %388 = arith.mulf %225, %387 : vector<24x128xf32>
    %389 = arith.mulf %388, %11 : vector<24x128xf32>
    %cst_139 = arith.constant dense<0.000000e+00> : vector<8x128xf32>
    %390 = tpu.matmul %4, %389, %cst_139 {dimension_numbers = #tpu.dot_dimension_numbers<[1], [0], [0], [1], [0, 0, 1, 1], [], []>} : vector<8x24xf32>, vector<24x128xf32>, vector<8x128xf32> -> vector<8x128xf32>
    %391 = arith.addf %212, %390 : vector<8x128xf32>
    %392 = arith.mulf %391, %8 : vector<8x128xf32>
    %393 = arith.mulf %343, %8 : vector<8x128xf32>
    %c2560 = arith.constant 2560 : index
    %c0_140 = arith.constant 0 : index
    %394 = vector.load %arg8[%c2560, %c0_140] : memref<2816x128xf32, #tpu.memory_space<vmem>>, vector<128x128xf32>
    %cst_141 = arith.constant dense<0.000000e+00> : vector<8x128xf32>
    %395 = tpu.matmul %393, %394, %cst_141 {dimension_numbers = #tpu.dot_dimension_numbers<[1], [0], [0], [1], [0, 0, 1, 1], [], []>} : vector<8x128xf32>, vector<128x128xf32>, vector<8x128xf32> -> vector<8x128xf32>
    %c240 = arith.constant 240 : index
    %c0_142 = arith.constant 0 : index
    %396 = vector.load %arg9[%c240, %c0_142] : memref<256x128xf32, #tpu.memory_space<vmem>>, vector<1x128xf32>
    %397 = vector.broadcast %396 : vector<1x128xf32> to vector<8x128xf32>
    %398 = arith.addf %395, %397 : vector<8x128xf32>
    %399 = arith.negf %398 : vector<8x128xf32>
    %400 = math.exp %399 : vector<8x128xf32>
    %cst_143 = arith.constant 1.000000e+00 : f32
    %401 = vector.broadcast %cst_143 : f32 to vector<8x128xf32>
    %402 = arith.addf %401, %400 : vector<8x128xf32>
    %403 = arith.divf %401, %402 : vector<8x128xf32>
    %404 = arith.mulf %398, %403 : vector<8x128xf32>
    %c2688 = arith.constant 2688 : index
    %c0_144 = arith.constant 0 : index
    %405 = vector.load %arg8[%c2688, %c0_144] : memref<2816x128xf32, #tpu.memory_space<vmem>>, vector<128x128xf32>
    %cst_145 = arith.constant dense<0.000000e+00> : vector<8x128xf32>
    %406 = tpu.matmul %404, %405, %cst_145 {dimension_numbers = #tpu.dot_dimension_numbers<[1], [0], [0], [1], [0, 0, 1, 1], [], []>} : vector<8x128xf32>, vector<128x128xf32>, vector<8x128xf32> -> vector<8x128xf32>
    %c248 = arith.constant 248 : index
    %c0_146 = arith.constant 0 : index
    %407 = vector.load %arg9[%c248, %c0_146] : memref<256x128xf32, #tpu.memory_space<vmem>>, vector<1x128xf32>
    %408 = vector.broadcast %407 : vector<1x128xf32> to vector<8x128xf32>
    %409 = arith.addf %406, %408 : vector<8x128xf32>
    %410 = arith.mulf %409, %8 : vector<8x128xf32>
    %c0_147 = arith.constant 0 : index
    %c0_148 = arith.constant 0 : index
    %411 = vector.load %arg10[%c0_147, %c0_148] : memref<8x128xf32, #tpu.memory_space<vmem>>, vector<8x128xf32>
    tpu.vector_store %arg10[%c0_147, %c0_148], %410 {strides = array<i32>} : memref<8x128xf32, #tpu.memory_space<vmem>>, vector<8x128xf32>,
    %c0_149 = arith.constant 0 : index
    %c0_150 = arith.constant 0 : index
    %412 = vector.load %arg11[%c0_149, %c0_150] : memref<8x128xf32, #tpu.memory_space<vmem>>, vector<8x128xf32>
    tpu.vector_store %arg11[%c0_149, %c0_150], %392 {strides = array<i32>} : memref<8x128xf32, #tpu.memory_space<vmem>>, vector<8x128xf32>,
    return
  }
}

</mosaic_0001>

<bundles_post_ra>
// kernel: egnn_forward_pallas.1
= control target key start
LH: loop header
LB: loop body
LE: loop exit
PB: predicated region body
PF: predicated region fallthrough
CT: control target
= control target key end

     0   :  { %17 = vsyncpa [#allocation3], 0  ;;  %s4274_s0 = inlined_call_operand.vmem [shape: f32[8,128], index: 0, kind: input, shape index: {}]   ;;  %s4275_s1 = inlined_call_operand.vmem [shape: f32[8,128], index: 1, kind: input, shape index: {}]   ;;  %s4276_s2 = inlined_call_operand.vmem [shape: f32[24,8], index: 2, kind: input, shape index: {}]   ;;  %s4277_s3 = inlined_call_operand.vmem [shape: f32[24,8], index: 3, kind: input, shape index: {}]   ;;  %s4278_s4 = inlined_call_operand.hbm [shape: f32[8,24], index: 4, kind: input, shape index: {}]   ;;  %s4279_s5 = inlined_call_operand.vmem [shape: f32[8,1], index: 5, kind: input, shape index: {}]   ;;  %s4280_s6 = inlined_call_operand.vmem [shape: f32[24,1], index: 6, kind: input, shape index: {}]   ;;  %s4281_s7 = inlined_call_operand.hbm [shape: f32[768,256], index: 7, kind: input, shape index: {}]   ;;  %s4282_s8 = inlined_call_operand.hbm [shape: f32[2816,128], index: 8, kind: input, shape index: {}]   ;;  %s4283_s9 = inlined_call_operand.hbm [shape: f32[256,128], index: 9, kind: input, shape index: {}]   ;;  %s4284_s10 = inlined_call_operand.hbm [shape: f32[8,128], index: 10, kind: output, shape index: {0}]   ;;  %s4285_s11 = inlined_call_operand.vmem [shape: f32[8,128], index: 11, kind: output, shape index: {1}]  }
   0x1   :  { %18 = vsyncpa [#allocation6], 0 }
   0x2   :  { %19 = vsyncpa [#allocation9], 0  ;;  %s48_s19 = sshll.u32 %s4281_s7, 4  ;;  %s49_s19 = int_to_ptr.hbm [resolvable:$true] %s48_s19 }
   0x3   :  { %20 = vsyncpa [#allocation4], 0  ;;  %s3602_s20 = smov [#allocation5]   ;;  %s34_s24 = sshll.u32 %s4278_s4, 4  ;;  %s35_s24 = int_to_ptr.hbm [resolvable:$true] %s34_s24 }
   0x4   :  { %s50_s21 = sshll.u32 %s3602_s20, 4  ;;  %s3603_s25 = smov 256   ;;  %s51_s21 = int_to_ptr.vmem [resolvable:$true] %s50_s21 }
   0x5   :  { %s3604_s26 = smov 16   ;;  %s3605_s27 = smov [#allocation2]  }
   0x6   :  { %56 = dma.hbm_to_vmem [thread:$0]  %s49_s19, 24576, %s51_s21, [#allocation6], %s3603_s25, %s3603_s25, %s3604_s26  }
   0x7   :  { %s36_s28 = sshll.u32 %s3605_s27, 4  ;;  %s61_s12 = sshll.u32 %s4282_s8, 4  ;;  %s37_s28 = int_to_ptr.vmem [resolvable:$true] %s36_s28  ;;  %s62_s12 = int_to_ptr.hbm [resolvable:$true] %s61_s12 }
   0x8   :  { %39 = dma.hbm_to_vmem [thread:$0]  %s35_s24, 128, %s37_s28, [#allocation3]  }
   0x9   :  { %s3606_s7 = smov [#allocation7]   ;;  %s74_s4 = sshll.u32 %s4283_s9, 4  ;;  %s75_s4 = int_to_ptr.hbm [resolvable:$true] %s74_s4 }
   0xa   :  { %s63_s13 = sshll.u32 %s3606_s7, 4  ;;  %s3607_s16 = smov 128   ;;  %s64_s13 = int_to_ptr.vmem [resolvable:$true] %s63_s13 }
   0xb   :  { %s3608_s17 = smov 8   ;;  %s3609_s18 = smov [#allocation8]  }
   0xc   :  { %69 = dma.hbm_to_vmem [thread:$0]  %s62_s12, 45056, %s64_s13, [#allocation6], %s3607_s16, %s3607_s16, %s3608_s17  }
   0xd   :  { %s76_s19 = sshll.u32 %s3609_s18, 4  ;;  %s77_s19 = int_to_ptr.vmem [resolvable:$true] %s76_s19 }
   0xe   :  { %82 = dma.hbm_to_vmem [thread:$0]  %s75_s4, 4096, %s77_s19, [#allocation9], %s3607_s16, %s3607_s16, %s3608_s17  }
   0xf   :  { %3594 = dma.done.wait [#allocation3], 128  }
  0x10   :  { %3595 = vsyncadd [#allocation3], 4294967168 }
  0x11   :  { %3596 = dma.done.wait [#allocation6], 69632  }
  0x12   :  { %3597 = vsyncadd [#allocation6], 4294897664 }
  0x13   :  { %3598 = dma.done.wait [#allocation9], 4096  }
  0x14   :  { %3599 = vsyncadd [#allocation9], 4294963200  ;;  %v195_v0 = vld [vmem:[#allocation7 + $0x78] sm:$0xff]  ;;  %v194_v1 = vld [vmem:[#allocation7 + $0x70] sm:$0xff]  ;;  %vm135_vm0 = vcmask 64512   ;;  %s3111_s28 = sshll.u32 %s4284_s10, 4  ;;  %s3112_s28 = int_to_ptr.hbm [resolvable:$true] %s3111_s28 }
  0x15   :  { %198 = vmatpush.msra.mxu1 %v195_v0  ;;  %v193_v2 = vld [vmem:[#allocation7 + $0x68] sm:$0xff]  ;;  %v192_v3 = vld [vmem:[#allocation7 + $0x60] sm:$0xff]  ;;  %v191_v4 = vld [vmem:[#allocation7 + $0x58] sm:$0xff] }
  0x16   :  { %v190_v5 = vld [vmem:[#allocation7 + $0x50] sm:$0xff]  ;;  %v189_v6 = vld [vmem:[#allocation7 + $0x48] sm:$0xff]  ;;  %v188_v7 = vld [vmem:[#allocation7 + $0x40] sm:$0xff] }
  0x17   :  { %199 = vmatpush.msra.mxu1 %v194_v1  ;;  %v187_v8 = vld [vmem:[#allocation7 + $0x38] sm:$0xff]  ;;  %v186_v9 = vld [vmem:[#allocation7 + $0x30] sm:$0xff]  ;;  %v185_v10 = vld [vmem:[#allocation7 + $0x28] sm:$0xff] }
  0x18   :  { %v184_v11 = vld [vmem:[#allocation7 + $0x20] sm:$0xff]  ;;  %v183_v12 = vld [vmem:[#allocation7 + $0x18] sm:$0xff]  ;;  %v182_v13 = vld [vmem:[#allocation7 + $0x10] sm:$0xff] }
  0x19   :  { %200 = vmatpush.msra.mxu1 %v193_v2  ;;  %v181_v14 = vld [vmem:[#allocation7 + $0x8] sm:$0xff]  ;;  %v180_v15 = vld [vmem:[#allocation7] sm:$0xff]  ;;  %v99_v16 = vld [vmem:[%s4274_s0] sm:$0xff] }
  0x1a   :  { %v253_v17 = vld [vmem:[#allocation7 + $0xf8] sm:$0xff]  ;;  %v252_v18 = vld [vmem:[#allocation7 + $0xf0] sm:$0xff]  ;;  %v251_v19 = vld [vmem:[#allocation7 + $0xe8] sm:$0xff] }
  0x1b   :  { %201 = vmatpush.msra.mxu1 %v192_v3  ;;  %256 = vmatpush.msra.mxu2 %v253_v17  ;;  %v250_v20 = vld [vmem:[#allocation7 + $0xe0] sm:$0xff]  ;;  %v249_v21 = vld [vmem:[#allocation7 + $0xd8] sm:$0xff]  ;;  %v248_v22 = vld [vmem:[#allocation7 + $0xd0] sm:$0xff] }
  0x1c   :  { %v247_v23 = vld [vmem:[#allocation7 + $0xc8] sm:$0xff]  ;;  %v246_v24 = vld [vmem:[#allocation7 + $0xc0] sm:$0xff]  ;;  %v245_v25 = vld [vmem:[#allocation7 + $0xb8] sm:$0xff] }
  0x1d   :  { %202 = vmatpush.msra.mxu1 %v191_v4  ;;  %257 = vmatpush.msra.mxu2 %v252_v18  ;;  %v244_v26 = vld [vmem:[#allocation7 + $0xb0] sm:$0xff]  ;;  %v243_v27 = vld [vmem:[#allocation7 + $0xa8] sm:$0xff]  ;;  %v242_v28 = vld [vmem:[#allocation7 + $0xa0] sm:$0xff] }
  0x1e   :  { %v241_v29 = vld [vmem:[#allocation7 + $0x98] sm:$0xff]  ;;  %v240_v30 = vld [vmem:[#allocation7 + $0x90] sm:$0xff]  ;;  %v239_v31 = vld [vmem:[#allocation7 + $0x88] sm:$0xff] }
  0x1f   :  { %203 = vmatpush.msra.mxu1 %v190_v5  ;;  %258 = vmatpush.msra.mxu2 %v251_v19  ;;  %v3231_v32 = vld [vmem:[#allocation8] ss:$0 sm:$0xff]  ;;  %v3690_v35 = vld [vmem:[%s4276_s2] sm:$0xff]  ;;  %v3725_v46 = vld [vmem:[%s4276_s2 + $0x10] sm:$0xff] }
  0x20   :  { %v238_v33 = vld [vmem:[#allocation7 + $0x80] sm:$0xff]  ;;  %v3695_v36 = vld [vmem:[%s4277_s3] sm:$0xff]  ;;  %v3730_v47 = vld [vmem:[%s4277_s3 + $0x10] sm:$0xff] }
  0x21   :  { %204 = vmatpush.msra.mxu1 %v189_v6  ;;  %259 = vmatpush.msra.mxu2 %v250_v20  ;;  %v100_v38 = vld [vmem:[%s4275_s1] sm:$0xff]  ;;  %v3702_v39 = vsub.f32 %v3690_v35, %v3695_v36  ;;  %v3709_v41 = vld [vmem:[%s4276_s2 + $0x8] sm:$0xff]  ;;  %v3734_v48 = vsub.f32 %v3725_v46, %v3730_v47  ;;  %v386_v62 = vld [vmem:[#allocation5 + $0xf0] sm:$0xff] }
  0x22   :  { %160 = vmatpush.msra.mxu0 %v100_v38  ;;  %v3714_v42 = vld [vmem:[%s4277_s3 + $0x8] sm:$0xff]  ;;  %v387_v63 = vld [vmem:[#allocation5 + $0xf8] sm:$0xff]  ;;  %388 = vmatpush.msra.mxu3 %v386_v62  ;;  %v385_v1 = vld [vmem:[#allocation5 + $0xe8] sm:$0xff] }
  0x23   :  { %205 = vmatpush.msra.mxu1 %v188_v7  ;;  %260 = vmatpush.msra.mxu2 %v249_v21  ;;  %v3718_v43 = vsub.f32 %v3709_v41, %v3714_v42  ;;  %v384_v0 = vld [vmem:[#allocation5 + $0xe0] sm:$0xff]  ;;  %v382_v3 = vld [vmem:[#allocation5 + $0xd0] sm:$0xff]  ;;  %v383_v4 = vld [vmem:[#allocation5 + $0xd8] sm:$0xff] }
  0x24   :  { %3127 = vmatmul.msk.f32.vlgmr.msra.gmra.mxu0 %vm135_vm0, %v3702_v39  ;;  %389 = vmatpush.msra.mxu3 %v384_v0  ;;  %v380_v6 = vld [vmem:[#allocation5 + $0xc0] sm:$0xff]  ;;  %v381_v7 = vld [vmem:[#allocation5 + $0xc8] sm:$0xff]  ;;  %v370_v18 = vld [vmem:[#allocation5 + $0x70] sm:$0xff] }
  0x25   :  { %206 = vmatpush.msra.mxu1 %v187_v8  ;;  %261 = vmatpush.msra.mxu2 %v248_v22  ;;  %v378_v8 = vld [vmem:[#allocation5 + $0xb0] sm:$0xff]  ;;  %v373_v17 = vld [vmem:[#allocation5 + $0x88] sm:$0xff]  ;;  %v371_v19 = vld [vmem:[#allocation5 + $0x78] sm:$0xff] }
  0x26   :  { %408 = vmatpush.msrb.mxu0 %v387_v63  ;;  %390 = vmatpush.msra.mxu3 %v382_v3  ;;  %v368_v20 = vld [vmem:[#allocation5 + $0x60] sm:$0xff]  ;;  %v369_v21 = vld [vmem:[#allocation5 + $0x68] sm:$0xff]  ;;  %v366_v22 = vld [vmem:[#allocation5 + $0x50] sm:$0xff] }
  0x27   :  { %207 = vmatpush.msra.mxu1 %v186_v9  ;;  %262 = vmatpush.msra.mxu2 %v247_v23  ;;  %v379_v9 = vld [vmem:[#allocation5 + $0xb8] sm:$0xff]  ;;  %v711_v63 = vld [vmem:[#allocation7 + $0x1f0] sm:$0xff]  ;;  %v710_v0 = vld [vmem:[#allocation7 + $0x1e8] sm:$0xff] }
  0x28   :  { %409 = vmatpush.msrb.mxu0 %v385_v1  ;;  %391 = vmatpush.msra.mxu3 %v380_v6  ;;  %v367_v23 = vld [vmem:[#allocation5 + $0x58] sm:$0xff]  ;;  %v709_v1 = vld [vmem:[#allocation7 + $0x1e0] sm:$0xff]  ;;  %v706_v6 = vld [vmem:[#allocation7 + $0x1c8] sm:$0xff] }
  0x29   :  { %208 = vmatpush.msra.mxu1 %v185_v10  ;;  %263 = vmatpush.msra.mxu2 %v246_v24  ;;  %v376_v10 = vld [vmem:[#allocation5 + $0xa0] sm:$0xff] }
  0x2a   :  { %410 = vmatpush.msrb.mxu0 %v383_v4  ;;  %392 = vmatpush.msra.mxu3 %v378_v8  ;;  %v364_v24 = vld [vmem:[#allocation5 + $0x40] sm:$0xff]  ;;  %v708_v4 = vld [vmem:[#allocation7 + $0x1d8] sm:$0xff]  ;;  %v703_v8 = vld [vmem:[#allocation7 + $0x1b0] sm:$0xff] }
  0x2b   :  { %209 = vmatpush.msra.mxu1 %v184_v11  ;;  %264 = vmatpush.msra.mxu2 %v245_v25  ;;  %v377_v11 = vld [vmem:[#allocation5 + $0xa8] sm:$0xff] }
  0x2c   :  { %3128 = vmatmul.msk.f32.gmra.mxu0 %vm135_vm0, %v3718_v43  ;;  %393 = vmatpush.msra.mxu3 %v376_v10  ;;  %v365_v25 = vld [vmem:[#allocation5 + $0x48] sm:$0xff]  ;;  %v700_v10 = vld [vmem:[#allocation7 + $0x198] sm:$0xff] }
  0x2d   :  { %210 = vmatpush.msra.mxu1 %v183_v12  ;;  %265 = vmatpush.msra.mxu2 %v244_v26  ;;  %v362_v26 = vld [vmem:[#allocation5 + $0x30] sm:$0xff] }
  0x2e   :  { %411 = vmatpush.msrb.mxu0 %v381_v7  ;;  %v705_v7 = vld [vmem:[#allocation7 + $0x1c0] sm:$0xff] }
  0x2f   :  { %211 = vmatpush.msra.mxu1 %v182_v13  ;;  %266 = vmatpush.msra.mxu2 %v243_v27  ;;  %v374_v13 = vld [vmem:[#allocation5 + $0x90] sm:$0xff]  ;;  %v363_v27 = vld [vmem:[#allocation5 + $0x38] sm:$0xff] }
  0x30   :  { %412 = vmatpush.msrb.mxu0 %v379_v9  ;;  %394 = vmatpush.msra.mxu3 %v374_v13  ;;  %v702_v9 = vld [vmem:[#allocation7 + $0x1a8] sm:$0xff]  ;;  %v581_v13 = vld [vmem:[#allocation7 + $0x178] sm:$0xff] }
  0x31   :  { %212 = vmatpush.msra.mxu1 %v181_v14  ;;  %267 = vmatpush.msra.mxu2 %v242_v28  ;;  %v375_v14 = vld [vmem:[#allocation5 + $0x98] sm:$0xff]  ;;  %v360_v28 = vld [vmem:[#allocation5 + $0x20] sm:$0xff] }
  0x32   :  { %413 = vmatpush.msrb.mxu0 %v377_v11  ;;  %v698_v11 = vld [vmem:[#allocation7 + $0x188] sm:$0xff] }
  0x33   :  { %213 = vmatpush.msra.mxu1 %v180_v15  ;;  %268 = vmatpush.msra.mxu2 %v241_v29  ;;  %v361_v29 = vld [vmem:[#allocation5 + $0x28] sm:$0xff] }
  0x34   :  { %214 = vmatmul.f32.vlgmr.msra.gmra.mxu1 %v99_v16  ;;  %3129 = vmatmul.msk.f32.gmra.mxu0 %vm135_vm0, %v3734_v48  ;;  %v372_v16 = vld [vmem:[#allocation5 + $0x80] sm:$0xff] }
  0x35   :  { %269 = vmatpush.msra.mxu2 %v240_v30  ;;  %414 = vmatpush.msrb.mxu0 %v375_v14  ;;  %v3232_v30 = vld [vmem:[#allocation8 + $0x8] ss:$0 sm:$0xff] }
  0x36   :  { %395 = vmatpush.msra.mxu3 %v372_v16  ;;  %v579_v14 = vld [vmem:[#allocation7 + $0x168] sm:$0xff]  ;;  %v577_v16 = vld [vmem:[#allocation7 + $0x158] sm:$0xff] }
  0x37   :  { %270 = vmatpush.msra.mxu2 %v239_v31  ;;  %415 = vmatpush.msrb.mxu0 %v373_v17  ;;  %v358_v31 = vld [vmem:[#allocation5 + $0x10] sm:$0xff]  ;;  %v575_v17 = vld [vmem:[#allocation7 + $0x148] sm:$0xff] }
  0x38   :  { %396 = vmatpush.msra.mxu3 %v370_v18  ;;  %v574_v18 = vld [vmem:[#allocation7 + $0x140] sm:$0xff] }
  0x39   :  { %271 = vmatpush.msra.mxu2 %v238_v33  ;;  %416 = vmatpush.msrb.mxu0 %v371_v19  ;;  %v356_v33 = vld [vmem:[#allocation5] sm:$0xff]  ;;  %v573_v19 = vld [vmem:[#allocation7 + $0x138] sm:$0xff] }
  0x3a   :  { %397 = vmatpush.msra.mxu3 %v368_v20  ;;  %v572_v20 = vld [vmem:[#allocation7 + $0x130] sm:$0xff] }
  0x3b   :  { %417 = vmatpush.msrb.mxu0 %v369_v21  ;;  %v344_v21 = vld [vmem:[#allocation8 + $0x10] sm:$0x3] }
  0x3c   :  { %398 = vmatpush.msra.mxu3 %v366_v22  ;;  %v571_v22 = vld [vmem:[#allocation7 + $0x128] sm:$0xff] }
  0x3d   :  { %418 = vmatpush.msrb.mxu0 %v367_v23  ;;  %v345_v23 = vperm.slane %v344_v21, 0 }
  0x3e   :  { %399 = vmatpush.msra.mxu3 %v364_v24  ;;  %v349_v24 = vperm.slane %v344_v21, 1 }
  0x3f   :  { %419 = vmatpush.msrb.mxu0 %v365_v25  ;;  %v570_v25 = vld [vmem:[#allocation7 + $0x120] sm:$0xff] }
  0x40   :  { %400 = vmatpush.msra.mxu3 %v362_v26 }
  0x41   :  { %420 = vmatpush.msrb.mxu0 %v363_v27  ;;  %v569_v27 = vld [vmem:[#allocation7 + $0x118] sm:$0xff] }
  0x42   :  { %401 = vmatpush.msra.mxu3 %v360_v28 }
  0x43   :  { %421 = vmatpush.msrb.mxu0 %v361_v29 }
  0x44   :  { %402 = vmatpush.msra.mxu3 %v358_v31  ;;  %v568_v31 = vld [vmem:[#allocation7 + $0x110] sm:$0xff] }
  0x46   :  { %403 = vmatpush.msra.mxu3 %v356_v33 }
  0x48   :  { %584 = vmatpush.msrb.mxu3 %v581_v13 }
  0xa1   :  { %v3738_v60 = vpop.f32.mrf.mxu0 }
  0xa2   :  { %v171_v61 = vmul.f32 %v3738_v60, %v3738_v60 }
  0xa4   :  { %174 = vadd.xlane.f32.xlu0 %v171_v61  ;;  %v712_v61 = vld [vmem:[#allocation7 + $0x1f8] sm:$0xff] }
  0xa9   :  { %v3742_v2 = vpop.f32.mrf.mxu0 }
  0xaa   :  { %v172_v5 = vmul.f32 %v3742_v2, %v3742_v2 }
  0xac   :  { %176 = vadd.xlane.f32.xlu0 %v172_v5  ;;  %v707_v5 = vld [vmem:[#allocation7 + $0x1d0] sm:$0xff] }
  0xb1   :  { %v215_v34 = vpop.f32.mrf.mxu1  ;;  %v3746_v12 = vpop.f32.mrf.mxu0 }
  0xb2   :  { %v216_v37 = vadd.f32 %v3231_v32, %v215_v34  ;;  %v173_v15 = vmul.f32 %v3746_v12, %v3746_v12  ;;  %v359_v32 = vld [vmem:[#allocation5 + $0x18] sm:$0xff]  ;;  %v357_v34 = vld [vmem:[#allocation5 + $0x8] sm:$0xff] }
  0xb3   :  { %422 = vmatpush.msrb.mxu0 %v359_v32  ;;  %v567_v32 = vld [vmem:[#allocation7 + $0x108] sm:$0xff] }
  0xb4   :  { %v3130_v40 = vmul.f32 -1.442695, %v216_v37  ;;  %178 = vadd.xlane.f32.xlu1 %v173_v15  ;;  %v578_v15 = vld [vmem:[#allocation7 + $0x160] sm:$0xff] }
  0xb5   :  { %423 = vmatpush.msrb.mxu0 %v357_v34 }
  0xb6   :  { %3257 = vpow2.f32 %v3130_v40 }
  0xbc   :  { %v3258_v44 = vpop.eup %3257 }
  0xbd   :  { %v221_v45 = vadd.f32 1.0, %v3258_v44 }
  0xbf   :  { %3259 = vrcp.f32 %v221_v45  ;;  %v233_v52 = vand.u32 2147483648, %v221_v45  ;;  %v231_v54 = vand.u32 2147483647, %v221_v45  ;;  %vm227_vm2 = vweird.f32 %v221_v45 }
  0xc1   :  { %v234_v56 = vor.u32 1.1754944e-38, %v233_v52  ;;  %vm232_vm4 = vcmp.eq.f32.partialorder %v231_v54, 8.507059e+37 }
  0xc5   :  { %v3260_v49 = vpop.eup %3259 }
  0xc6   :  { %v223_v50 = vmul.f32 %v3260_v49, %v221_v45  ;;  %vm228_vm1 = vweird.f32 %v3260_v49 }
  0xc7   :  { %vm229_vm3 = vmor %vm227_vm2, %vm228_vm1 }
  0xc8   :  { %v224_v51 = vsub.f32 1.0, %v223_v50 }
  0xca   :  { %v225_v53 = vmul.f32 %v3260_v49, %v224_v51 }
  0xcc   :  { %v226_v55 = vadd.f32 %v3260_v49, %v225_v53 }
  0xce   :  { %v230_v57 = vsel %vm229_vm3, %v3260_v49, %v226_v55 }
  0xcf   :  { %v235_v58 = vsel %vm232_vm4, %v234_v56, %v230_v57 }
  0xd0   :  { %v237_v59 = vmul.f32 %v235_v58, %v216_v37 }
  0xd2   :  { %272 = vmatmul.f32.vlgmr.msra.gmra.mxu2 %v237_v59 }
 0x117   :  { %v3767_v26 = vpop.xlane.xlu0 %174 }
 0x118   :  { %v346_v29 = vmul.f32 %v345_v23, %v3767_v26 }
 0x155   :  { %v273_v37 = vpop.f32.mrf.mxu2 }
 0x156   :  { %v274_v38 = vadd.f32 %v3232_v30, %v273_v37  ;;  %v350_v30 = vmul.f32 %v349_v24, %v3767_v26 }
 0x158   :  { %v3131_v40 = vmul.f32 -1.442695, %v274_v38  ;;  %v353_v34 = vadd.f32 %v350_v30, %v346_v29 }
 0x15a   :  { %3261 = vpow2.f32 %v3131_v40  ;;  %v566_v40 = vld [vmem:[#allocation7 + $0x100] sm:$0xff] }
 0x160   :  { %v3262_v44 = vpop.eup %3261 }
 0x161   :  { %v279_v45 = vadd.f32 1.0, %v3262_v44 }
 0x163   :  { %3263 = vrcp.f32 %v279_v45  ;;  %v291_v52 = vand.u32 2147483648, %v279_v45  ;;  %v289_v54 = vand.u32 2147483647, %v279_v45  ;;  %vm285_vm6 = vweird.f32 %v279_v45 }
 0x165   :  { %v292_v56 = vor.u32 1.1754944e-38, %v291_v52  ;;  %vm290_vm8 = vcmp.eq.f32.partialorder %v289_v54, 8.507059e+37 }
 0x169   :  { %v3264_v49 = vpop.eup %3263 }
 0x16a   :  { %v281_v50 = vmul.f32 %v3264_v49, %v279_v45  ;;  %vm286_vm5 = vweird.f32 %v3264_v49  ;;  %v3771_v45 = vpop.xlane.xlu0 %176 }
 0x16b   :  { %vm287_vm7 = vmor %vm285_vm6, %vm286_vm5 }
 0x16c   :  { %v282_v51 = vsub.f32 1.0, %v281_v50  ;;  %v347_v50 = vmul.f32 %v345_v23, %v3771_v45 }
 0x16e   :  { %v283_v53 = vmul.f32 %v3264_v49, %v282_v51  ;;  %v351_v51 = vmul.f32 %v349_v24, %v3771_v45 }
 0x170   :  { %v284_v55 = vadd.f32 %v3264_v49, %v283_v53 }
 0x172   :  { %v288_v57 = vsel %vm287_vm7, %v3264_v49, %v284_v55  ;;  %v354_v55 = vadd.f32 %v351_v51, %v347_v50 }
 0x173   :  { %v293_v58 = vsel %vm290_vm8, %v292_v56, %v288_v57 }
 0x174   :  { %v3750_v59 = vmul.f32 %v293_v58, %v274_v38  ;;  %v3233_v38 = vld [vmem:[#allocation8 + $0x18] ss:$0 sm:$0xff]  ;;  %v3775_v58 = vpop.xlane.xlu1 %178 }
 0x176   :  { %404 = vmatmul.f32.vlgmr.msra.gmra.mxu3 %v3750_v59  ;;  %424 = vmatmul.f32.vlgmr.msrb.gmra.mxu0 %v3750_v59 }
 0x1f3   :  { %v425_v62 = vpop.f32.mrf.mxu0 }
 0x1f4   :  { %452 = vmatpush.msrb.mxu1 %v425_v62  ;;  %v352_v62 = vmul.f32 %v349_v24, %v3775_v58 }
 0x1f5   :  { %3132 = vmatmul.msk.f32.vlgmr.msrb.gmra.mxu1 %vm135_vm0, %v3695_v36  ;;  %v704_v36 = vld [vmem:[#allocation7 + $0x1b8] sm:$0xff] }
 0x1f6   :  { %731 = vmatpush.msra.mxu1 %v712_v61  ;;  %v348_v61 = vmul.f32 %v345_v23, %v3775_v58 }
 0x1f8   :  { %732 = vmatpush.msra.mxu1 %v711_v63 }
 0x1f9   :  { %v405_v3 = vpop.f32.mrf.mxu3 }
 0x1fa   :  { %733 = vmatpush.msra.mxu1 %v710_v0  ;;  %487 = vmatpush.msrb.mxu2 %v405_v3 }
 0x1fb   :  { %3135 = vmatmul.msk.f32.vlgmr.msrb.gmra.mxu2 %vm135_vm0, %v3690_v35  ;;  %v701_v35 = vld [vmem:[#allocation7 + $0x1a0] sm:$0xff] }
 0x1fc   :  { %734 = vmatpush.msra.mxu1 %v709_v1 }
 0x1fd   :  { %3133 = vmatmul.msk.f32.gmra.mxu1 %vm135_vm0, %v3714_v42  ;;  %v699_v42 = vld [vmem:[#allocation7 + $0x190] sm:$0xff] }
 0x1fe   :  { %735 = vmatpush.msra.mxu1 %v708_v4 }
 0x200   :  { %736 = vmatpush.msra.mxu1 %v707_v5 }
 0x202   :  { %737 = vmatpush.msra.mxu1 %v706_v6  ;;  %v355_v6 = vadd.f32 %v352_v62, %v348_v61  ;;  %v3235_v61 = vld [vmem:[#allocation8 + $0x20] ss:$0 sm:$0xff] }
 0x203   :  { %3136 = vmatmul.msk.f32.gmra.mxu2 %vm135_vm0, %v3709_v41  ;;  %v697_v41 = vld [vmem:[#allocation7 + $0x180] sm:$0xff] }
 0x204   :  { %738 = vmatpush.msra.mxu1 %v705_v7 }
 0x205   :  { %3134 = vmatmul.msk.f32.gmra.mxu1 %vm135_vm0, %v3730_v47  ;;  %v580_v47 = vld [vmem:[#allocation7 + $0x170] sm:$0xff] }
 0x206   :  { %739 = vmatpush.msra.mxu1 %v704_v36  ;;  %585 = vmatpush.msrb.mxu3 %v580_v47 }
 0x208   :  { %740 = vmatpush.msra.mxu1 %v703_v8  ;;  %586 = vmatpush.msrb.mxu3 %v579_v14 }
 0x20a   :  { %741 = vmatpush.msra.mxu1 %v702_v9  ;;  %587 = vmatpush.msrb.mxu3 %v578_v15  ;;  %v118_v9 = vld [vmem:[%s4280_s6 + $0x8] sm:$0xff] }
 0x20b   :  { %3137 = vmatmul.msk.f32.gmra.mxu2 %vm135_vm0, %v3725_v46  ;;  %v576_v46 = vld [vmem:[#allocation7 + $0x150] sm:$0xff] }
 0x20c   :  { %742 = vmatpush.msra.mxu1 %v701_v35  ;;  %588 = vmatpush.msrb.mxu3 %v577_v16  ;;  %v119_v35 = vld [vmem:[%s4280_s6 + $0x10] sm:$0xff]  ;;  %v117_v16 = vld [vmem:[%s4280_s6] sm:$0xff] }
 0x20e   :  { %743 = vmatpush.msra.mxu1 %v700_v10  ;;  %589 = vmatpush.msrb.mxu3 %v576_v46  ;;  %v3610_v10 = vmov 0  }
 0x20f   :  { %3229 = vset.pattern.permute.xlu2 %v3610_v10  ;;  %3228 = vset.pattern.permute.xlu1 %v3610_v10 }
 0x210   :  { %744 = vmatpush.msra.mxu1 %v699_v42  ;;  %590 = vmatpush.msrb.mxu3 %v575_v17 }
 0x211   :  { %127 = vperm.xlu2 %3229, %v118_v9   ;;  %132 = vperm.xlu1 %3228, %v119_v35  }
 0x212   :  { %745 = vmatpush.msra.mxu1 %v698_v11  ;;  %591 = vmatpush.msrb.mxu3 %v574_v18 }
 0x213   :  { %3230 = vset.pattern.permute.xlu0 %v3610_v10 }
 0x214   :  { %746 = vmatpush.msra.mxu1 %v697_v41  ;;  %592 = vmatpush.msrb.mxu3 %v573_v19 }
 0x215   :  { %747 = vmatmul.f32.vlgmr.msra.gmra.mxu1 %v3750_v59 }
 0x216   :  { %593 = vmatpush.msrb.mxu3 %v572_v20 }
 0x218   :  { %594 = vmatpush.msrb.mxu3 %v571_v22 }
 0x219   :  { %122 = vperm.xlu2 %3229, %v117_v16   ;;  %v725_v16 = vld [vmem:[#allocation7 + $0x260] sm:$0xff] }
 0x21a   :  { %595 = vmatpush.msrb.mxu3 %v570_v25 }
 0x21c   :  { %596 = vmatpush.msrb.mxu3 %v569_v27 }
 0x21e   :  { %597 = vmatpush.msrb.mxu3 %v568_v31 }
 0x220   :  { %598 = vmatpush.msrb.mxu3 %v567_v32 }
 0x222   :  { %599 = vmatpush.msrb.mxu3 %v566_v40 }
 0x272   :  { %v454_v28 = vpop.f32.mrf.mxu1 }
 0x27a   :  { %v457_v52 = vpop.f32.mrf.mxu1 }
 0x27e   :  { %v489_v33 = vpop.f32.mrf.mxu2 }
 0x27f   :  { %v490_v37 = vadd.f32 %v489_v33, %v454_v28 }
 0x281   :  { %v498_v44 = vadd.f32 %v490_v37, %v353_v34 }
 0x282   :  { %v460_v4 = vpop.f32.mrf.mxu1 }
 0x283   :  { %v503_v49 = vadd.f32 %v3233_v38, %v498_v44 }
 0x285   :  { %v3138_v53 = vmul.f32 -1.442695, %v503_v49 }
 0x286   :  { %v492_v54 = vpop.f32.mrf.mxu2 }
 0x287   :  { %3265 = vpow2.f32 %v3138_v53  ;;  %v493_v56 = vadd.f32 %v492_v54, %v457_v52 }
 0x289   :  { %v499_v57 = vadd.f32 %v493_v56, %v354_v55 }
 0x28b   :  { %v3779_v63 = vadd.f32 %v3233_v38, %v499_v57 }
 0x28d   :  { %v3266_v0 = vpop.eup %3265  ;;  %v3139_v1 = vmul.f32 -1.442695, %v3779_v63 }
 0x28e   :  { %v515_v3 = vadd.f32 1.0, %v3266_v0  ;;  %v495_v5 = vpop.f32.mrf.mxu2 }
 0x28f   :  { %v496_v7 = vadd.f32 %v495_v5, %v460_v4  ;;  %3267 = vpow2.f32 %v3139_v1 }
 0x290   :  { %3269 = vrcp.f32 %v515_v3  ;;  %v529_v15 = vand.u32 2147483648, %v515_v3  ;;  %v527_v17 = vand.u32 2147483647, %v515_v3  ;;  %vm523_vm10 = vweird.f32 %v515_v3 }
 0x291   :  { %v500_v36 = vadd.f32 %v496_v7, %v355_v6 }
 0x292   :  { %v530_v21 = vor.u32 1.1754944e-38, %v529_v15  ;;  %vm528_vm12 = vcmp.eq.f32.partialorder %v527_v17, 8.507059e+37  ;;  %v724_v17 = vld [vmem:[#allocation7 + $0x258] sm:$0xff] }
 0x293   :  { %v3782_v8 = vadd.f32 %v3233_v38, %v500_v36 }
 0x295   :  { %v3268_v42 = vpop.eup %3267  ;;  %v3140_v11 = vmul.f32 -1.442695, %v3782_v8 }
 0x296   :  { %v3270_v41 = vpop.eup %3269  ;;  %v516_v13 = vadd.f32 1.0, %v3268_v42  ;;  %v728_v42 = vld [vmem:[#allocation7 + $0x278] sm:$0xff] }
 0x297   :  { %v519_v47 = vmul.f32 %v3270_v41, %v515_v3  ;;  %3271 = vpow2.f32 %v3140_v11  ;;  %vm524_vm9 = vweird.f32 %v3270_v41  ;;  %v727_v11 = vld [vmem:[#allocation7 + $0x270] sm:$0xff]  ;;  %751 = vmatpush.msra.mxu2 %v728_v42 }
 0x298   :  { %3273 = vrcp.f32 %v516_v13  ;;  %vm525_vm11 = vmor %vm523_vm10, %vm524_vm9  ;;  %v544_v29 = vand.u32 2147483648, %v516_v13  ;;  %v542_v31 = vand.u32 2147483647, %v516_v13  ;;  %vm538_vm14 = vweird.f32 %v516_v13 }
 0x299   :  { %v520_v14 = vsub.f32 1.0, %v519_v47  ;;  %752 = vmatpush.msra.mxu2 %v727_v11 }
 0x29a   :  { %v545_v34 = vor.u32 1.1754944e-38, %v544_v29  ;;  %vm543_vm1 = vcmp.eq.f32.partialorder %v542_v31, 8.507059e+37 }
 0x29b   :  { %v521_v46 = vmul.f32 %v3270_v41, %v520_v14 }
 0x29d   :  { %v3272_v18 = vpop.eup %3271  ;;  %v522_v19 = vadd.f32 %v3270_v41, %v521_v46 }
 0x29e   :  { %v3274_v20 = vpop.eup %3273  ;;  %v517_v22 = vadd.f32 1.0, %v3272_v18 }
 0x29f   :  { %v526_v23 = vsel %vm525_vm11, %v3270_v41, %v522_v19  ;;  %v534_v24 = vmul.f32 %v3274_v20, %v516_v13  ;;  %vm539_vm13 = vweird.f32 %v3274_v20  ;;  %v726_v41 = vld [vmem:[#allocation7 + $0x268] sm:$0xff] }
 0x2a0   :  { %v531_v25 = vsel %vm528_vm12, %v530_v21, %v526_v23  ;;  %3275 = vrcp.f32 %v517_v22  ;;  %vm540_vm15 = vmor %vm538_vm14, %vm539_vm13  ;;  %v559_v51 = vand.u32 2147483648, %v517_v22  ;;  %v557_v52 = vand.u32 2147483647, %v517_v22  ;;  %753 = vmatpush.msra.mxu2 %v726_v41 }
 0x2a1   :  { %v563_v27 = vmul.f32 %v531_v25, %v503_v49  ;;  %v535_v28 = vsub.f32 1.0, %v534_v24  ;;  %vm553_vm3 = vweird.f32 %v517_v22  ;;  %v721_v25 = vld [vmem:[#allocation7 + $0x240] sm:$0xff] }
 0x2a2   :  { %v560_v54 = vor.u32 1.1754944e-38, %v559_v51  ;;  %vm558_vm5 = vcmp.eq.f32.partialorder %v557_v52, 8.507059e+37  ;;  %754 = vmatpush.msra.mxu2 %v725_v16  ;;  %v805_v16 = vld [vmem:[#allocation7 + $0x2f0] sm:$0xff] }
 0x2a3   :  { %600 = vmatmul.f32.vlgmr.msrb.gmra.mxu3 %v563_v27  ;;  %v536_v30 = vmul.f32 %v3274_v20, %v535_v28 }
 0x2a4   :  { %755 = vmatpush.msra.mxu2 %v724_v17  ;;  %v803_v17 = vld [vmem:[#allocation7 + $0x2e0] sm:$0xff] }
 0x2a5   :  { %v537_v32 = vadd.f32 %v3274_v20, %v536_v30  ;;  %v720_v30 = vld [vmem:[#allocation7 + $0x238] sm:$0xff] }
 0x2a6   :  { %v3276_v33 = vpop.eup %3275 }
 0x2a7   :  { %v541_v37 = vsel %vm540_vm15, %v3274_v20, %v537_v32  ;;  %v549_v38 = vmul.f32 %v3276_v33, %v517_v22  ;;  %vm554_vm2 = vweird.f32 %v3276_v33  ;;  %v723_v20 = vld [vmem:[#allocation7 + $0x250] sm:$0xff]  ;;  %v722_v22 = vld [vmem:[#allocation7 + $0x248] sm:$0xff] }
 0x2a8   :  { %v546_v40 = vsel %vm543_vm1, %v545_v34, %v541_v37  ;;  %vm555_vm4 = vmor %vm553_vm3, %vm554_vm2  ;;  %756 = vmatpush.msra.mxu2 %v723_v20  ;;  %vm673_vm3 = vcmask 195584   ;;  %v800_v20 = vld [vmem:[#allocation7 + $0x2c8] sm:$0xff] }
 0x2a9   :  { %v564_v44 = vmul.f32 %v546_v40, %v3779_v63  ;;  %v550_v50 = vsub.f32 1.0, %v549_v38  ;;  %v111_v38 = vld [vmem:[%s4279_s5] sm:$0xff] }
 0x2aa   :  { %757 = vmatpush.msra.mxu2 %v722_v22  ;;  %v798_v22 = vld [vmem:[#allocation7 + $0x2b8] sm:$0xff]  ;;  %114 = vperm.xlu0 %3230, %v111_v38  }
 0x2ab   :  { %603 = vmatmul.f32.gmra.mxu3 %v564_v44  ;;  %v551_v49 = vmul.f32 %v3276_v33, %v550_v50  ;;  %v3822_v44 = vpop.permute.xlu2 %127  ;;  %v719_v50 = vld [vmem:[#allocation7 + $0x230] sm:$0xff] }
 0x2ac   :  { %758 = vmatpush.msra.mxu2 %v721_v25  ;;  %v795_v25 = vld [vmem:[#allocation7 + $0x2a0] sm:$0xff] }
 0x2ad   :  { %v552_v53 = vadd.f32 %v3276_v33, %v551_v49 }
 0x2ae   :  { %759 = vmatpush.msra.mxu2 %v720_v30  ;;  %v793_v30 = vld [vmem:[#allocation7 + $0x290] sm:$0xff] }
 0x2af   :  { %v556_v55 = vsel %vm555_vm4, %v3276_v33, %v552_v53  ;;  %v869_v53 = vld [vmem:[#allocation5 + $0x1d0] sm:$0xff] }
 0x2b0   :  { %v561_v56 = vsel %vm558_vm5, %v560_v54, %v556_v55  ;;  %v718_v55 = vld [vmem:[#allocation7 + $0x228] sm:$0xff]  ;;  %760 = vmatpush.msra.mxu2 %v719_v50  ;;  %v874_v50 = vld [vmem:[#allocation5 + $0x1f8] sm:$0xff] }
 0x2b1   :  { %v565_v57 = vmul.f32 %v561_v56, %v3782_v8  ;;  %895 = vmatpush.msrb.mxu1 %v874_v50 }
 0x2b2   :  { %761 = vmatpush.msra.mxu2 %v718_v55  ;;  %v867_v55 = vld [vmem:[#allocation5 + $0x1c0] sm:$0xff] }
 0x2b3   :  { %606 = vmatmul.f32.gmra.mxu3 %v565_v57  ;;  %v3841_v41 = vpop.permute.xlu2 %122 }
 0x31c   :  { %v3856_v38 = vpop.permute.xlu0 %114 }
 0x326   :  { %v601_v62 = vpop.f32.mrf.mxu3 }
 0x327   :  { %v3796_v0 = vadd.f32 %v3235_v61, %v601_v62 }
 0x329   :  { %v3141_v63 = vmul.f32 -1.442695, %v3796_v0 }
 0x32b   :  { %3277 = vpow2.f32 %v3141_v63 }
 0x32e   :  { %v604_v1 = vpop.f32.mrf.mxu3 }
 0x32f   :  { %v3799_v3 = vadd.f32 %v3235_v61, %v604_v1  ;;  %v717_v1 = vld [vmem:[#allocation7 + $0x220] sm:$0xff] }
 0x330   :  { %762 = vmatpush.msra.mxu2 %v717_v1 }
 0x331   :  { %v3278_v4 = vpop.eup %3277  ;;  %v3142_v5 = vmul.f32 -1.442695, %v3799_v3 }
 0x332   :  { %v3802_v6 = vadd.f32 1.0, %v3278_v4 }
 0x333   :  { %3279 = vpow2.f32 %v3142_v5 }
 0x334   :  { %3281 = vrcp.f32 %v3802_v6  ;;  %vm627_vm9 = vweird.f32 %v3802_v6  ;;  %v631_v34 = vand.u32 2147483647, %v3802_v6  ;;  %v633_v37 = vand.u32 2147483648, %v3802_v6 }
 0x336   :  { %v607_v7 = vpop.f32.mrf.mxu3  ;;  %vm632_vm1 = vcmp.eq.f32.partialorder %v631_v34, 8.507059e+37 }
 0x337   :  { %v3804_v36 = vadd.f32 %v3235_v61, %v607_v7  ;;  %v634_v61 = vor.u32 1.1754944e-38, %v633_v37  ;;  %v3835_v7 = vpop.permute.xlu1 %132 }
 0x339   :  { %v3280_v8 = vpop.eup %3279  ;;  %v3143_v9 = vmul.f32 -1.442695, %v3804_v36 }
 0x33a   :  { %v620_v35 = vadd.f32 1.0, %v3280_v8  ;;  %v3808_v10 = vpop.eup %3281  ;;  %v716_v8 = vld [vmem:[#allocation7 + $0x218] sm:$0xff] }
 0x33b   :  { %3283 = vpow2.f32 %v3143_v9  ;;  %v623_v47 = vmul.f32 %v3808_v10, %v3802_v6  ;;  %vm628_vm7 = vweird.f32 %v3808_v10  ;;  %763 = vmatpush.msra.mxu2 %v716_v8  ;;  %v859_v8 = vld [vmem:[#allocation5 + $0x180] sm:$0xff] }
 0x33c   :  { %3285 = vrcp.f32 %v620_v35  ;;  %v648_v29 = vand.u32 2147483648, %v620_v35  ;;  %vm642_vm8 = vweird.f32 %v620_v35  ;;  %v646_v32 = vand.u32 2147483647, %v620_v35  ;;  %vm3828_vm12 = vmor %vm627_vm9, %vm628_vm7 }
 0x33d   :  { %v624_v18 = vsub.f32 1.0, %v623_v47 }
 0x33e   :  { %v649_v54 = vor.u32 1.1754944e-38, %v648_v29  ;;  %vm647_vm13 = vcmp.eq.f32.partialorder %v646_v32, 8.507059e+37  ;;  %v748_v29 = vpop.f32.mrf.mxu1 }
 0x33f   :  { %v625_v23 = vmul.f32 %v3808_v10, %v624_v18  ;;  %v802_v18 = vld [vmem:[#allocation7 + $0x2d8] sm:$0xff] }
 0x341   :  { %v3284_v13 = vpop.eup %3283  ;;  %v626_v31 = vadd.f32 %v3808_v10, %v625_v23  ;;  %v797_v23 = vld [vmem:[#allocation7 + $0x2b0] sm:$0xff] }
 0x342   :  { %v3286_v14 = vpop.eup %3285  ;;  %v621_v15 = vadd.f32 1.0, %v3284_v13  ;;  %v714_v13 = vld [vmem:[#allocation7 + $0x208] sm:$0xff] }
 0x343   :  { %v638_v46 = vmul.f32 %v3286_v14, %v620_v35  ;;  %vm643_vm6 = vweird.f32 %v3286_v14  ;;  %v630_v56 = vsel %vm3828_vm12, %v3808_v10, %v626_v31  ;;  %v715_v10 = vld [vmem:[#allocation7 + $0x210] sm:$0xff]  ;;  %v792_v31 = vld [vmem:[#allocation7 + $0x288] sm:$0xff] }
 0x344   :  { %3287 = vrcp.f32 %v621_v15  ;;  %vm3818_vm10 = vmor %vm642_vm8, %vm643_vm6  ;;  %v663_v40 = vand.u32 2147483648, %v621_v15  ;;  %v661_v52 = vand.u32 2147483647, %v621_v15  ;;  %vm657_vm14 = vweird.f32 %v621_v15  ;;  %764 = vmatpush.msra.mxu2 %v715_v10  ;;  %v858_v10 = vld [vmem:[#allocation5 + $0x178] sm:$0xff] }
 0x345   :  { %v639_v19 = vsub.f32 1.0, %v638_v46  ;;  %v635_v5 = vsel %vm632_vm1, %v634_v61, %v630_v56  ;;  %v804_v46 = vld [vmem:[#allocation7 + $0x2e8] sm:$0xff]  ;;  %v866_v61 = vld [vmem:[#allocation5 + $0x1b8] sm:$0xff] }
 0x346   :  { %v664_v63 = vor.u32 1.1754944e-38, %v663_v40  ;;  %vm662_vm2 = vcmp.eq.f32.partialorder %v661_v52, 8.507059e+37  ;;  %v667_v42 = vmul.f32 %v635_v5, %v3796_v0  ;;  %765 = vmatpush.msra.mxu2 %v714_v13  ;;  %v713_v0 = vld [vmem:[#allocation7 + $0x200] sm:$0xff]  ;;  %v873_v40 = vld [vmem:[#allocation5 + $0x1f0] sm:$0xff]  ;;  %v868_v56 = vld [vmem:[#allocation5 + $0x1c8] sm:$0xff] }
 0x347   :  { %v640_v21 = vmul.f32 %v3286_v14, %v639_v19  ;;  %v801_v19 = vld [vmem:[#allocation7 + $0x2d0] sm:$0xff]  ;;  %875 = vmatpush.msra.mxu3 %v873_v40 }
 0x348   :  { %766 = vmatpush.msra.mxu2 %v713_v0  ;;  %v853_v13 = vld [vmem:[#allocation5 + $0x150] sm:$0xff] }
 0x349   :  { %v641_v27 = vadd.f32 %v3286_v14, %v640_v21  ;;  %v799_v21 = vld [vmem:[#allocation7 + $0x2c0] sm:$0xff] }
 0x34a   :  { %v3288_v24 = vpop.eup %3287 }
 0x34b   :  { %v653_v28 = vmul.f32 %v3288_v24, %v621_v15  ;;  %v645_v51 = vsel %vm3818_vm10, %v3286_v14, %v641_v27  ;;  %vm658_vm11 = vweird.f32 %v3288_v24  ;;  %v670_v14 = vmul.f32 %v667_v42, %v3841_v41  ;;  %v806_v15 = vld [vmem:[#allocation7 + $0x2f8] sm:$0xff]  ;;  %v855_v42 = vld [vmem:[#allocation5 + $0x160] sm:$0xff] }
 0x34c   :  { %v650_v62 = vsel %vm647_vm13, %v649_v54, %v645_v51  ;;  %vm659_vm15 = vmor %vm657_vm14, %vm658_vm11  ;;  %v794_v27 = vld [vmem:[#allocation7 + $0x298] sm:$0xff]  ;;  %v871_v51 = vld [vmem:[#allocation5 + $0x1e0] sm:$0xff] }
 0x34d   :  { %v654_v33 = vsub.f32 1.0, %v653_v28  ;;  %v668_v9 = vmul.f32 %v650_v62, %v3799_v3  ;;  %v3845_v3 = vld [vmem:[#allocation2] sm:$0xff]  ;;  %v3234_v28 = vld [vmem:[#allocation8 + $0x28] ss:$0 sm:$0xff]  ;;  %876 = vmatpush.msra.mxu3 %v871_v51  ;;  %v863_v62 = vld [vmem:[#allocation5 + $0x1a0] sm:$0xff] }
 0x34e   :  { %v749_v32 = vadd.f32 %v3234_v28, %v748_v29  ;;  %v870_v54 = vld [vmem:[#allocation5 + $0x1d8] sm:$0xff]  ;;  %v848_v28 = vld [vmem:[#allocation5 + $0x128] sm:$0xff]  ;;  %v845_v29 = vld [vmem:[#allocation5 + $0x110] sm:$0xff] }
 0x34f   :  { %v655_v49 = vmul.f32 %v3288_v24, %v654_v33  ;;  %v671_v47 = vmul.f32 %v668_v9, %v3822_v44  ;;  %v791_v33 = vld [vmem:[#allocation7 + $0x280] sm:$0xff]  ;;  %877 = vmatpush.msra.mxu3 %v869_v53  ;;  %v860_v9 = vld [vmem:[#allocation5 + $0x188] sm:$0xff]  ;;  %v1177_v53 = vld [vmem:[#allocation7 + $0x3f8] sm:$0xff] }
 0x351   :  { %v656_v57 = vadd.f32 %v3288_v24, %v655_v49  ;;  %v872_v49 = vld [vmem:[#allocation5 + $0x1e8] sm:$0xff]  ;;  %878 = vmatpush.msra.mxu3 %v867_v55  ;;  %v3881_v55 = vld [vmem:[%s4277_s3 + $0x8] sm:$0xff] }
 0x352   :  { %896 = vmatpush.msrb.mxu1 %v872_v49  ;;  %v3867_v49 = vld [vmem:[%s4277_s3] sm:$0xff] }
 0x353   :  { %v660_v4 = vsel %vm659_vm15, %v3288_v24, %v656_v57  ;;  %v796_v24 = vld [vmem:[#allocation7 + $0x2a8] sm:$0xff]  ;;  %v865_v57 = vld [vmem:[#allocation5 + $0x1b0] sm:$0xff] }
 0x354   :  { %v665_v6 = vsel %vm662_vm2, %v664_v63, %v660_v4  ;;  %897 = vmatpush.msrb.mxu1 %v870_v54  ;;  %879 = vmatpush.msra.mxu3 %v865_v57  ;;  %v864_v63 = vld [vmem:[#allocation5 + $0x1a8] sm:$0xff]  ;;  %v861_v4 = vld [vmem:[#allocation5 + $0x190] sm:$0xff]  ;;  %v1174_v57 = vld [vmem:[#allocation7 + $0x3e0] sm:$0xff] }
 0x355   :  { %v669_v35 = vmul.f32 %v665_v6, %v3804_v36  ;;  %v862_v6 = vld [vmem:[#allocation5 + $0x198] sm:$0xff]  ;;  %v1176_v54 = vld [vmem:[#allocation7 + $0x3f0] sm:$0xff] }
 0x356   :  { %898 = vmatpush.msrb.mxu1 %v868_v56  ;;  %880 = vmatpush.msra.mxu3 %v863_v62  ;;  %v1175_v56 = vld [vmem:[#allocation7 + $0x3e8] sm:$0xff]  ;;  %v3888_v62 = vld [vmem:[%s4276_s2 + $0x8] sm:$0xff] }
 0x357   :  { %v672_v11 = vmul.f32 %v669_v35, %v3835_v7  ;;  %v857_v35 = vld [vmem:[#allocation5 + $0x170] sm:$0xff] }
 0x358   :  { %899 = vmatpush.msrb.mxu1 %v866_v61  ;;  %881 = vmatpush.msra.mxu3 %v861_v4  ;;  %v1173_v61 = vld [vmem:[#allocation7 + $0x3d8] sm:$0xff]  ;;  %v1171_v4 = vld [vmem:[#allocation7 + $0x3c8] sm:$0xff] }
 0x359   :  { %690 = vmatpush.msra.mxu0 %v672_v11  ;;  %v856_v11 = vld [vmem:[#allocation5 + $0x168] sm:$0xff] }
 0x35a   :  { %900 = vmatpush.msrb.mxu1 %v864_v63  ;;  %882 = vmatpush.msra.mxu3 %v859_v8  ;;  %v1172_v63 = vld [vmem:[#allocation7 + $0x3d0] sm:$0xff]  ;;  %v3902_v8 = vld [vmem:[%s4276_s2 + $0x10] sm:$0xff] }
 0x35b   :  { %691 = vmatpush.msra.mxu0 %v671_v47 }
 0x35c   :  { %901 = vmatpush.msrb.mxu1 %v862_v6  ;;  %883 = vmatpush.msra.mxu3 %v857_v35  ;;  %v1169_v6 = vld [vmem:[#allocation7 + $0x3b8] sm:$0xff]  ;;  %v1167_v35 = vld [vmem:[#allocation7 + $0x3a8] sm:$0xff] }
 0x35d   :  { %692 = vmatpush.msra.mxu0 %v670_v14  ;;  %v854_v14 = vld [vmem:[#allocation5 + $0x158] sm:$0xff] }
 0x35e   :  { %3144 = vmatmul.msk.f32.vlgmr.msra.gmra.mxu0 %vm673_vm3, %v3845_v3  ;;  %902 = vmatpush.msrb.mxu1 %v860_v9  ;;  %v1168_v9 = vld [vmem:[#allocation7 + $0x3b0] sm:$0xff] }
 0x35f   :  { %809 = vmatpush.msrb.mxu0 %v806_v15  ;;  %884 = vmatpush.msra.mxu3 %v855_v42  ;;  %v852_v15 = vld [vmem:[#allocation5 + $0x148] sm:$0xff]  ;;  %v1165_v42 = vld [vmem:[#allocation7 + $0x398] sm:$0xff] }
 0x360   :  { %903 = vmatpush.msrb.mxu1 %v858_v10  ;;  %v1166_v10 = vld [vmem:[#allocation7 + $0x3a0] sm:$0xff] }
 0x361   :  { %810 = vmatpush.msrb.mxu0 %v805_v16  ;;  %885 = vmatpush.msra.mxu3 %v853_v13  ;;  %v1163_v13 = vld [vmem:[#allocation7 + $0x388] sm:$0xff] }
 0x362   :  { %904 = vmatpush.msrb.mxu1 %v856_v11  ;;  %v1164_v11 = vld [vmem:[#allocation7 + $0x390] sm:$0xff] }
 0x363   :  { %811 = vmatpush.msrb.mxu0 %v804_v46 }
 0x364   :  { %905 = vmatpush.msrb.mxu1 %v854_v14  ;;  %v1050_v14 = vld [vmem:[#allocation7 + $0x378] sm:$0xff] }
 0x365   :  { %812 = vmatpush.msrb.mxu0 %v803_v17 }
 0x366   :  { %906 = vmatpush.msrb.mxu1 %v852_v15  ;;  %v1047_v15 = vld [vmem:[#allocation7 + $0x360] sm:$0xff] }
 0x367   :  { %813 = vmatpush.msrb.mxu0 %v802_v18 }
 0x369   :  { %814 = vmatpush.msrb.mxu0 %v801_v19 }
 0x36b   :  { %815 = vmatpush.msrb.mxu0 %v800_v20 }
 0x36d   :  { %816 = vmatpush.msrb.mxu0 %v799_v21 }
 0x36f   :  { %817 = vmatpush.msrb.mxu0 %v798_v22 }
 0x371   :  { %818 = vmatpush.msrb.mxu0 %v797_v23 }
 0x373   :  { %819 = vmatpush.msrb.mxu0 %v796_v24  ;;  %v849_v24 = vld [vmem:[#allocation5 + $0x130] sm:$0xff] }
 0x375   :  { %820 = vmatpush.msrb.mxu0 %v795_v25  ;;  %v850_v25 = vld [vmem:[#allocation5 + $0x138] sm:$0xff] }
 0x376   :  { %907 = vmatpush.msrb.mxu1 %v850_v25  ;;  %v1039_v25 = vld [vmem:[#allocation7 + $0x320] sm:$0xff] }
 0x377   :  { %821 = vmatpush.msrb.mxu0 %v794_v27  ;;  %v847_v27 = vld [vmem:[#allocation5 + $0x120] sm:$0xff] }
 0x378   :  { %908 = vmatpush.msrb.mxu1 %v848_v28 }
 0x379   :  { %822 = vmatpush.msrb.mxu0 %v793_v30  ;;  %v846_v30 = vld [vmem:[#allocation5 + $0x118] sm:$0xff] }
 0x37a   :  { %909 = vmatpush.msrb.mxu1 %v846_v30 }
 0x37b   :  { %823 = vmatpush.msrb.mxu0 %v792_v31  ;;  %v843_v31 = vld [vmem:[#allocation5 + $0x100] sm:$0xff] }
 0x37d   :  { %824 = vmatpush.msrb.mxu0 %v791_v33  ;;  %v3236_v33 = vld [vmem:[#allocation8 + $0x30] ss:$0 sm:$0xff] }
 0x3db   :  { %v694_v36 = vpop.f32.mrf.mxu0 }
 0x3dc   :  { %767 = vmatmul.f32.vlgmr.msra.gmra.mxu2 %v694_v36  ;;  %v851_v36 = vld [vmem:[#allocation5 + $0x140] sm:$0xff] }
 0x3dd   :  { %886 = vmatpush.msra.mxu3 %v851_v36  ;;  %v1048_v36 = vld [vmem:[#allocation7 + $0x368] sm:$0xff] }
 0x3df   :  { %887 = vmatpush.msra.mxu3 %v849_v24  ;;  %v1040_v24 = vld [vmem:[#allocation7 + $0x328] sm:$0xff] }
 0x3e1   :  { %888 = vmatpush.msra.mxu3 %v847_v27 }
 0x3e3   :  { %889 = vmatpush.msra.mxu3 %v845_v29  ;;  %v1038_v29 = vld [vmem:[#allocation7 + $0x318] sm:$0xff] }
 0x3e5   :  { %890 = vmatpush.msra.mxu3 %v843_v31 }
 0x45f   :  { %v768_v34 = vpop.f32.mrf.mxu2 }
 0x460   :  { %v3849_v37 = vadd.f32 %v768_v34, %v749_v32  ;;  %v844_v32 = vld [vmem:[#allocation5 + $0x108] sm:$0xff] }
 0x461   :  { %910 = vmatpush.msrb.mxu1 %v844_v32  ;;  %v1037_v32 = vld [vmem:[#allocation7 + $0x310] sm:$0xff] }
 0x462   :  { %v3145_v52 = vmul.f32 -1.442695, %v3849_v37 }
 0x464   :  { %3289 = vpow2.f32 %v3145_v52 }
 0x46a   :  { %v3290_v1 = vpop.eup %3289 }
 0x46b   :  { %v774_v5 = vadd.f32 1.0, %v3290_v1  ;;  %v3895_v1 = vld [vmem:[%s4277_s3 + $0x10] sm:$0xff] }
 0x46d   :  { %3291 = vrcp.f32 %v774_v5  ;;  %v786_v46 = vand.u32 2147483648, %v774_v5  ;;  %v784_v18 = vand.u32 2147483647, %v774_v5  ;;  %vm780_vm5 = vweird.f32 %v774_v5 }
 0x46f   :  { %v787_v20 = vor.u32 1.1754944e-38, %v786_v46  ;;  %vm785_vm7 = vcmp.eq.f32.partialorder %v784_v18, 8.507059e+37  ;;  %v1045_v46 = vld [vmem:[#allocation7 + $0x350] sm:$0xff]  ;;  %v1043_v18 = vld [vmem:[#allocation7 + $0x340] sm:$0xff] }
 0x473   :  { %v3292_v47 = vpop.eup %3291 }
 0x474   :  { %v776_v0 = vmul.f32 %v3292_v47, %v774_v5  ;;  %vm781_vm4 = vweird.f32 %v3292_v47  ;;  %v1170_v5 = vld [vmem:[#allocation7 + $0x3c0] sm:$0xff] }
 0x475   :  { %vm782_vm6 = vmor %vm780_vm5, %vm781_vm4 }
 0x476   :  { %v777_v16 = vsub.f32 1.0, %v776_v0  ;;  %v1049_v0 = vld [vmem:[#allocation7 + $0x370] sm:$0xff] }
 0x478   :  { %v778_v17 = vmul.f32 %v3292_v47, %v777_v16  ;;  %v1046_v16 = vld [vmem:[#allocation7 + $0x358] sm:$0xff] }
 0x47a   :  { %v779_v19 = vadd.f32 %v3292_v47, %v778_v17  ;;  %v1044_v17 = vld [vmem:[#allocation7 + $0x348] sm:$0xff] }
 0x47c   :  { %v783_v21 = vsel %vm782_vm6, %v3292_v47, %v779_v19  ;;  %v1162_v47 = vld [vmem:[#allocation7 + $0x380] sm:$0xff]  ;;  %v831_v19 = vld [vmem:[#allocation8 + $0x38] sm:$0x3] }
 0x47d   :  { %v788_v22 = vsel %vm785_vm7, %v787_v20, %v783_v21  ;;  %v1042_v20 = vld [vmem:[#allocation7 + $0x338] sm:$0xff]  ;;  %v1041_v21 = vld [vmem:[#allocation7 + $0x330] sm:$0xff] }
 0x47e   :  { %v790_v23 = vmul.f32 %v788_v22, %v3849_v37  ;;  %v832_v22 = vperm.slane %v831_v19, 0 }
 0x480   :  { %825 = vmatmul.f32.vlgmr.msrb.gmra.mxu0 %v790_v23  ;;  %v836_v23 = vperm.slane %v831_v19, 1  ;;  %v833_v27 = vmul.f32 %v832_v22, %v3767_v26 }
 0x482   :  { %v837_v28 = vmul.f32 %v836_v23, %v3767_v26 }
 0x4fd   :  { %v826_v34 = vpop.f32.mrf.mxu0 }
 0x4fe   :  { %v827_v37 = vadd.f32 %v3236_v33, %v826_v34  ;;  %v840_v33 = vadd.f32 %v837_v28, %v833_v27 }
 0x500   :  { %v829_v40 = vadd.f32 %v827_v37, %v3750_v59  ;;  %v3874_v59 = vld [vmem:[%s4276_s2] sm:$0xff]  ;;  %v3237_v37 = vld [vmem:[#allocation8 + $0x40] ss:$0 sm:$0xff] }
 0x502   :  { %v3860_v50 = vmul.f32 %v829_v40, %v3856_v38  ;;  %v1036_v40 = vld [vmem:[#allocation7 + $0x308] sm:$0xff] }
 0x504   :  { %891 = vmatmul.f32.vlgmr.msra.gmra.mxu3 %v3860_v50  ;;  %911 = vmatmul.f32.vlgmr.msrb.gmra.mxu1 %v3860_v50 }
 0x581   :  { %v912_v51 = vpop.f32.mrf.mxu1 }
 0x582   :  { %930 = vmatpush.msrb.mxu2 %v912_v51 }
 0x583   :  { %3146 = vmatmul.msk.f32.vlgmr.msrb.gmra.mxu2 %vm135_vm0, %v3867_v49 }
 0x584   :  { %1053 = vmatpush.msra.mxu2 %v1050_v14 }
 0x586   :  { %1054 = vmatpush.msra.mxu2 %v1049_v0 }
 0x587   :  { %v892_v52 = vpop.f32.mrf.mxu3 }
 0x588   :  { %956 = vmatpush.msra.mxu0 %v892_v52  ;;  %1055 = vmatpush.msra.mxu2 %v1048_v36  ;;  %v1035_v52 = vld [vmem:[#allocation7 + $0x300] sm:$0xff] }
 0x589   :  { %3149 = vmatmul.msk.f32.vlgmr.msra.gmra.mxu0 %vm135_vm0, %v3874_v59 }
 0x58a   :  { %1196 = vmatpush.msrb.mxu0 %v1177_v53  ;;  %1056 = vmatpush.msra.mxu2 %v1047_v15 }
 0x58b   :  { %3147 = vmatmul.msk.f32.gmra.mxu2 %vm135_vm0, %v3881_v55 }
 0x58c   :  { %1197 = vmatpush.msrb.mxu0 %v1176_v54  ;;  %1057 = vmatpush.msra.mxu2 %v1046_v16  ;;  %v834_v54 = vmul.f32 %v832_v22, %v3771_v45 }
 0x58e   :  { %1198 = vmatpush.msrb.mxu0 %v1175_v56  ;;  %1058 = vmatpush.msra.mxu2 %v1045_v46  ;;  %v838_v56 = vmul.f32 %v836_v23, %v3771_v45 }
 0x590   :  { %1199 = vmatpush.msrb.mxu0 %v1174_v57  ;;  %1059 = vmatpush.msra.mxu2 %v1044_v17 }
 0x591   :  { %3150 = vmatmul.msk.f32.gmra.mxu0 %vm135_vm0, %v3888_v62 }
 0x592   :  { %1200 = vmatpush.msrb.mxu0 %v1173_v61  ;;  %1060 = vmatpush.msra.mxu2 %v1043_v18 }
 0x593   :  { %3148 = vmatmul.msk.f32.gmra.mxu2 %vm135_vm0, %v3895_v1 }
 0x594   :  { %1201 = vmatpush.msrb.mxu0 %v1172_v63  ;;  %1061 = vmatpush.msra.mxu2 %v1042_v20 }
 0x596   :  { %1202 = vmatpush.msrb.mxu0 %v1171_v4  ;;  %1062 = vmatpush.msra.mxu2 %v1041_v21  ;;  %v841_v4 = vadd.f32 %v838_v56, %v834_v54 }
 0x598   :  { %1203 = vmatpush.msrb.mxu0 %v1170_v5  ;;  %1063 = vmatpush.msra.mxu2 %v1040_v24 }
 0x599   :  { %3151 = vmatmul.msk.f32.gmra.mxu0 %vm135_vm0, %v3902_v8 }
 0x59a   :  { %1204 = vmatpush.msrb.mxu0 %v1169_v6  ;;  %1064 = vmatpush.msra.mxu2 %v1039_v25 }
 0x59c   :  { %1205 = vmatpush.msrb.mxu0 %v1168_v9  ;;  %1065 = vmatpush.msra.mxu2 %v1038_v29  ;;  %v835_v9 = vmul.f32 %v832_v22, %v3775_v58 }
 0x59e   :  { %1206 = vmatpush.msrb.mxu0 %v1167_v35  ;;  %1066 = vmatpush.msra.mxu2 %v1037_v32  ;;  %v839_v35 = vmul.f32 %v836_v23, %v3775_v58 }
 0x5a0   :  { %1207 = vmatpush.msrb.mxu0 %v1166_v10  ;;  %1067 = vmatpush.msra.mxu2 %v1036_v40  ;;  %v842_v0 = vadd.f32 %v839_v35, %v835_v9 }
 0x5a2   :  { %1208 = vmatpush.msrb.mxu0 %v1165_v42  ;;  %1068 = vmatpush.msra.mxu2 %v1035_v52 }
 0x5a4   :  { %1209 = vmatpush.msrb.mxu0 %v1164_v11 }
 0x5a6   :  { %1210 = vmatpush.msrb.mxu0 %v1163_v13 }
 0x5a8   :  { %1211 = vmatpush.msrb.mxu0 %v1162_v47 }
 0x5a9   :  { %1212 = vmatmul.f32.vlgmr.msrb.gmra.mxu0 %v3860_v50 }
 0x606   :  { %v932_v30 = vpop.f32.mrf.mxu2  ;;  %v958_v31 = vpop.f32.mrf.mxu0 }
 0x607   :  { %v959_v34 = vadd.f32 %v958_v31, %v932_v30 }
 0x609   :  { %v967_v51 = vadd.f32 %v959_v34, %v840_v33 }
 0x60b   :  { %v972_v53 = vadd.f32 %v3237_v37, %v967_v51 }
 0x60d   :  { %v3152_v57 = vmul.f32 -1.442695, %v972_v53 }
 0x60e   :  { %v935_v61 = vpop.f32.mrf.mxu2  ;;  %v961_v63 = vpop.f32.mrf.mxu0 }
 0x60f   :  { %3293 = vpow2.f32 %v3152_v57  ;;  %v962_v5 = vadd.f32 %v961_v63, %v935_v61 }
 0x611   :  { %v968_v6 = vadd.f32 %v962_v5, %v841_v4 }
 0x613   :  { %v973_v10 = vadd.f32 %v3237_v37, %v968_v6 }
 0x615   :  { %v3294_v42 = vpop.eup %3293  ;;  %v3153_v11 = vmul.f32 -1.442695, %v973_v10 }
 0x616   :  { %v984_v13 = vadd.f32 1.0, %v3294_v42  ;;  %v938_v47 = vpop.f32.mrf.mxu2  ;;  %v964_v14 = vpop.f32.mrf.mxu0 }
 0x617   :  { %v965_v36 = vadd.f32 %v964_v14, %v938_v47  ;;  %3295 = vpow2.f32 %v3153_v11 }
 0x618   :  { %3297 = vrcp.f32 %v984_v13  ;;  %v998_v22 = vand.u32 2147483648, %v984_v13  ;;  %v996_v24 = vand.u32 2147483647, %v984_v13  ;;  %vm992_vm9 = vweird.f32 %v984_v13 }
 0x619   :  { %v969_v15 = vadd.f32 %v965_v36, %v842_v0  ;;  %v3239_v0 = vld [vmem:[#allocation8 + $0x48] ss:$0 sm:$0xff] }
 0x61a   :  { %v999_v29 = vor.u32 1.1754944e-38, %v998_v22  ;;  %vm997_vm11 = vcmp.eq.f32.partialorder %v996_v24, 8.507059e+37 }
 0x61b   :  { %v974_v16 = vadd.f32 %v3237_v37, %v969_v15 }
 0x61d   :  { %v3296_v46 = vpop.eup %3295  ;;  %v3154_v17 = vmul.f32 -1.442695, %v974_v16 }
 0x61e   :  { %v3298_v18 = vpop.eup %3297  ;;  %v985_v19 = vadd.f32 1.0, %v3296_v46 }
 0x61f   :  { %v988_v20 = vmul.f32 %v3298_v18, %v984_v13  ;;  %3299 = vpow2.f32 %v3154_v17  ;;  %vm993_vm8 = vweird.f32 %v3298_v18 }
 0x620   :  { %3301 = vrcp.f32 %v985_v19  ;;  %vm994_vm10 = vmor %vm992_vm9, %vm993_vm8  ;;  %v1013_v40 = vand.u32 2147483648, %v985_v19  ;;  %v1011_v52 = vand.u32 2147483647, %v985_v19  ;;  %vm1007_vm13 = vweird.f32 %v985_v19 }
 0x621   :  { %v989_v21 = vsub.f32 1.0, %v988_v20 }
 0x622   :  { %v1014_v57 = vor.u32 1.1754944e-38, %v1013_v40  ;;  %vm1012_vm15 = vcmp.eq.f32.partialorder %v1011_v52, 8.507059e+37  ;;  %v1189_v40 = vld [vmem:[#allocation7 + $0x458] sm:$0xff] }
 0x623   :  { %v990_v23 = vmul.f32 %v3298_v18, %v989_v21 }
 0x625   :  { %v3300_v25 = vpop.eup %3299  ;;  %v991_v27 = vadd.f32 %v3298_v18, %v990_v23 }
 0x626   :  { %v3302_v28 = vpop.eup %3301  ;;  %v986_v30 = vadd.f32 1.0, %v3300_v25 }
 0x627   :  { %v995_v31 = vsel %vm994_vm10, %v3298_v18, %v991_v27  ;;  %v1003_v32 = vmul.f32 %v3302_v28, %v985_v19  ;;  %vm1008_vm12 = vweird.f32 %v3302_v28  ;;  %v1193_v27 = vld [vmem:[#allocation7 + $0x478] sm:$0xff] }
 0x628   :  { %v1000_v33 = vsel %vm997_vm11, %v999_v29, %v995_v31  ;;  %3303 = vrcp.f32 %v986_v30  ;;  %vm1009_vm14 = vmor %vm1007_vm13, %vm1008_vm12  ;;  %v1028_v9 = vand.u32 2147483648, %v986_v30  ;;  %v1026_v35 = vand.u32 2147483647, %v986_v30  ;;  %1216 = vmatpush.msra.mxu1 %v1193_v27  ;;  %v1191_v29 = vld [vmem:[#allocation7 + $0x468] sm:$0xff] }
 0x629   :  { %v1032_v34 = vmul.f32 %v1000_v33, %v972_v53  ;;  %v1004_v37 = vsub.f32 1.0, %v1003_v32  ;;  %vm1022_vm2 = vweird.f32 %v986_v30 }
 0x62a   :  { %v1029_v11 = vor.u32 1.1754944e-38, %v1028_v9  ;;  %vm1027_vm5 = vcmp.eq.f32.partialorder %v1026_v35, 8.507059e+37 }
 0x62b   :  { %1069 = vmatmul.f32.vlgmr.msra.gmra.mxu2 %v1032_v34  ;;  %v1005_v51 = vmul.f32 %v3302_v28, %v1004_v37  ;;  %v1190_v34 = vld [vmem:[#allocation7 + $0x460] sm:$0xff] }
 0x62d   :  { %v1006_v54 = vadd.f32 %v3302_v28, %v1005_v51 }
 0x62e   :  { %v3304_v56 = vpop.eup %3303 }
 0x62f   :  { %v1010_v61 = vsel %vm1009_vm14, %v3302_v28, %v1006_v54  ;;  %v1018_v63 = vmul.f32 %v3304_v56, %v986_v30  ;;  %vm1023_vm1 = vweird.f32 %v3304_v56  ;;  %v1192_v28 = vld [vmem:[#allocation7 + $0x470] sm:$0xff] }
 0x630   :  { %v1015_v4 = vsel %vm1012_vm15, %v1014_v57, %v1010_v61  ;;  %vm1024_vm4 = vmor %vm1022_vm2, %vm1023_vm1  ;;  %1217 = vmatpush.msra.mxu1 %v1192_v28  ;;  %v1188_v54 = vld [vmem:[#allocation7 + $0x450] sm:$0xff]  ;;  %v1187_v57 = vld [vmem:[#allocation7 + $0x448] sm:$0xff] }
 0x631   :  { %v1033_v5 = vmul.f32 %v1015_v4, %v973_v10  ;;  %v1019_v6 = vsub.f32 1.0, %v1018_v63  ;;  %v1186_v4 = vld [vmem:[#allocation7 + $0x440] sm:$0xff] }
 0x632   :  { %1218 = vmatpush.msra.mxu1 %v1191_v29  ;;  %v1182_v29 = vld [vmem:[#allocation7 + $0x420] sm:$0xff] }
 0x633   :  { %1072 = vmatmul.f32.gmra.mxu2 %v1033_v5  ;;  %v1020_v53 = vmul.f32 %v3304_v56, %v1019_v6 }
 0x634   :  { %1219 = vmatpush.msra.mxu1 %v1190_v34  ;;  %v1181_v34 = vld [vmem:[#allocation7 + $0x418] sm:$0xff] }
 0x635   :  { %v1021_v42 = vadd.f32 %v3304_v56, %v1020_v53  ;;  %v1185_v53 = vld [vmem:[#allocation7 + $0x438] sm:$0xff] }
 0x636   :  { %1220 = vmatpush.msra.mxu1 %v1189_v40  ;;  %v1180_v40 = vld [vmem:[#allocation7 + $0x410] sm:$0xff] }
 0x637   :  { %v1025_v13 = vsel %vm1024_vm4, %v3304_v56, %v1021_v42 }
 0x638   :  { %v1030_v47 = vsel %vm1027_vm5, %v1029_v11, %v1025_v13  ;;  %1221 = vmatpush.msra.mxu1 %v1188_v54 }
 0x639   :  { %v1034_v14 = vmul.f32 %v1030_v47, %v974_v16 }
 0x63a   :  { %1222 = vmatpush.msra.mxu1 %v1187_v57  ;;  %v1270_v57 = vld [vmem:[#allocation7 + $0x4f0] sm:$0xff] }
 0x63b   :  { %1075 = vmatmul.f32.gmra.mxu2 %v1034_v14  ;;  %v1258_v14 = vld [vmem:[#allocation7 + $0x490] sm:$0xff] }
 0x63c   :  { %1223 = vmatpush.msra.mxu1 %v1186_v4  ;;  %v1267_v4 = vld [vmem:[#allocation7 + $0x4d8] sm:$0xff] }
 0x63e   :  { %1224 = vmatpush.msra.mxu1 %v1185_v53  ;;  %v1262_v53 = vld [vmem:[#allocation7 + $0x4b0] sm:$0xff] }
 0x6ae   :  { %v1070_v36 = vpop.f32.mrf.mxu2 }
 0x6af   :  { %v3913_v15 = vadd.f32 %v3239_v0, %v1070_v36  ;;  %v1184_v36 = vld [vmem:[#allocation7 + $0x430] sm:$0xff] }
 0x6b0   :  { %1225 = vmatpush.msra.mxu1 %v1184_v36 }
 0x6b1   :  { %v3155_v10 = vmul.f32 -1.442695, %v3913_v15 }
 0x6b3   :  { %3305 = vpow2.f32 %v3155_v10 }
 0x6b6   :  { %v1073_v46 = vpop.f32.mrf.mxu2 }
 0x6b7   :  { %v3916_v17 = vadd.f32 %v3239_v0, %v1073_v46 }
 0x6b9   :  { %v3306_v18 = vpop.eup %3305  ;;  %v3156_v19 = vmul.f32 -1.442695, %v3916_v17 }
 0x6ba   :  { %v3919_v20 = vadd.f32 1.0, %v3306_v18 }
 0x6bb   :  { %3307 = vpow2.f32 %v3156_v19  ;;  %v1338_v19 = vld [vmem:[#allocation5 + $0x2f0] sm:$0xff] }
 0x6bc   :  { %3309 = vrcp.f32 %v3919_v20  ;;  %vm1096_vm9 = vweird.f32 %v3919_v20  ;;  %v1100_v13 = vand.u32 2147483647, %v3919_v20  ;;  %v1102_v47 = vand.u32 2147483648, %v3919_v20  ;;  %1340 = vmatpush.msrb.mxu2 %v1338_v19  ;;  %v1768_v19 = vld [vmem:[#allocation5 + $0x3e8] sm:$0xff] }
 0x6be   :  { %v1076_v21 = vpop.f32.mrf.mxu2  ;;  %vm1101_vm1 = vcmp.eq.f32.partialorder %v1100_v13, 8.507059e+37  ;;  %v3238_v13 = vld [vmem:[#allocation8 + $0x50] ss:$0 sm:$0xff] }
 0x6bf   :  { %v3921_v22 = vadd.f32 %v3239_v0, %v1076_v21  ;;  %v1183_v21 = vld [vmem:[#allocation7 + $0x428] sm:$0xff] }
 0x6c0   :  { %1226 = vmatpush.msra.mxu1 %v1183_v21 }
 0x6c1   :  { %v3308_v16 = vpop.eup %3307  ;;  %v3157_v23 = vmul.f32 -1.442695, %v3921_v22 }
 0x6c2   :  { %v1089_v24 = vadd.f32 1.0, %v3308_v16  ;;  %v3925_v25 = vpop.eup %3309  ;;  %1227 = vmatpush.msra.mxu1 %v1182_v29  ;;  %v1335_v29 = vld [vmem:[#allocation5 + $0x2d8] sm:$0xff] }
 0x6c3   :  { %3311 = vpow2.f32 %v3157_v23  ;;  %v1092_v31 = vmul.f32 %v3925_v25, %v3919_v20  ;;  %vm1097_vm7 = vweird.f32 %v3925_v25 }
 0x6c4   :  { %3313 = vrcp.f32 %v1089_v24  ;;  %v1117_v9 = vand.u32 2147483648, %v1089_v24  ;;  %vm1111_vm8 = vweird.f32 %v1089_v24  ;;  %v1115_v42 = vand.u32 2147483647, %v1089_v24  ;;  %vm3943_vm12 = vmor %vm1096_vm9, %vm1097_vm7  ;;  %1228 = vmatpush.msra.mxu1 %v1181_v34  ;;  %v1326_v34 = vld [vmem:[#allocation5 + $0x290] sm:$0xff] }
 0x6c5   :  { %v1093_v51 = vsub.f32 1.0, %v1092_v31 }
 0x6c6   :  { %v1118_v20 = vor.u32 1.1754944e-38, %v1117_v9  ;;  %vm1116_vm13 = vcmp.eq.f32.partialorder %v1115_v42, 8.507059e+37  ;;  %1229 = vmatpush.msra.mxu1 %v1180_v40  ;;  %v1264_v9 = vld [vmem:[#allocation7 + $0x4c0] sm:$0xff] }
 0x6c7   :  { %v1094_v61 = vmul.f32 %v3925_v25, %v1093_v51  ;;  %v1260_v42 = vld [vmem:[#allocation7 + $0x4a0] sm:$0xff] }
 0x6c8   :  { %v1324_v40 = vld [vmem:[#allocation5 + $0x280] sm:$0xff] }
 0x6c9   :  { %v3312_v30 = vpop.eup %3311  ;;  %v1095_v35 = vadd.f32 %v3925_v25, %v1094_v61  ;;  %v1269_v61 = vld [vmem:[#allocation7 + $0x4e8] sm:$0xff] }
 0x6ca   :  { %v3314_v32 = vpop.eup %3313  ;;  %v1090_v33 = vadd.f32 1.0, %v3312_v30 }
 0x6cb   :  { %v1107_v37 = vmul.f32 %v3314_v32, %v1089_v24  ;;  %vm1112_vm6 = vweird.f32 %v3314_v32  ;;  %v1099_v16 = vsel %vm3943_vm12, %v3925_v25, %v1095_v35  ;;  %v1103_v24 = vor.u32 1.1754944e-38, %v1102_v47  ;;  %v1261_v35 = vld [vmem:[#allocation7 + $0x4a8] sm:$0xff]  ;;  %v1213_v47 = vpop.f32.mrf.mxu0 }
 0x6cc   :  { %3315 = vrcp.f32 %v1090_v33  ;;  %vm3935_vm10 = vmor %vm1111_vm8, %vm1112_vm6  ;;  %v1132_v0 = vand.u32 2147483648, %v1090_v33  ;;  %v1130_v18 = vand.u32 2147483647, %v1090_v33  ;;  %vm1126_vm14 = vweird.f32 %v1090_v33 }
 0x6cd   :  { %v1108_v52 = vsub.f32 1.0, %v1107_v37  ;;  %v1104_v31 = vsel %vm1101_vm1, %v1103_v24, %v1099_v16  ;;  %v1214_v36 = vadd.f32 %v3238_v13, %v1213_v47  ;;  %v1334_v16 = vld [vmem:[#allocation5 + $0x2d0] sm:$0xff]  ;;  %v1339_v24 = vld [vmem:[#allocation5 + $0x2f8] sm:$0xff] }
 0x6ce   :  { %v1133_v28 = vor.u32 1.1754944e-38, %v1132_v0  ;;  %vm1131_vm2 = vcmp.eq.f32.partialorder %v1130_v18, 8.507059e+37  ;;  %v1257_v0 = vld [vmem:[#allocation7 + $0x488] sm:$0xff]  ;;  %1360 = vmatpush.msra.mxu0 %v1339_v24  ;;  %v1310_v13 = vld [vmem:[#allocation5 + $0x210] sm:$0xff]  ;;  %v1758_v24 = vld [vmem:[#allocation5 + $0x398] sm:$0xff] }
 0x6cf   :  { %v1109_v56 = vmul.f32 %v3314_v32, %v1108_v52  ;;  %v1179_v52 = vld [vmem:[#allocation7 + $0x408] sm:$0xff] }
 0x6d0   :  { %1230 = vmatpush.msra.mxu1 %v1179_v52  ;;  %v1327_v52 = vld [vmem:[#allocation5 + $0x298] sm:$0xff] }
 0x6d1   :  { %v1110_v5 = vadd.f32 %v3314_v32, %v1109_v56 }
 0x6d2   :  { %v3316_v63 = vpop.eup %3315 }
 0x6d3   :  { %v1122_v6 = vmul.f32 %v3316_v63, %v1090_v33  ;;  %v1114_v10 = vsel %vm3935_vm10, %v3314_v32, %v1110_v5  ;;  %vm1127_vm11 = vweird.f32 %v3316_v63  ;;  %v1136_v33 = vmul.f32 %v1104_v31, %v3913_v15  ;;  %v1271_v15 = vld [vmem:[#allocation7 + $0x4f8] sm:$0xff]  ;;  %v1266_v5 = vld [vmem:[#allocation7 + $0x4d0] sm:$0xff]  ;;  %v1333_v31 = vld [vmem:[#allocation5 + $0x2c8] sm:$0xff] }
 0x6d4   :  { %v1119_v27 = vsel %vm1116_vm13, %v1118_v20, %v1114_v10  ;;  %vm1128_vm15 = vmor %vm1126_vm14, %vm1127_vm11  ;;  %v1256_v10 = vld [vmem:[#allocation7 + $0x480] sm:$0xff] }
 0x6d5   :  { %v1123_v11 = vsub.f32 1.0, %v1122_v6  ;;  %v1137_v37 = vmul.f32 %v1119_v27, %v3916_v17  ;;  %v1139_v56 = vmul.f32 %v1136_v33, %v3841_v41  ;;  %v1178_v17 = vld [vmem:[#allocation7 + $0x400] sm:$0xff]  ;;  %v1265_v6 = vld [vmem:[#allocation7 + $0x4c8] sm:$0xff] }
 0x6d6   :  { %1231 = vmatpush.msra.mxu1 %v1178_v17  ;;  %v1336_v20 = vld [vmem:[#allocation5 + $0x2e0] sm:$0xff]  ;;  %v1337_v27 = vld [vmem:[#allocation5 + $0x2e8] sm:$0xff]  ;;  %v1318_v17 = vld [vmem:[#allocation5 + $0x250] sm:$0xff] }
 0x6d7   :  { %v1124_v46 = vmul.f32 %v3316_v63, %v1123_v11  ;;  %v1140_v54 = vmul.f32 %v1137_v37, %v3822_v44  ;;  %v1259_v11 = vld [vmem:[#allocation7 + $0x498] sm:$0xff]  ;;  %1341 = vmatpush.msrb.mxu2 %v1336_v20  ;;  %1361 = vmatpush.msra.mxu0 %v1337_v27  ;;  %v1329_v33 = vld [vmem:[#allocation5 + $0x2a8] sm:$0xff] }
 0x6d8   :  { %v1331_v37 = vld [vmem:[#allocation5 + $0x2b8] sm:$0xff]  ;;  %v1756_v27 = vld [vmem:[#allocation5 + $0x388] sm:$0xff] }
 0x6d9   :  { %v1125_v23 = vadd.f32 %v3316_v63, %v1124_v46  ;;  %1342 = vmatpush.msrb.mxu2 %v1334_v16  ;;  %1362 = vmatpush.msra.mxu0 %v1335_v29  ;;  %v1766_v20 = vld [vmem:[#allocation5 + $0x3d8] sm:$0xff] }
 0x6da   :  { %v1762_v16 = vld [vmem:[#allocation5 + $0x3b8] sm:$0xff] }
 0x6db   :  { %v1129_v30 = vsel %vm1128_vm15, %v3316_v63, %v1125_v23  ;;  %v1268_v63 = vld [vmem:[#allocation7 + $0x4e0] sm:$0xff]  ;;  %1363 = vmatpush.msra.mxu0 %v1333_v31  ;;  %v1754_v29 = vld [vmem:[#allocation5 + $0x378] sm:$0xff] }
 0x6dc   :  { %v1134_v32 = vsel %vm1131_vm2, %v1133_v28, %v1129_v30  ;;  %v1332_v23 = vld [vmem:[#allocation5 + $0x2c0] sm:$0xff]  ;;  %v1330_v28 = vld [vmem:[#allocation5 + $0x2b0] sm:$0xff]  ;;  %v1311_v31 = vld [vmem:[#allocation5 + $0x218] sm:$0xff] }
 0x6dd   :  { %v1138_v25 = vmul.f32 %v1134_v32, %v3921_v22  ;;  %1343 = vmatpush.msrb.mxu2 %v1332_v23  ;;  %v1328_v30 = vld [vmem:[#allocation5 + $0x2a0] sm:$0xff]  ;;  %1364 = vmatpush.msra.mxu0 %v1331_v37  ;;  %v1760_v23 = vld [vmem:[#allocation5 + $0x3a8] sm:$0xff] }
 0x6de   :  { %v1748_v37 = vld [vmem:[#allocation5 + $0x348] sm:$0xff] }
 0x6df   :  { %v1141_v51 = vmul.f32 %v1138_v25, %v3835_v7  ;;  %1344 = vmatpush.msrb.mxu2 %v1330_v28  ;;  %1365 = vmatpush.msra.mxu0 %v1329_v33  ;;  %v1315_v28 = vld [vmem:[#allocation5 + $0x238] sm:$0xff] }
 0x6e0   :  { %v1742_v33 = vld [vmem:[#allocation5 + $0x318] sm:$0xff] }
 0x6e1   :  { %1155 = vmatpush.msrb.mxu3 %v1141_v51  ;;  %1345 = vmatpush.msrb.mxu2 %v1328_v30  ;;  %v1322_v51 = vld [vmem:[#allocation5 + $0x270] sm:$0xff]  ;;  %v1752_v30 = vld [vmem:[#allocation5 + $0x368] sm:$0xff] }
 0x6e2   :  { %1366 = vmatpush.msra.mxu0 %v1327_v52  ;;  %v3240_v52 = vld [vmem:[#allocation8 + $0x58] ss:$0 sm:$0xff] }
 0x6e3   :  { %1156 = vmatpush.msrb.mxu3 %v1140_v54  ;;  %1346 = vmatpush.msrb.mxu2 %v1326_v34  ;;  %v1320_v54 = vld [vmem:[#allocation5 + $0x260] sm:$0xff]  ;;  %v1309_v34 = vld [vmem:[#allocation5 + $0x208] sm:$0xff] }
 0x6e5   :  { %1157 = vmatpush.msrb.mxu3 %v1139_v56  ;;  %1347 = vmatpush.msrb.mxu2 %v1324_v40  ;;  %v1325_v56 = vld [vmem:[#allocation5 + $0x288] sm:$0xff] }
 0x6e6   :  { %3158 = vmatmul.msk.f32.vlgmr.msrb.gmra.mxu3 %vm673_vm3, %v3845_v3  ;;  %v1263_v3 = vld [vmem:[#allocation7 + $0x4b8] sm:$0xff]  ;;  %1367 = vmatpush.msra.mxu0 %v1325_v56  ;;  %v1744_v40 = vld [vmem:[#allocation5 + $0x328] sm:$0xff] }
 0x6e7   :  { %1274 = vmatpush.msra.mxu3 %v1271_v15  ;;  %1348 = vmatpush.msrb.mxu2 %v1322_v51  ;;  %v1740_v51 = vld [vmem:[#allocation5 + $0x308] sm:$0xff] }
 0x6e9   :  { %1275 = vmatpush.msra.mxu3 %v1270_v57  ;;  %1349 = vmatpush.msrb.mxu2 %v1320_v54 }
 0x6eb   :  { %1276 = vmatpush.msra.mxu3 %v1269_v61  ;;  %v1316_v61 = vld [vmem:[#allocation5 + $0x240] sm:$0xff]  ;;  %1350 = vmatpush.msrb.mxu2 %v1318_v17 }
 0x6ed   :  { %1277 = vmatpush.msra.mxu3 %v1268_v63  ;;  %v1321_v63 = vld [vmem:[#allocation5 + $0x268] sm:$0xff]  ;;  %1351 = vmatpush.msrb.mxu2 %v1316_v61 }
 0x6ef   :  { %1278 = vmatpush.msra.mxu3 %v1267_v4 }
 0x6f1   :  { %1279 = vmatpush.msra.mxu3 %v1266_v5  ;;  %v1314_v5 = vld [vmem:[#allocation5 + $0x230] sm:$0xff] }
 0x6f2   :  { %1352 = vmatpush.msrb.mxu2 %v1314_v5  ;;  %v1509_v5 = vld [vmem:[#allocation7 + $0x548] sm:$0xff] }
 0x6f3   :  { %1280 = vmatpush.msra.mxu3 %v1265_v6  ;;  %v1319_v6 = vld [vmem:[#allocation5 + $0x258] sm:$0xff] }
 0x6f5   :  { %1281 = vmatpush.msra.mxu3 %v1264_v9 }
 0x6f7   :  { %1282 = vmatpush.msra.mxu3 %v1263_v3 }
 0x6f9   :  { %1283 = vmatpush.msra.mxu3 %v1262_v53 }
 0x6fb   :  { %1284 = vmatpush.msra.mxu3 %v1261_v35  ;;  %v1312_v35 = vld [vmem:[#allocation5 + $0x220] sm:$0xff] }
 0x6fc   :  { %1353 = vmatpush.msrb.mxu2 %v1312_v35  ;;  %v1505_v35 = vld [vmem:[#allocation7 + $0x528] sm:$0xff] }
 0x6fd   :  { %1285 = vmatpush.msra.mxu3 %v1260_v42  ;;  %v1317_v42 = vld [vmem:[#allocation5 + $0x248] sm:$0xff] }
 0x6fe   :  { %1354 = vmatpush.msrb.mxu2 %v1310_v13 }
 0x6ff   :  { %1286 = vmatpush.msra.mxu3 %v1259_v11 }
 0x701   :  { %1287 = vmatpush.msra.mxu3 %v1258_v14 }
 0x703   :  { %1288 = vmatpush.msra.mxu3 %v1257_v0  ;;  %v1308_v0 = vld [vmem:[#allocation5 + $0x200] sm:$0xff] }
 0x704   :  { %1355 = vmatpush.msrb.mxu2 %v1308_v0  ;;  %v1502_v0 = vld [vmem:[#allocation7 + $0x510] sm:$0xff] }
 0x705   :  { %1289 = vmatpush.msra.mxu3 %v1256_v10  ;;  %v1770_v10 = vld [vmem:[#allocation5 + $0x3f8] sm:$0xff] }
 0x706   :  { %1791 = vmatpush.msra.mxu2 %v1770_v10 }
 0x708   :  { %1792 = vmatpush.msra.mxu2 %v1768_v19  ;;  %v1501_v19 = vld [vmem:[#allocation7 + $0x508] sm:$0xff] }
 0x70a   :  { %1793 = vmatpush.msra.mxu2 %v1766_v20 }
 0x769   :  { %v1159_v22 = vpop.f32.mrf.mxu3 }
 0x76a   :  { %1232 = vmatmul.f32.vlgmr.msra.gmra.mxu1 %v1159_v22  ;;  %v1323_v22 = vld [vmem:[#allocation5 + $0x278] sm:$0xff] }
 0x76b   :  { %1368 = vmatpush.msra.mxu0 %v1323_v22 }
 0x76d   :  { %1369 = vmatpush.msra.mxu0 %v1321_v63  ;;  %v1513_v63 = vld [vmem:[#allocation7 + $0x568] sm:$0xff] }
 0x76f   :  { %1370 = vmatpush.msra.mxu0 %v1319_v6  ;;  %v1507_v6 = vld [vmem:[#allocation7 + $0x538] sm:$0xff] }
 0x771   :  { %1371 = vmatpush.msra.mxu0 %v1317_v42  ;;  %v1504_v42 = vld [vmem:[#allocation7 + $0x520] sm:$0xff] }
 0x773   :  { %1372 = vmatpush.msra.mxu0 %v1315_v28 }
 0x7e7   :  { %v1233_v46 = vpop.f32.mrf.mxu1 }
 0x7e8   :  { %v3958_v18 = vadd.f32 %v1233_v46, %v1214_v36 }
 0x7ea   :  { %v3159_v21 = vmul.f32 -1.442695, %v3958_v18 }
 0x7ec   :  { %3317 = vpow2.f32 %v3159_v21  ;;  %v1764_v21 = vld [vmem:[#allocation5 + $0x3c8] sm:$0xff] }
 0x7ed   :  { %1794 = vmatpush.msra.mxu2 %v1764_v21  ;;  %v1500_v21 = vld [vmem:[#allocation7 + $0x500] sm:$0xff] }
 0x7ef   :  { %1795 = vmatpush.msra.mxu2 %v1762_v16 }
 0x7f1   :  { %1796 = vmatpush.msra.mxu2 %v1760_v23 }
 0x7f2   :  { %v3318_v32 = vpop.eup %3317 }
 0x7f3   :  { %v1239_v25 = vadd.f32 1.0, %v3318_v32  ;;  %1797 = vmatpush.msra.mxu2 %v1758_v24  ;;  %v1750_v32 = vld [vmem:[#allocation5 + $0x358] sm:$0xff] }
 0x7f5   :  { %3319 = vrcp.f32 %v1239_v25  ;;  %v1251_v9 = vand.u32 2147483648, %v1239_v25  ;;  %v1249_v53 = vand.u32 2147483647, %v1239_v25  ;;  %vm1245_vm5 = vweird.f32 %v1239_v25  ;;  %1798 = vmatpush.msra.mxu2 %v1756_v27 }
 0x7f7   :  { %v1252_v47 = vor.u32 1.1754944e-38, %v1251_v9  ;;  %vm1250_vm7 = vcmp.eq.f32.partialorder %v1249_v53, 8.507059e+37  ;;  %1799 = vmatpush.msra.mxu2 %v1754_v29 }
 0x7f9   :  { %1800 = vmatpush.msra.mxu2 %v1752_v30 }
 0x7fb   :  { %v3320_v15 = vpop.eup %3319  ;;  %1801 = vmatpush.msra.mxu2 %v1750_v32 }
 0x7fc   :  { %v1241_v57 = vmul.f32 %v3320_v15, %v1239_v25  ;;  %vm1246_vm4 = vweird.f32 %v3320_v15  ;;  %v1746_v25 = vld [vmem:[#allocation5 + $0x338] sm:$0xff] }
 0x7fd   :  { %vm1247_vm6 = vmor %vm1245_vm5, %vm1246_vm4  ;;  %1802 = vmatpush.msra.mxu2 %v1748_v37 }
 0x7fe   :  { %v1242_v4 = vsub.f32 1.0, %v1241_v57 }
 0x7ff   :  { %1803 = vmatpush.msra.mxu2 %v1746_v25 }
 0x800   :  { %v1243_v3 = vmul.f32 %v3320_v15, %v1242_v4  ;;  %v1512_v4 = vld [vmem:[#allocation7 + $0x560] sm:$0xff] }
 0x801   :  { %1804 = vmatpush.msra.mxu2 %v1744_v40 }
 0x802   :  { %v1244_v11 = vadd.f32 %v3320_v15, %v1243_v3 }
 0x803   :  { %1805 = vmatpush.msra.mxu2 %v1742_v33 }
 0x804   :  { %v1248_v14 = vsel %vm1247_vm6, %v3320_v15, %v1244_v11 }
 0x805   :  { %v1253_v36 = vsel %vm1250_vm7, %v1252_v47, %v1248_v14  ;;  %1806 = vmatpush.msra.mxu2 %v1740_v51  ;;  %v1503_v47 = vld [vmem:[#allocation7 + $0x518] sm:$0xff] }
 0x806   :  { %v1255_v46 = vmul.f32 %v1253_v36, %v3958_v18  ;;  %v1313_v18 = vld [vmem:[#allocation5 + $0x228] sm:$0xff] }
 0x807   :  { %1373 = vmatpush.msra.mxu0 %v1313_v18 }
 0x808   :  { %1290 = vmatmul.f32.vlgmr.msra.gmra.mxu3 %v1255_v46  ;;  %v3241_v46 = vld [vmem:[#allocation8 + $0x68] ss:$0 sm:$0xff] }
 0x809   :  { %1374 = vmatpush.msra.mxu0 %v1311_v31 }
 0x80b   :  { %1375 = vmatpush.msra.mxu0 %v1309_v34 }
 0x88b   :  { %v1291_v54 = vpop.f32.mrf.mxu3 }
 0x88c   :  { %v1292_v56 = vadd.f32 %v3240_v52, %v1291_v54 }
 0x88e   :  { %v1294_v17 = vadd.f32 %v1292_v56, %v3860_v50  ;;  %v1515_v50 = vld [vmem:[#allocation7 + $0x578] sm:$0xff] }
 0x890   :  { %v1295_v22 = vmul.f32 %v1294_v17, %v3856_v38 }
 0x892   :  { %1356 = vmatmul.f32.vlgmr.msrb.gmra.mxu2 %v1295_v22  ;;  %1376 = vmatmul.f32.vlgmr.msra.gmra.mxu0 %v1295_v22  ;;  %v3965_v15 = vmul.f32 %v1295_v22, %v3856_v38 }
 0x89a   :  { %1807 = vmatmul.f32.vlgmr.msra.gmra.mxu2 %v3965_v15 }
 0x90f   :  { %v1377_v57 = vpop.f32.mrf.mxu0 }
 0x910   :  { %1395 = vmatpush.msrb.mxu1 %v1377_v57 }
 0x911   :  { %3160 = vmatmul.msk.f32.vlgmr.msrb.gmra.mxu1 %vm135_vm0, %v3867_v49  ;;  %v1514_v49 = vld [vmem:[#allocation7 + $0x570] sm:$0xff] }
 0x912   :  { %1518 = vmatpush.msra.mxu1 %v1515_v50 }
 0x914   :  { %1519 = vmatpush.msra.mxu1 %v1514_v49 }
 0x915   :  { %v1357_v61 = vpop.f32.mrf.mxu2 }
 0x916   :  { %1421 = vmatpush.msrb.mxu3 %v1357_v61  ;;  %1520 = vmatpush.msra.mxu1 %v1513_v63 }
 0x917   :  { %3163 = vmatmul.msk.f32.vlgmr.msrb.gmra.mxu3 %vm135_vm0, %v3874_v59  ;;  %v1511_v59 = vld [vmem:[#allocation7 + $0x558] sm:$0xff] }
 0x918   :  { %1521 = vmatpush.msra.mxu1 %v1512_v4 }
 0x919   :  { %3161 = vmatmul.msk.f32.gmra.mxu1 %vm135_vm0, %v3881_v55  ;;  %v1510_v55 = vld [vmem:[#allocation7 + $0x550] sm:$0xff] }
 0x91a   :  { %1522 = vmatpush.msra.mxu1 %v1511_v59 }
 0x91c   :  { %1523 = vmatpush.msra.mxu1 %v1510_v55 }
 0x91e   :  { %1524 = vmatpush.msra.mxu1 %v1509_v5 }
 0x91f   :  { %3164 = vmatmul.msk.f32.gmra.mxu3 %vm135_vm0, %v3888_v62  ;;  %v1508_v62 = vld [vmem:[#allocation7 + $0x540] sm:$0xff] }
 0x920   :  { %1525 = vmatpush.msra.mxu1 %v1508_v62 }
 0x921   :  { %3162 = vmatmul.msk.f32.gmra.mxu1 %vm135_vm0, %v3895_v1  ;;  %v1296_v1 = vld [vmem:[#allocation8 + $0x60] sm:$0x3] }
 0x922   :  { %1526 = vmatpush.msra.mxu1 %v1507_v6  ;;  %v1297_v9 = vperm.slane %v1296_v1, 0  ;;  %v1301_v3 = vperm.slane %v1296_v1, 1 }
 0x924   :  { %v1298_v11 = vmul.f32 %v1297_v9, %v3767_v26  ;;  %v1302_v13 = vmul.f32 %v1301_v3, %v3767_v26  ;;  %v1299_v24 = vmul.f32 %v1297_v9, %v3771_v45  ;;  %v1303_v27 = vmul.f32 %v1301_v3, %v3771_v45 }
 0x925   :  { %v1300_v32 = vmul.f32 %v1297_v9, %v3775_v58  ;;  %v1304_v34 = vmul.f32 %v1301_v3, %v3775_v58 }
 0x926   :  { %v1305_v36 = vadd.f32 %v1302_v13, %v1298_v11  ;;  %v1306_v18 = vadd.f32 %v1303_v27, %v1299_v24 }
 0x927   :  { %3165 = vmatmul.msk.f32.gmra.mxu3 %vm135_vm0, %v3902_v8  ;;  %v1506_v8 = vld [vmem:[#allocation7 + $0x530] sm:$0xff]  ;;  %v1307_v54 = vadd.f32 %v1304_v34, %v1300_v32 }
 0x928   :  { %1527 = vmatpush.msra.mxu1 %v1506_v8  ;;  %v3242_v32 = vld [vmem:[#allocation8 + $0x70] ss:$0 sm:$0xff] }
 0x92a   :  { %1528 = vmatpush.msra.mxu1 %v1505_v35 }
 0x92c   :  { %1529 = vmatpush.msra.mxu1 %v1504_v42 }
 0x92e   :  { %1530 = vmatpush.msra.mxu1 %v1503_v47 }
 0x930   :  { %1531 = vmatpush.msra.mxu1 %v1502_v0 }
 0x932   :  { %1532 = vmatpush.msra.mxu1 %v1501_v19 }
 0x934   :  { %1533 = vmatpush.msra.mxu1 %v1500_v21 }
 0x98e   :  { %v1397_v53 = vpop.f32.mrf.mxu1 }
 0x996   :  { %v1400_v16 = vpop.f32.mrf.mxu1 }
 0x99a   :  { %v1423_v14 = vpop.f32.mrf.mxu3 }
 0x99b   :  { %v1424_v10 = vadd.f32 %v1423_v14, %v1397_v53 }
 0x99d   :  { %v1432_v20 = vadd.f32 %v1424_v10, %v1305_v36 }
 0x99e   :  { %v1403_v25 = vpop.f32.mrf.mxu1 }
 0x99f   :  { %v1437_v23 = vadd.f32 %v3241_v46, %v1432_v20 }
 0x9a1   :  { %v3166_v28 = vmul.f32 -1.442695, %v1437_v23 }
 0x9a2   :  { %v1426_v29 = vpop.f32.mrf.mxu3 }
 0x9a3   :  { %3321 = vpow2.f32 %v3166_v28  ;;  %v1427_v30 = vadd.f32 %v1426_v29, %v1400_v16 }
 0x9a5   :  { %v1433_v31 = vadd.f32 %v1427_v30, %v1306_v18 }
 0x9a7   :  { %v1438_v37 = vadd.f32 %v3241_v46, %v1433_v31 }
 0x9a9   :  { %v3322_v40 = vpop.eup %3321  ;;  %v3167_v33 = vmul.f32 -1.442695, %v1438_v37 }
 0x9aa   :  { %v1449_v51 = vadd.f32 1.0, %v3322_v40  ;;  %v1429_v52 = vpop.f32.mrf.mxu3 }
 0x9ab   :  { %v1430_v56 = vadd.f32 %v1429_v52, %v1403_v25  ;;  %3323 = vpow2.f32 %v3167_v33 }
 0x9ac   :  { %3325 = vrcp.f32 %v1449_v51  ;;  %v1463_v59 = vand.u32 2147483648, %v1449_v51  ;;  %v1461_v5 = vand.u32 2147483647, %v1449_v51  ;;  %vm1457_vm9 = vweird.f32 %v1449_v51 }
 0x9ad   :  { %v1434_v17 = vadd.f32 %v1430_v56, %v1307_v54 }
 0x9ae   :  { %v1464_v8 = vor.u32 1.1754944e-38, %v1463_v59  ;;  %vm1462_vm11 = vcmp.eq.f32.partialorder %v1461_v5, 8.507059e+37 }
 0x9af   :  { %v1439_v22 = vadd.f32 %v3241_v46, %v1434_v17 }
 0x9b1   :  { %v3324_v57 = vpop.eup %3323  ;;  %v3168_v61 = vmul.f32 -1.442695, %v1439_v22 }
 0x9b2   :  { %v3326_v50 = vpop.eup %3325  ;;  %v1450_v49 = vadd.f32 1.0, %v3324_v57 }
 0x9b3   :  { %v1453_v63 = vmul.f32 %v3326_v50, %v1449_v51  ;;  %3327 = vpow2.f32 %v3168_v61  ;;  %vm1458_vm8 = vweird.f32 %v3326_v50 }
 0x9b4   :  { %3329 = vrcp.f32 %v1450_v49  ;;  %vm1459_vm10 = vmor %vm1457_vm9, %vm1458_vm8  ;;  %v1478_v13 = vand.u32 2147483648, %v1450_v49  ;;  %v1476_v14 = vand.u32 2147483647, %v1450_v49  ;;  %vm1472_vm13 = vweird.f32 %v1450_v49 }
 0x9b5   :  { %v1454_v4 = vsub.f32 1.0, %v1453_v63 }
 0x9b6   :  { %v1479_v10 = vor.u32 1.1754944e-38, %v1478_v13  ;;  %vm1477_vm15 = vcmp.eq.f32.partialorder %v1476_v14, 8.507059e+37 }
 0x9b7   :  { %v1455_v55 = vmul.f32 %v3326_v50, %v1454_v4 }
 0x9b9   :  { %v3328_v62 = vpop.eup %3327  ;;  %v1456_v1 = vadd.f32 %v3326_v50, %v1455_v55 }
 0x9ba   :  { %v3330_v6 = vpop.eup %3329  ;;  %v1451_v9 = vadd.f32 1.0, %v3328_v62 }
 0x9bb   :  { %v1460_v3 = vsel %vm1459_vm10, %v3326_v50, %v1456_v1  ;;  %v1468_v53 = vmul.f32 %v3330_v6, %v1450_v49  ;;  %vm1473_vm12 = vweird.f32 %v3330_v6 }
 0x9bc   :  { %v1465_v35 = vsel %vm1462_vm11, %v1464_v8, %v1460_v3  ;;  %3331 = vrcp.f32 %v1451_v9  ;;  %vm1474_vm14 = vmor %vm1472_vm13, %vm1473_vm12  ;;  %v1493_v24 = vand.u32 2147483648, %v1451_v9  ;;  %v1491_v27 = vand.u32 2147483647, %v1451_v9 }
 0x9bd   :  { %v1497_v42 = vmul.f32 %v1465_v35, %v1437_v23  ;;  %v1469_v11 = vsub.f32 1.0, %v1468_v53  ;;  %vm1487_vm2 = vweird.f32 %v1451_v9  ;;  %v3243_v53 = vld [vmem:[#allocation8 + $0x78] ss:$0 sm:$0xff] }
 0x9be   :  { %v1494_v29 = vor.u32 1.1754944e-38, %v1493_v24  ;;  %vm1492_vm5 = vcmp.eq.f32.partialorder %v1491_v27, 8.507059e+37 }
 0x9bf   :  { %1534 = vmatmul.f32.vlgmr.msra.gmra.mxu1 %v1497_v42  ;;  %v1470_v47 = vmul.f32 %v3330_v6, %v1469_v11 }
 0x9c1   :  { %v1471_v0 = vadd.f32 %v3330_v6, %v1470_v47 }
 0x9c2   :  { %v3332_v36 = vpop.eup %3331 }
 0x9c3   :  { %v1475_v46 = vsel %vm1474_vm14, %v3330_v6, %v1471_v0  ;;  %v1483_v19 = vmul.f32 %v3332_v36, %v1451_v9  ;;  %vm1488_vm1 = vweird.f32 %v3332_v36 }
 0x9c4   :  { %v1480_v20 = vsel %vm1477_vm15, %v1479_v10, %v1475_v46  ;;  %vm1489_vm4 = vmor %vm1487_vm2, %vm1488_vm1 }
 0x9c5   :  { %v1498_v21 = vmul.f32 %v1480_v20, %v1438_v37  ;;  %v1484_v16 = vsub.f32 1.0, %v1483_v19 }
 0x9c7   :  { %1537 = vmatmul.f32.gmra.mxu1 %v1498_v21  ;;  %v1485_v23 = vmul.f32 %v3332_v36, %v1484_v16 }
 0x9c9   :  { %v1486_v28 = vadd.f32 %v3332_v36, %v1485_v23 }
 0x9cb   :  { %v1490_v18 = vsel %vm1489_vm4, %v3332_v36, %v1486_v28 }
 0x9cc   :  { %v1495_v30 = vsel %vm1492_vm5, %v1494_v29, %v1490_v18 }
 0x9cd   :  { %v1499_v31 = vmul.f32 %v1495_v30, %v1439_v22 }
 0x9cf   :  { %1540 = vmatmul.f32.gmra.mxu1 %v1499_v31 }
 0xa3c   :  { %v1535_v34 = vpop.f32.mrf.mxu1 }
 0xa3d   :  { %v1536_v25 = vadd.f32 %v3242_v32, %v1535_v34 }
 0xa3f   :  { %v3169_v40 = vmul.f32 -1.442695, %v1536_v25 }
 0xa41   :  { %3333 = vpow2.f32 %v3169_v40  ;;  %v297_v40 = vadd.f32 1e-08, %v3771_v45 }
 0xa43   :  { %vm318_vm4 = vcmp.eq.f32.partialorder %v297_v40, inf }
 0xa44   :  { %v1538_v37 = vpop.f32.mrf.mxu1 }
 0xa45   :  { %v1539_v33 = vadd.f32 %v3242_v32, %v1538_v37  ;;  %v298_v37 = vadd.f32 1e-08, %v3775_v58 }
 0xa47   :  { %v3334_v51 = vpop.eup %3333  ;;  %v3170_v52 = vmul.f32 -1.442695, %v1539_v33  ;;  %vm330_vm5 = vcmp.eq.f32.partialorder %v298_v37, inf }
 0xa48   :  { %v1553_v54 = vadd.f32 1.0, %v3334_v51 }
 0xa49   :  { %3335 = vpow2.f32 %v3170_v52 }
 0xa4a   :  { %3337 = vrcp.f32 %v1553_v54  ;;  %v1567_v4 = vand.u32 2147483648, %v1553_v54  ;;  %v1565_v55 = vand.u32 2147483647, %v1553_v54  ;;  %vm1561_vm7 = vweird.f32 %v1553_v54 }
 0xa4c   :  { %v1541_v56 = vpop.f32.mrf.mxu1  ;;  %v1568_v6 = vor.u32 1.1754944e-38, %v1567_v4  ;;  %vm1566_vm9 = vcmp.eq.f32.partialorder %v1565_v55, 8.507059e+37 }
 0xa4d   :  { %v1542_v17 = vadd.f32 %v3242_v32, %v1541_v56 }
 0xa4f   :  { %v3336_v57 = vpop.eup %3335  ;;  %v3171_v61 = vmul.f32 -1.442695, %v1542_v17 }
 0xa50   :  { %v3338_v50 = vpop.eup %3337  ;;  %v1554_v49 = vadd.f32 1.0, %v3336_v57 }
 0xa51   :  { %v1557_v22 = vmul.f32 %v3338_v50, %v1553_v54  ;;  %3339 = vpow2.f32 %v3171_v61  ;;  %vm1562_vm6 = vweird.f32 %v3338_v50 }
 0xa52   :  { %3341 = vrcp.f32 %v1554_v49  ;;  %vm1563_vm8 = vmor %vm1561_vm7, %vm1562_vm6  ;;  %v1582_v13 = vand.u32 2147483648, %v1554_v49  ;;  %v1580_v14 = vand.u32 2147483647, %v1554_v49  ;;  %vm1576_vm11 = vweird.f32 %v1554_v49 }
 0xa53   :  { %v1558_v63 = vsub.f32 1.0, %v1557_v22  ;;  %vm320_vm7 = vcmp.eq.f32.partialorder %v297_v40, 0.0 }
 0xa54   :  { %v1583_v46 = vor.u32 1.1754944e-38, %v1582_v13  ;;  %vm1581_vm13 = vcmp.eq.f32.partialorder %v1580_v14, 8.507059e+37 }
 0xa55   :  { %v1559_v59 = vmul.f32 %v3338_v50, %v1558_v63 }
 0xa57   :  { %v3340_v5 = vpop.eup %3339  ;;  %v1560_v62 = vadd.f32 %v3338_v50, %v1559_v59 }
 0xa58   :  { %v3342_v1 = vpop.eup %3341  ;;  %v1555_v8 = vadd.f32 1.0, %v3340_v5 }
 0xa59   :  { %v1564_v9 = vsel %vm1563_vm8, %v3338_v50, %v1560_v62  ;;  %v1572_v3 = vmul.f32 %v3342_v1, %v1554_v49  ;;  %vm1577_vm10 = vweird.f32 %v3342_v1  ;;  %vm332_vm8 = vcmp.eq.f32.partialorder %v298_v37, 0.0 }
 0xa5a   :  { %v1569_v35 = vsel %vm1566_vm9, %v1568_v6, %v1564_v9  ;;  %3343 = vrcp.f32 %v1555_v8  ;;  %vm1578_vm12 = vmor %vm1576_vm11, %vm1577_vm10  ;;  %v1597_v23 = vand.u32 2147483648, %v1555_v8  ;;  %v1595_v28 = vand.u32 2147483647, %v1555_v8 }
 0xa5b   :  { %v1601_v42 = vmul.f32 %v1569_v35, %v1536_v25  ;;  %v1573_v11 = vsub.f32 1.0, %v1572_v3  ;;  %vm1591_vm15 = vweird.f32 %v1555_v8  ;;  %3345 = vrsqrt.f32 %v297_v40 }
 0xa5c   :  { %v1598_v30 = vor.u32 1.1754944e-38, %v1597_v23  ;;  %vm1596_vm2 = vcmp.eq.f32.partialorder %v1595_v28, 8.507059e+37  ;;  %3347 = vrsqrt.f32 %v298_v37 }
 0xa5d   :  { %v1574_v47 = vmul.f32 %v3342_v1, %v1573_v11  ;;  %v1606_v0 = vmul.f32 %v3243_v53, %v1601_v42  ;;  %v333_v42 = vand.u32 2147483648, %v298_v37 }
 0xa5f   :  { %v1575_v36 = vadd.f32 %v3342_v1, %v1574_v47  ;;  %1609 = vadd.xlane.f32.xlu0 %v1606_v0 }
 0xa60   :  { %v3344_v10 = vpop.eup %3343 }
 0xa61   :  { %v1579_v19 = vsel %vm1578_vm12, %v3342_v1, %v1575_v36  ;;  %v1587_v20 = vmul.f32 %v3344_v10, %v1555_v8  ;;  %vm1592_vm14 = vweird.f32 %v3344_v10  ;;  %v3346_v51 = vpop.eup %3345 }
 0xa62   :  { %v1584_v21 = vsel %vm1581_vm13, %v1583_v46, %v1579_v19  ;;  %vm1593_vm1 = vmor %vm1591_vm15, %vm1592_vm14  ;;  %v3348_v52 = vpop.eup %3347  ;;  %v312_v56 = vmul.f32 %v3346_v51, %v297_v40 }
 0xa63   :  { %v1602_v16 = vmul.f32 %v1584_v21, %v1539_v33  ;;  %v1588_v24 = vsub.f32 1.0, %v1587_v20  ;;  %v296_v33 = vadd.f32 1e-08, %v3767_v26  ;;  %v324_v57 = vmul.f32 %v3348_v52, %v298_v37 }
 0xa64   :  { %v313_v50 = vmul.f32 %v3346_v51, %v312_v56  ;;  %v2068_v56 = vld [vmem:[#allocation7 + $0x650] sm:$0xff] }
 0xa65   :  { %v1589_v27 = vmul.f32 %v3344_v10, %v1588_v24  ;;  %v1607_v29 = vmul.f32 %v3243_v53, %v1602_v16  ;;  %3349 = vrsqrt.f32 %v296_v33  ;;  %v325_v49 = vmul.f32 %v3348_v52, %v324_v57  ;;  %v2067_v57 = vld [vmem:[#allocation7 + $0x648] sm:$0xff] }
 0xa66   :  { %v314_v22 = vmul.f32 0.5, %v313_v50  ;;  %vm306_vm6 = vcmp.eq.f32.partialorder %v296_v33, inf  ;;  %v309_v13 = vand.u32 2147483648, %v296_v33  ;;  %vm308_vm9 = vcmp.eq.f32.partialorder %v296_v33, 0.0  ;;  %v2065_v50 = vld [vmem:[#allocation7 + $0x638] sm:$0xff] }
 0xa67   :  { %v1590_v18 = vadd.f32 %v3344_v10, %v1589_v27  ;;  %1611 = vadd.xlane.f32.xlu1 %v1607_v29  ;;  %v326_v63 = vmul.f32 0.5, %v325_v49  ;;  %v4009_v49 = vld [vmem:[%s4277_s3 + $0x8] sm:$0xff] }
 0xa68   :  { %v315_v59 = vsub.f32 1.5, %v314_v22  ;;  %v2063_v22 = vld [vmem:[#allocation7 + $0x628] sm:$0xff] }
 0xa69   :  { %v1594_v31 = vsel %vm1593_vm1, %v3344_v10, %v1590_v18  ;;  %v327_v55 = vsub.f32 1.5, %v326_v63  ;;  %v2062_v63 = vld [vmem:[#allocation7 + $0x620] sm:$0xff] }
 0xa6a   :  { %v1599_v32 = vsel %vm1596_vm2, %v1598_v30, %v1594_v31  ;;  %v316_v62 = vmul.f32 %v3346_v51, %v315_v59  ;;  %v2070_v51 = vld [vmem:[#allocation7 + $0x660] sm:$0xff]  ;;  %v4016_v59 = vld [vmem:[%s4277_s3 + $0x10] sm:$0xff] }
 0xa6b   :  { %v1603_v34 = vmul.f32 %v1599_v32, %v1542_v17  ;;  %v3350_v54 = vpop.eup %3349  ;;  %v328_v1 = vmul.f32 %v3348_v52, %v327_v55  ;;  %v2069_v52 = vld [vmem:[#allocation7 + $0x658] sm:$0xff]  ;;  %v2060_v55 = vld [vmem:[#allocation7 + $0x610] sm:$0xff] }
 0xa6c   :  { %v300_v61 = vmul.f32 %v3350_v54, %v296_v33  ;;  %v317_v8 = vmul.f32 %v316_v62, %v297_v40  ;;  %v2058_v62 = vld [vmem:[#allocation7 + $0x600] sm:$0xff] }
 0xa6d   :  { %v1608_v25 = vmul.f32 %v3243_v53, %v1603_v34  ;;  %v329_v9 = vmul.f32 %v328_v1, %v298_v37  ;;  %v321_v53 = vand.u32 2147483648, %v297_v40 }
 0xa6e   :  { %v301_v17 = vmul.f32 %v3350_v54, %v300_v61  ;;  %v319_v35 = vsel %vm318_vm4, %v297_v40, %v317_v8  ;;  %v2066_v61 = vld [vmem:[#allocation7 + $0x640] sm:$0xff] }
 0xa6f   :  { %1613 = vadd.xlane.f32.xlu2 %v1608_v25  ;;  %v331_v11 = vsel %vm330_vm5, %v298_v37, %v329_v9  ;;  %v322_v14 = vsel %vm320_vm7, %v321_v53, %v319_v35  ;;  %v2073_v37 = vld [vmem:[#allocation7 + $0x678] sm:$0xff]  ;;  %v1767_v53 = vld [vmem:[#allocation5 + $0x3e0] sm:$0xff]  ;;  %v1765_v35 = vld [vmem:[#allocation5 + $0x3d0] sm:$0xff] }
 0xa70   :  { %v302_v4 = vmul.f32 0.5, %v301_v17  ;;  %v334_v0 = vsel %vm332_vm8, %v333_v42, %v331_v11  ;;  %v336_v10 = vadd.f32 1.0, %v322_v14  ;;  %v2064_v17 = vld [vmem:[#allocation7 + $0x630] sm:$0xff]  ;;  %v1763_v42 = vld [vmem:[#allocation5 + $0x3c0] sm:$0xff] }
 0xa71   :  { %v337_v46 = vadd.f32 1.0, %v334_v0  ;;  %v1761_v11 = vld [vmem:[#allocation5 + $0x3b0] sm:$0xff]  ;;  %v1755_v14 = vld [vmem:[#allocation5 + $0x380] sm:$0xff] }
 0xa72   :  { %v303_v5 = vsub.f32 1.5, %v302_v4  ;;  %3351 = vrcp.f32 %v336_v10  ;;  %v2061_v4 = vld [vmem:[#allocation7 + $0x618] sm:$0xff]  ;;  %v1753_v0 = vld [vmem:[#allocation5 + $0x370] sm:$0xff]  ;;  %v1747_v10 = vld [vmem:[#allocation5 + $0x340] sm:$0xff] }
 0xa73   :  { %3353 = vrcp.f32 %v337_v46  ;;  %v1745_v46 = vld [vmem:[#allocation5 + $0x330] sm:$0xff] }
 0xa74   :  { %v304_v6 = vmul.f32 %v3350_v54, %v303_v5  ;;  %v4002_v54 = vld [vmem:[%s4277_s3] sm:$0xff]  ;;  %v2059_v5 = vld [vmem:[#allocation7 + $0x608] sm:$0xff] }
 0xa76   :  { %v305_v3 = vmul.f32 %v304_v6, %v296_v33  ;;  %v3463_v6 = vld [vmem:[%s4275_s1] sm:$0xff] }
 0xa78   :  { %v307_v47 = vsel %vm306_vm6, %v296_v33, %v305_v3  ;;  %v3352_v20 = vpop.eup %3351  ;;  %v3995_v33 = vld [vmem:[#allocation2] sm:$0xff]  ;;  %v1769_v3 = vld [vmem:[#allocation5 + $0x3f0] sm:$0xff] }
 0xa79   :  { %v310_v36 = vsel %vm308_vm9, %v309_v13, %v307_v47  ;;  %v3354_v21 = vpop.eup %3353  ;;  %v342_v23 = vmul.f32 %v3352_v20, %v3742_v2  ;;  %v1808_v2 = vpop.f32.mrf.mxu2  ;;  %v1759_v13 = vld [vmem:[#allocation5 + $0x3a0] sm:$0xff]  ;;  %v1757_v47 = vld [vmem:[#allocation5 + $0x390] sm:$0xff] }
 0xa7a   :  { %v335_v19 = vadd.f32 1.0, %v310_v36  ;;  %v343_v27 = vmul.f32 %v3354_v21, %v3746_v12  ;;  %v2071_v12 = vld [vmem:[#allocation7 + $0x668] sm:$0xff]  ;;  %v1749_v36 = vld [vmem:[#allocation5 + $0x350] sm:$0xff]  ;;  %v1739_v20 = vld [vmem:[#allocation5 + $0x300] sm:$0xff] }
 0xa7c   :  { %3355 = vrcp.f32 %v335_v19  ;;  %v1741_v19 = vld [vmem:[#allocation5 + $0x310] sm:$0xff] }
 0xa82   :  { %v3356_v16 = vpop.eup %3355 }
 0xa83   :  { %v341_v18 = vmul.f32 %v3356_v16, %v3738_v60  ;;  %v2072_v60 = vld [vmem:[#allocation7 + $0x670] sm:$0xff] }
 0xad2   :  { %v1610_v28 = vpop.xlane.xlu0 %1609 }
 0xad3   :  { %v1615_v32 = vmul.f32 %v1610_v28, %v341_v18  ;;  %v4057_v18 = vld [vmem:[%s4276_s2 + $0x8] sm:$0xff] }
 0xad5   :  { %v1618_v40 = vmul.f32 %v1615_v32, %v3841_v41  ;;  %v1945_v32 = vld [vmem:[#allocation7 + $0x5f0] sm:$0xff] }
 0xada   :  { %v1612_v24 = vpop.xlane.xlu1 %1611 }
 0xadb   :  { %v1616_v30 = vmul.f32 %v1612_v24, %v342_v23 }
 0xadd   :  { %v1619_v25 = vmul.f32 %v1616_v30, %v3822_v44  ;;  %v4064_v30 = vld [vmem:[%s4276_s2 + $0x10] sm:$0xff] }
 0xae2   :  { %v1614_v29 = vpop.xlane.xlu2 %1613 }
 0xae3   :  { %v1617_v31 = vmul.f32 %v1614_v29, %v343_v27  ;;  %v4050_v29 = vld [vmem:[%s4276_s2] sm:$0xff] }
 0xae5   :  { %v1620_v34 = vmul.f32 %v1617_v31, %v3835_v7  ;;  %v1946_v31 = vld [vmem:[#allocation7 + $0x5f8] sm:$0xff] }
 0xae6   :  { %1949 = vmatpush.msrb.mxu1 %v1946_v31 }
 0xae7   :  { %1634 = vmatpush.msrb.mxu0 %v1620_v34  ;;  %v1944_v34 = vld [vmem:[#allocation7 + $0x5e8] sm:$0xff] }
 0xae8   :  { %1950 = vmatpush.msrb.mxu1 %v1945_v32 }
 0xae9   :  { %1635 = vmatpush.msrb.mxu0 %v1619_v25  ;;  %v1943_v25 = vld [vmem:[#allocation7 + $0x5e0] sm:$0xff] }
 0xaea   :  { %1951 = vmatpush.msrb.mxu1 %v1944_v34 }
 0xaeb   :  { %1636 = vmatpush.msrb.mxu0 %v1618_v40  ;;  %v1942_v40 = vld [vmem:[#allocation7 + $0x5d8] sm:$0xff] }
 0xaec   :  { %3172 = vmatmul.msk.f32.vlgmr.msrb.gmra.mxu0 %vm673_vm3, %v3995_v33  ;;  %1952 = vmatpush.msrb.mxu1 %v1943_v25 }
 0xaed   :  { %1826 = vmatpush.msra.mxu0 %v1808_v2  ;;  %v1940_v2 = vld [vmem:[#allocation7 + $0x5c8] sm:$0xff] }
 0xaee   :  { %1953 = vmatpush.msrb.mxu1 %v1942_v40 }
 0xaef   :  { %2092 = vmatpush.msrb.mxu0 %v2073_v37  ;;  %v1941_v37 = vld [vmem:[#allocation7 + $0x5d0] sm:$0xff] }
 0xaf0   :  { %1954 = vmatpush.msrb.mxu1 %v1941_v37 }
 0xaf1   :  { %2093 = vmatpush.msrb.mxu0 %v2072_v60  ;;  %v1939_v60 = vld [vmem:[#allocation7 + $0x5c0] sm:$0xff] }
 0xaf2   :  { %1955 = vmatpush.msrb.mxu1 %v1940_v2 }
 0xaf3   :  { %2094 = vmatpush.msrb.mxu0 %v2071_v12  ;;  %v1938_v12 = vld [vmem:[#allocation7 + $0x5b8] sm:$0xff] }
 0xaf4   :  { %3176 = vmatmul.msk.f32.vlgmr.msra.gmra.mxu0 %vm135_vm0, %v4002_v54  ;;  %1956 = vmatpush.msrb.mxu1 %v1939_v60 }
 0xaf5   :  { %2095 = vmatpush.msrb.mxu0 %v2070_v51 }
 0xaf6   :  { %1957 = vmatpush.msrb.mxu1 %v1938_v12 }
 0xaf7   :  { %2096 = vmatpush.msrb.mxu0 %v2069_v52  ;;  %v1937_v52 = vld [vmem:[#allocation7 + $0x5b0] sm:$0xff] }
 0xaf8   :  { %1958 = vmatpush.msrb.mxu1 %v1937_v52 }
 0xaf9   :  { %2097 = vmatpush.msrb.mxu0 %v2068_v56  ;;  %v1727_v56 = vld [vmem:[#allocation8 + $0x80] sm:$0x3] }
 0xafb   :  { %2098 = vmatpush.msrb.mxu0 %v2067_v57  ;;  %v1728_v57 = vperm.slane %v1727_v56, 0 }
 0xafc   :  { %3177 = vmatmul.msk.f32.gmra.mxu0 %vm135_vm0, %v4009_v49 }
 0xafd   :  { %2099 = vmatpush.msrb.mxu0 %v2066_v61  ;;  %v1936_v61 = vld [vmem:[#allocation7 + $0x5a8] sm:$0xff] }
 0xafe   :  { %1959 = vmatpush.msrb.mxu1 %v1936_v61 }
 0xaff   :  { %2100 = vmatpush.msrb.mxu0 %v2065_v50  ;;  %v1732_v50 = vperm.slane %v1727_v56, 1 }
 0xb01   :  { %2101 = vmatpush.msrb.mxu0 %v2064_v17  ;;  %v1935_v17 = vld [vmem:[#allocation7 + $0x5a0] sm:$0xff] }
 0xb02   :  { %1960 = vmatpush.msrb.mxu1 %v1935_v17 }
 0xb03   :  { %2102 = vmatpush.msrb.mxu0 %v2063_v22 }
 0xb04   :  { %3178 = vmatmul.msk.f32.gmra.mxu0 %vm135_vm0, %v4016_v59 }
 0xb05   :  { %2103 = vmatpush.msrb.mxu0 %v2062_v63 }
 0xb07   :  { %2104 = vmatpush.msrb.mxu0 %v2061_v4  ;;  %v1934_v4 = vld [vmem:[#allocation7 + $0x598] sm:$0xff] }
 0xb08   :  { %1961 = vmatpush.msrb.mxu1 %v1934_v4 }
 0xb09   :  { %2105 = vmatpush.msrb.mxu0 %v2060_v55  ;;  %v1733_v55 = vmul.f32 %v1732_v50, %v3767_v26 }
 0xb0b   :  { %2106 = vmatpush.msrb.mxu0 %v2059_v5  ;;  %v1933_v5 = vld [vmem:[#allocation7 + $0x590] sm:$0xff] }
 0xb0c   :  { %1962 = vmatpush.msrb.mxu1 %v1933_v5 }
 0xb0d   :  { %2107 = vmatpush.msrb.mxu0 %v2058_v62 }
 0xb0e   :  { %2108 = vmatmul.f32.vlgmr.msrb.gmra.mxu0 %v3965_v15 }
 0xb69   :  { %v1638_v1 = vpop.f32.mrf.mxu0 }
 0xb6a   :  { %v1641_v8 = vadd.f32 %v3463_v6, %v1638_v1 }
 0xb6c   :  { %v4025_v9 = vmul.f32 %v1641_v8, %v3856_v38 }
 0xb6e   :  { %1659 = vmatpush.msra.mxu3 %v4025_v9 }
 0xb6f   :  { %3173 = vmatmul.msk.f32.vlgmr.msra.gmra.mxu3 %vm135_vm0, %v3702_v39  ;;  %v1751_v39 = vld [vmem:[#allocation5 + $0x360] sm:$0xff] }
 0xb70   :  { %1771 = vmatpush.msrb.mxu3 %v1769_v3  ;;  %v3245_v3 = vld [vmem:[#allocation8 + $0x88] ss:$0 sm:$0xff] }
 0xb71   :  { %v1828_v22 = vpop.f32.mrf.mxu0 }
 0xb72   :  { %1772 = vmatpush.msrb.mxu3 %v1767_v53  ;;  %v1932_v53 = vld [vmem:[#allocation7 + $0x588] sm:$0xff] }
 0xb73   :  { %1963 = vmatpush.msrb.mxu1 %v1932_v53 }
 0xb74   :  { %1773 = vmatpush.msrb.mxu3 %v1765_v35 }
 0xb76   :  { %1774 = vmatpush.msrb.mxu3 %v1763_v42  ;;  %v1931_v42 = vld [vmem:[#allocation7 + $0x580] sm:$0xff] }
 0xb77   :  { %3174 = vmatmul.msk.f32.gmra.mxu3 %vm135_vm0, %v3718_v43  ;;  %v1743_v43 = vld [vmem:[#allocation5 + $0x320] sm:$0xff]  ;;  %1964 = vmatpush.msrb.mxu1 %v1931_v42 }
 0xb78   :  { %1775 = vmatpush.msrb.mxu3 %v1761_v11 }
 0xb7a   :  { %1776 = vmatpush.msrb.mxu3 %v1759_v13 }
 0xb7c   :  { %1777 = vmatpush.msrb.mxu3 %v1757_v47  ;;  %v1831_v47 = vpop.f32.mrf.mxu0 }
 0xb7e   :  { %1778 = vmatpush.msrb.mxu3 %v1755_v14 }
 0xb7f   :  { %3175 = vmatmul.msk.f32.gmra.mxu3 %vm135_vm0, %v3734_v48 }
 0xb80   :  { %1779 = vmatpush.msrb.mxu3 %v1753_v0  ;;  %v1734_v0 = vmul.f32 %v1732_v50, %v3771_v45 }
 0xb82   :  { %1780 = vmatpush.msrb.mxu3 %v1751_v39 }
 0xb84   :  { %1781 = vmatpush.msrb.mxu3 %v1749_v36 }
 0xb86   :  { %1782 = vmatpush.msrb.mxu3 %v1747_v10 }
 0xb88   :  { %1783 = vmatpush.msrb.mxu3 %v1745_v46 }
 0xb8a   :  { %1784 = vmatpush.msrb.mxu3 %v1743_v43 }
 0xb8c   :  { %1785 = vmatpush.msrb.mxu3 %v1741_v19 }
 0xb8e   :  { %1786 = vmatpush.msrb.mxu3 %v1739_v20 }
 0xb8f   :  { %1787 = vmatmul.f32.vlgmr.msrb.gmra.mxu3 %v3965_v15 }
 0xbf2   :  { %v4035_v21 = vpop.f32.mrf.mxu3 }
 0xbf3   :  { %v1670_v48 = vmul.f32 %v4035_v21, %v4035_v21 }
 0xbf5   :  { %1673 = vadd.xlane.f32.xlu2 %v1670_v48 }
 0xbfa   :  { %v4039_v16 = vpop.f32.mrf.mxu3 }
 0xbfb   :  { %v1671_v24 = vmul.f32 %v4039_v16, %v4039_v16 }
 0xbfd   :  { %1675 = vadd.xlane.f32.xlu2 %v1671_v24  ;;  %v1735_v24 = vmul.f32 %v1732_v50, %v3775_v58 }
 0xc02   :  { %v4043_v23 = vpop.f32.mrf.mxu3 }
 0xc03   :  { %v1672_v27 = vmul.f32 %v4043_v23, %v4043_v23 }
 0xc05   :  { %1677 = vadd.xlane.f32.xlu2 %v1672_v27 }
 0xc12   :  { %v1788_v28 = vpop.f32.mrf.mxu3 }
 0xc13   :  { %1852 = vmatpush.msra.mxu3 %v1788_v28  ;;  %v1834_v28 = vpop.f32.mrf.mxu0 }
 0xc14   :  { %3179 = vmatmul.msk.f32.vlgmr.msra.gmra.mxu3 %vm135_vm0, %v4050_v29 }
 0xc1c   :  { %3180 = vmatmul.msk.f32.gmra.mxu3 %vm135_vm0, %v4057_v18 }
 0xc24   :  { %3181 = vmatmul.msk.f32.gmra.mxu3 %vm135_vm0, %v4064_v30 }
 0xc68   :  { %v4068_v51 = vpop.xlane.xlu2 %1673 }
 0xc69   :  { %v1729_v63 = vmul.f32 %v1728_v57, %v4068_v51 }
 0xc6b   :  { %v1736_v6 = vadd.f32 %v1733_v55, %v1729_v63 }
 0xc70   :  { %v4072_v62 = vpop.xlane.xlu2 %1675 }
 0xc71   :  { %v1730_v11 = vmul.f32 %v1728_v57, %v4072_v62 }
 0xc73   :  { %v1737_v36 = vadd.f32 %v1734_v0, %v1730_v11 }
 0xc78   :  { %v4076_v46 = vpop.xlane.xlu2 %1677 }
 0xc79   :  { %v1731_v19 = vmul.f32 %v1728_v57, %v4076_v46 }
 0xc7b   :  { %v1738_v34 = vadd.f32 %v1735_v24, %v1731_v19 }
 0xc97   :  { %v1854_v1 = vpop.f32.mrf.mxu3 }
 0xc98   :  { %v1855_v8 = vadd.f32 %v1854_v1, %v1828_v22 }
 0xc9a   :  { %v1863_v35 = vadd.f32 %v1855_v8, %v1736_v6 }
 0xc9c   :  { %v1868_v13 = vadd.f32 %v3245_v3, %v1863_v35 }
 0xc9e   :  { %v3182_v14 = vmul.f32 -1.442695, %v1868_v13 }
 0xc9f   :  { %v1857_v39 = vpop.f32.mrf.mxu3 }
 0xca0   :  { %3357 = vpow2.f32 %v3182_v14  ;;  %v1858_v10 = vadd.f32 %v1857_v39, %v1831_v47 }
 0xca2   :  { %v1864_v43 = vadd.f32 %v1858_v10, %v1737_v36 }
 0xca4   :  { %v1869_v20 = vadd.f32 %v3245_v3, %v1864_v43 }
 0xca6   :  { %v3358_v48 = vpop.eup %3357  ;;  %v3183_v27 = vmul.f32 -1.442695, %v1869_v20 }
 0xca7   :  { %v1880_v31 = vadd.f32 1.0, %v3358_v48  ;;  %v1860_v32 = vpop.f32.mrf.mxu3 }
 0xca8   :  { %v1861_v25 = vadd.f32 %v1860_v32, %v1834_v28  ;;  %3359 = vpow2.f32 %v3183_v27 }
 0xca9   :  { %3361 = vrcp.f32 %v1880_v31  ;;  %v1894_v61 = vand.u32 2147483648, %v1880_v31  ;;  %v1892_v17 = vand.u32 2147483647, %v1880_v31  ;;  %vm1888_vm11 = vweird.f32 %v1880_v31 }
 0xcaa   :  { %v1865_v40 = vadd.f32 %v1861_v25, %v1738_v34  ;;  %v3246_v25 = vld [vmem:[#allocation8 + $0x90] ss:$0 sm:$0xff] }
 0xcab   :  { %v1895_v55 = vor.u32 1.1754944e-38, %v1894_v61  ;;  %vm1893_vm13 = vcmp.eq.f32.partialorder %v1892_v17, 8.507059e+37 }
 0xcac   :  { %v1870_v37 = vadd.f32 %v3245_v3, %v1865_v40 }
 0xcae   :  { %v3360_v2 = vpop.eup %3359  ;;  %v3184_v60 = vmul.f32 -1.442695, %v1870_v37 }
 0xcaf   :  { %v3362_v12 = vpop.eup %3361  ;;  %v1881_v52 = vadd.f32 1.0, %v3360_v2 }
 0xcb0   :  { %v1884_v56 = vmul.f32 %v3362_v12, %v1880_v31  ;;  %3363 = vpow2.f32 %v3184_v60  ;;  %vm1889_vm10 = vweird.f32 %v3362_v12 }
 0xcb1   :  { %3365 = vrcp.f32 %v1881_v52  ;;  %vm1890_vm12 = vmor %vm1888_vm11, %vm1889_vm10  ;;  %v1909_v35 = vand.u32 2147483648, %v1881_v52  ;;  %v1907_v11 = vand.u32 2147483647, %v1881_v52  ;;  %vm1903_vm15 = vweird.f32 %v1881_v52 }
 0xcb2   :  { %v1885_v57 = vsub.f32 1.0, %v1884_v56 }
 0xcb3   :  { %v1910_v0 = vor.u32 1.1754944e-38, %v1909_v35  ;;  %vm1908_vm2 = vcmp.eq.f32.partialorder %v1907_v11, 8.507059e+37 }
 0xcb4   :  { %v1886_v50 = vmul.f32 %v3362_v12, %v1885_v57 }
 0xcb6   :  { %v3364_v22 = vpop.eup %3363  ;;  %v1887_v63 = vadd.f32 %v3362_v12, %v1886_v50 }
 0xcb7   :  { %v3366_v4 = vpop.eup %3365  ;;  %v1882_v5 = vadd.f32 1.0, %v3364_v22 }
 0xcb8   :  { %v1891_v1 = vsel %vm1890_vm12, %v3362_v12, %v1887_v63  ;;  %v1899_v6 = vmul.f32 %v3366_v4, %v1881_v52  ;;  %vm1904_vm14 = vweird.f32 %v3366_v4 }
 0xcb9   :  { %v1896_v8 = vsel %vm1893_vm13, %v1895_v55, %v1891_v1  ;;  %3367 = vrcp.f32 %v1882_v5  ;;  %vm1905_vm1 = vmor %vm1903_vm15, %vm1904_vm14  ;;  %v1924_v48 = vand.u32 2147483648, %v1882_v5  ;;  %v1922_v24 = vand.u32 2147483647, %v1882_v5  ;;  %v2088_v55 = vld [vmem:[#allocation7 + $0x6f0] sm:$0xff] }
 0xcba   :  { %v1928_v3 = vmul.f32 %v1896_v8, %v1868_v13  ;;  %v1900_v53 = vsub.f32 1.0, %v1899_v6  ;;  %vm1918_vm5 = vweird.f32 %v1882_v5 }
 0xcbb   :  { %v1925_v28 = vor.u32 1.1754944e-38, %v1924_v48  ;;  %vm1923_vm7 = vcmp.eq.f32.partialorder %v1922_v24, 8.507059e+37  ;;  %v2081_v24 = vld [vmem:[#allocation7 + $0x6b8] sm:$0xff] }
 0xcbc   :  { %1965 = vmatmul.f32.vlgmr.msrb.gmra.mxu1 %v1928_v3  ;;  %v1901_v42 = vmul.f32 %v3366_v4, %v1900_v53  ;;  %v2086_v53 = vld [vmem:[#allocation7 + $0x6e0] sm:$0xff] }
 0xcbe   :  { %v1902_v47 = vadd.f32 %v3366_v4, %v1901_v42  ;;  %v2085_v42 = vld [vmem:[#allocation7 + $0x6d8] sm:$0xff] }
 0xcbf   :  { %v3368_v14 = vpop.eup %3367 }
 0xcc0   :  { %v1906_v39 = vsel %vm1905_vm1, %v3366_v4, %v1902_v47  ;;  %v1914_v36 = vmul.f32 %v3368_v14, %v1882_v5  ;;  %vm1919_vm4 = vweird.f32 %v3368_v14  ;;  %v2089_v4 = vld [vmem:[#allocation7 + $0x6f8] sm:$0xff]  ;;  %v2087_v5 = vld [vmem:[#allocation7 + $0x6e8] sm:$0xff] }
 0xcc1   :  { %v1911_v10 = vsel %vm1908_vm2, %v1910_v0, %v1906_v39  ;;  %vm1920_vm6 = vmor %vm1918_vm5, %vm1919_vm4  ;;  %2112 = vmatpush.msrb.mxu3 %v2089_v4  ;;  %v2083_v39 = vld [vmem:[#allocation7 + $0x6c8] sm:$0xff] }
 0xcc2   :  { %v1929_v43 = vmul.f32 %v1911_v10, %v1869_v20  ;;  %v1915_v19 = vsub.f32 1.0, %v1914_v36 }
 0xcc3   :  { %2113 = vmatpush.msrb.mxu3 %v2088_v55 }
 0xcc4   :  { %1968 = vmatmul.f32.gmra.mxu1 %v1929_v43  ;;  %v1916_v13 = vmul.f32 %v3368_v14, %v1915_v19  ;;  %v2082_v43 = vld [vmem:[#allocation7 + $0x6c0] sm:$0xff] }
 0xcc5   :  { %2114 = vmatpush.msrb.mxu3 %v2087_v5 }
 0xcc6   :  { %v1917_v27 = vadd.f32 %v3368_v14, %v1916_v13 }
 0xcc7   :  { %2115 = vmatpush.msrb.mxu3 %v2086_v53 }
 0xcc8   :  { %v1921_v31 = vsel %vm1920_vm6, %v3368_v14, %v1917_v27  ;;  %v2084_v14 = vld [vmem:[#allocation7 + $0x6d0] sm:$0xff] }
 0xcc9   :  { %v1926_v32 = vsel %vm1923_vm7, %v1925_v28, %v1921_v31  ;;  %2116 = vmatpush.msrb.mxu3 %v2085_v42 }
 0xcca   :  { %v1930_v34 = vmul.f32 %v1926_v32, %v1870_v37 }
 0xccb   :  { %2117 = vmatpush.msrb.mxu3 %v2084_v14  ;;  %v2075_v14 = vld [vmem:[#allocation7 + $0x688] sm:$0xff] }
 0xccc   :  { %1971 = vmatmul.f32.gmra.mxu1 %v1930_v34 }
 0xccd   :  { %2118 = vmatpush.msrb.mxu3 %v2083_v39 }
 0xccf   :  { %2119 = vmatpush.msrb.mxu3 %v2082_v43  ;;  %v2164_v43 = vld [vmem:[#allocation7 + $0x760] sm:$0xff] }
 0xcd1   :  { %2120 = vmatpush.msrb.mxu3 %v2081_v24  ;;  %v2160_v24 = vld [vmem:[#allocation7 + $0x740] sm:$0xff] }
 0xd39   :  { %v1966_v40 = vpop.f32.mrf.mxu1 }
 0xd3a   :  { %v4080_v2 = vadd.f32 %v3246_v25, %v1966_v40 }
 0xd3c   :  { %v3185_v20 = vmul.f32 -1.442695, %v4080_v2 }
 0xd3e   :  { %3369 = vpow2.f32 %v3185_v20  ;;  %v2080_v20 = vld [vmem:[#allocation7 + $0x6b0] sm:$0xff] }
 0xd3f   :  { %2121 = vmatpush.msrb.mxu3 %v2080_v20  ;;  %v2153_v20 = vld [vmem:[#allocation7 + $0x708] sm:$0xff] }
 0xd41   :  { %v1969_v60 = vpop.f32.mrf.mxu1 }
 0xd42   :  { %v4083_v12 = vadd.f32 %v3246_v25, %v1969_v60 }
 0xd44   :  { %v3370_v52 = vpop.eup %3369  ;;  %v3186_v56 = vmul.f32 -1.442695, %v4083_v12 }
 0xd45   :  { %v4086_v57 = vadd.f32 1.0, %v3370_v52 }
 0xd46   :  { %3371 = vpow2.f32 %v3186_v56 }
 0xd47   :  { %3373 = vrcp.f32 %v4086_v57  ;;  %vm1992_vm11 = vweird.f32 %v4086_v57  ;;  %v1996_v32 = vand.u32 2147483647, %v4086_v57  ;;  %v1998_v34 = vand.u32 2147483648, %v4086_v57 }
 0xd49   :  { %v1972_v61 = vpop.f32.mrf.mxu1  ;;  %v1999_v4 = vor.u32 1.1754944e-38, %v1998_v34  ;;  %vm1997_vm4 = vcmp.eq.f32.partialorder %v1996_v32, 8.507059e+37  ;;  %v2155_v32 = vld [vmem:[#allocation7 + $0x718] sm:$0xff] }
 0xd4a   :  { %v4088_v50 = vadd.f32 %v3246_v25, %v1972_v61  ;;  %v3244_v34 = vld [vmem:[#allocation8 + $0x98] ss:$0 sm:$0xff]  ;;  %v2109_v25 = vpop.f32.mrf.mxu0 }
 0xd4c   :  { %v3372_v37 = vpop.eup %3371  ;;  %v3187_v17 = vmul.f32 -1.442695, %v4088_v50 }
 0xd4d   :  { %v1985_v22 = vadd.f32 1.0, %v3372_v37  ;;  %v4092_v63 = vpop.eup %3373  ;;  %v2079_v37 = vld [vmem:[#allocation7 + $0x6a8] sm:$0xff] }
 0xd4e   :  { %3375 = vpow2.f32 %v3187_v17  ;;  %v1988_v6 = vmul.f32 %v4092_v63, %v4086_v57  ;;  %vm1993_vm9 = vweird.f32 %v4092_v63  ;;  %2122 = vmatpush.msrb.mxu3 %v2079_v37  ;;  %v2235_v37 = vld [vmem:[#allocation5 + $0x4f8] sm:$0xff] }
 0xd4f   :  { %3377 = vrcp.f32 %v1985_v22  ;;  %v2013_v13 = vand.u32 2147483648, %v1985_v22  ;;  %vm2007_vm10 = vweird.f32 %v1985_v22  ;;  %v2011_v28 = vand.u32 2147483647, %v1985_v22  ;;  %vm4110_vm14 = vmor %vm1992_vm11, %vm1993_vm9  ;;  %2256 = vmatpush.msra.mxu0 %v2235_v37  ;;  %v2207_v37 = vld [vmem:[#allocation5 + $0x418] sm:$0xff] }
 0xd50   :  { %v1989_v11 = vsub.f32 1.0, %v1988_v6 }
 0xd51   :  { %v2014_v57 = vor.u32 1.1754944e-38, %v2013_v13  ;;  %vm2012_vm15 = vcmp.eq.f32.partialorder %v2011_v28, 8.507059e+37  ;;  %v2161_v13 = vld [vmem:[#allocation7 + $0x748] sm:$0xff] }
 0xd52   :  { %v1990_v36 = vmul.f32 %v4092_v63, %v1989_v11  ;;  %v2076_v11 = vld [vmem:[#allocation7 + $0x690] sm:$0xff]  ;;  %v2157_v28 = vld [vmem:[#allocation7 + $0x728] sm:$0xff] }
 0xd54   :  { %v3376_v1 = vpop.eup %3375  ;;  %v1991_v27 = vadd.f32 %v4092_v63, %v1990_v36  ;;  %v2166_v36 = vld [vmem:[#allocation7 + $0x770] sm:$0xff] }
 0xd55   :  { %v3378_v8 = vpop.eup %3377  ;;  %v1986_v3 = vadd.f32 1.0, %v3376_v1  ;;  %v2078_v1 = vld [vmem:[#allocation7 + $0x6a0] sm:$0xff] }
 0xd56   :  { %v2003_v35 = vmul.f32 %v3378_v8, %v1985_v22  ;;  %vm2008_vm8 = vweird.f32 %v3378_v8  ;;  %v1995_v17 = vsel %vm4110_vm14, %v4092_v63, %v1991_v27  ;;  %2123 = vmatpush.msrb.mxu3 %v2078_v1  ;;  %v2158_v27 = vld [vmem:[#allocation7 + $0x730] sm:$0xff]  ;;  %v2228_v1 = vld [vmem:[#allocation5 + $0x4c0] sm:$0xff] }
 0xd57   :  { %3379 = vrcp.f32 %v1986_v3  ;;  %vm4102_vm12 = vmor %vm2007_vm10, %vm2008_vm8  ;;  %v2028_v40 = vand.u32 2147483648, %v1986_v3  ;;  %v2026_v56 = vand.u32 2147483647, %v1986_v3  ;;  %vm2022_vm1 = vweird.f32 %v1986_v3 }
 0xd58   :  { %v2004_v47 = vsub.f32 1.0, %v2003_v35  ;;  %v2077_v35 = vld [vmem:[#allocation7 + $0x698] sm:$0xff] }
 0xd59   :  { %v2029_v5 = vor.u32 1.1754944e-38, %v2028_v40  ;;  %vm2027_vm5 = vcmp.eq.f32.partialorder %v2026_v56, 8.507059e+37  ;;  %2124 = vmatpush.msrb.mxu3 %v2077_v35  ;;  %v2154_v40 = vld [vmem:[#allocation7 + $0x710] sm:$0xff]  ;;  %v2224_v35 = vld [vmem:[#allocation5 + $0x4a0] sm:$0xff] }
 0xd5a   :  { %v2005_v0 = vmul.f32 %v3378_v8, %v2004_v47 }
 0xd5b   :  { %2125 = vmatpush.msrb.mxu3 %v2076_v11  ;;  %v2222_v11 = vld [vmem:[#allocation5 + $0x490] sm:$0xff] }
 0xd5c   :  { %v2006_v19 = vadd.f32 %v3378_v8, %v2005_v0 }
 0xd5d   :  { %v3380_v10 = vpop.eup %3379  ;;  %2126 = vmatpush.msrb.mxu3 %v2075_v14  ;;  %v2220_v14 = vld [vmem:[#allocation5 + $0x480] sm:$0xff] }
 0xd5e   :  { %v2018_v48 = vmul.f32 %v3380_v10, %v1986_v3  ;;  %v2010_v60 = vsel %vm4102_vm12, %v3378_v8, %v2006_v19  ;;  %vm2023_vm13 = vweird.f32 %v3380_v10  ;;  %v2000_v8 = vsel %vm1997_vm4, %v1999_v4, %v1995_v17  ;;  %v2163_v19 = vld [vmem:[#allocation7 + $0x758] sm:$0xff]  ;;  %v2232_v17 = vld [vmem:[#allocation5 + $0x4e0] sm:$0xff] }
 0xd5f   :  { %v2015_v55 = vsel %vm2012_vm15, %v2014_v57, %v2010_v60  ;;  %vm2024_vm2 = vmor %vm2022_vm1, %vm2023_vm13  ;;  %v2032_v3 = vmul.f32 %v2000_v8, %v4080_v2  ;;  %v2167_v2 = vld [vmem:[#allocation7 + $0x778] sm:$0xff]  ;;  %v2110_v60 = vadd.f32 %v3244_v34, %v2109_v25  ;;  %v2234_v57 = vld [vmem:[#allocation5 + $0x4f0] sm:$0xff] }
 0xd60   :  { %v2019_v31 = vsub.f32 1.0, %v2018_v48  ;;  %v2033_v42 = vmul.f32 %v2015_v55, %v4083_v12  ;;  %v2074_v12 = vld [vmem:[#allocation7 + $0x680] sm:$0xff]  ;;  %v2162_v48 = vld [vmem:[#allocation7 + $0x750] sm:$0xff]  ;;  %2236 = vmatpush.msra.mxu1 %v2234_v57 }
 0xd61   :  { %v2035_v39 = vmul.f32 %v2032_v3, %v3841_v41  ;;  %2127 = vmatpush.msrb.mxu3 %v2074_v12  ;;  %v2230_v55 = vld [vmem:[#allocation5 + $0x4d0] sm:$0xff]  ;;  %v2223_v3 = vld [vmem:[#allocation5 + $0x498] sm:$0xff] }
 0xd62   :  { %v2020_v52 = vmul.f32 %v3380_v10, %v2019_v31  ;;  %v2036_v0 = vmul.f32 %v2033_v42, %v3822_v44  ;;  %v2156_v31 = vld [vmem:[#allocation7 + $0x720] sm:$0xff]  ;;  %2237 = vmatpush.msra.mxu1 %v2232_v17  ;;  %v2226_v8 = vld [vmem:[#allocation5 + $0x4b0] sm:$0xff]  ;;  %v2225_v42 = vld [vmem:[#allocation5 + $0x4a8] sm:$0xff] }
 0xd63   :  { %v2219_v12 = vld [vmem:[#allocation5 + $0x478] sm:$0xff]  ;;  %v2206_v57 = vld [vmem:[#allocation5 + $0x410] sm:$0xff]  ;;  %v2204_v17 = vld [vmem:[#allocation5 + $0x400] sm:$0xff] }
 0xd64   :  { %v2021_v22 = vadd.f32 %v3380_v10, %v2020_v52  ;;  %v2152_v52 = vld [vmem:[#allocation7 + $0x700] sm:$0xff]  ;;  %2238 = vmatpush.msra.mxu1 %v2230_v55 }
 0xd66   :  { %v2025_v6 = vsel %vm2024_vm2, %v3380_v10, %v2021_v22  ;;  %v2165_v10 = vld [vmem:[#allocation7 + $0x768] sm:$0xff]  ;;  %2239 = vmatpush.msra.mxu1 %v2228_v1 }
 0xd67   :  { %v2030_v53 = vsel %vm2027_vm5, %v2029_v5, %v2025_v6  ;;  %v2233_v22 = vld [vmem:[#allocation5 + $0x4e8] sm:$0xff]  ;;  %v2231_v5 = vld [vmem:[#allocation5 + $0x4d8] sm:$0xff] }
 0xd68   :  { %v2034_v63 = vmul.f32 %v2030_v53, %v4088_v50  ;;  %2257 = vmatpush.msra.mxu0 %v2233_v22  ;;  %v2229_v6 = vld [vmem:[#allocation5 + $0x4c8] sm:$0xff]  ;;  %v2227_v53 = vld [vmem:[#allocation5 + $0x4b8] sm:$0xff]  ;;  %2240 = vmatpush.msra.mxu1 %v2226_v8 }
 0xd69   :  { %v2205_v22 = vld [vmem:[#allocation5 + $0x408] sm:$0xff] }
 0xd6a   :  { %v2037_v47 = vmul.f32 %v2034_v63, %v3835_v7  ;;  %2258 = vmatpush.msra.mxu0 %v2231_v5  ;;  %2241 = vmatpush.msra.mxu1 %v2224_v35  ;;  %v2537_v35 = vld [vmem:[#allocation7 + $0x870] sm:$0xff] }
 0xd6c   :  { %2051 = vmatpush.msrb.mxu2 %v2037_v47  ;;  %2259 = vmatpush.msra.mxu0 %v2229_v6 }
 0xd6d   :  { %2242 = vmatpush.msra.mxu1 %v2222_v11  ;;  %v2533_v11 = vld [vmem:[#allocation7 + $0x850] sm:$0xff] }
 0xd6e   :  { %2052 = vmatpush.msrb.mxu2 %v2036_v0  ;;  %2260 = vmatpush.msra.mxu0 %v2227_v53  ;;  %v2221_v0 = vld [vmem:[#allocation5 + $0x488] sm:$0xff]  ;;  %v2538_v53 = vld [vmem:[#allocation7 + $0x878] sm:$0xff] }
 0xd6f   :  { %2243 = vmatpush.msra.mxu1 %v2220_v14  ;;  %v2527_v14 = vld [vmem:[#allocation7 + $0x820] sm:$0xff] }
 0xd70   :  { %2053 = vmatpush.msrb.mxu2 %v2035_v39  ;;  %2261 = vmatpush.msra.mxu0 %v2225_v42  ;;  %v2218_v39 = vld [vmem:[#allocation5 + $0x470] sm:$0xff]  ;;  %v2535_v42 = vld [vmem:[#allocation7 + $0x860] sm:$0xff] }
 0xd71   :  { %3188 = vmatmul.msk.f32.vlgmr.msrb.gmra.mxu2 %vm673_vm3, %v3995_v33  ;;  %v2159_v33 = vld [vmem:[#allocation7 + $0x738] sm:$0xff]  ;;  %2244 = vmatpush.msra.mxu1 %v2218_v39  ;;  %v2524_v39 = vld [vmem:[#allocation7 + $0x808] sm:$0xff] }
 0xd72   :  { %2170 = vmatpush.msra.mxu2 %v2167_v2  ;;  %2262 = vmatpush.msra.mxu0 %v2223_v3  ;;  %v2217_v2 = vld [vmem:[#allocation5 + $0x468] sm:$0xff]  ;;  %v2531_v3 = vld [vmem:[#allocation7 + $0x840] sm:$0xff] }
 0xd74   :  { %2171 = vmatpush.msra.mxu2 %v2166_v36  ;;  %2263 = vmatpush.msra.mxu0 %v2221_v0  ;;  %v2214_v36 = vld [vmem:[#allocation5 + $0x450] sm:$0xff] }
 0xd75   :  { %v2525_v0 = vld [vmem:[#allocation7 + $0x810] sm:$0xff] }
 0xd76   :  { %2172 = vmatpush.msra.mxu2 %v2165_v10  ;;  %2264 = vmatpush.msra.mxu0 %v2219_v12  ;;  %v2215_v10 = vld [vmem:[#allocation5 + $0x458] sm:$0xff]  ;;  %v2523_v12 = vld [vmem:[#allocation7 + $0x800] sm:$0xff] }
 0xd78   :  { %2173 = vmatpush.msra.mxu2 %v2164_v43  ;;  %2265 = vmatpush.msra.mxu0 %v2217_v2  ;;  %v2408_v2 = vld [vmem:[#allocation7 + $0x7e0] sm:$0xff] }
 0xd7a   :  { %2174 = vmatpush.msra.mxu2 %v2163_v19  ;;  %2266 = vmatpush.msra.mxu0 %v2215_v10  ;;  %v2406_v10 = vld [vmem:[#allocation7 + $0x7d0] sm:$0xff] }
 0xd7c   :  { %2175 = vmatpush.msra.mxu2 %v2162_v48  ;;  %v2212_v48 = vld [vmem:[#allocation5 + $0x440] sm:$0xff] }
 0xd7e   :  { %2176 = vmatpush.msra.mxu2 %v2161_v13  ;;  %v2213_v13 = vld [vmem:[#allocation5 + $0x448] sm:$0xff] }
 0xd7f   :  { %2267 = vmatpush.msra.mxu0 %v2213_v13  ;;  %v2192_v13 = vld [vmem:[#allocation8 + $0xa8] sm:$0x3] }
 0xd80   :  { %2177 = vmatpush.msra.mxu2 %v2160_v24 }
 0xd82   :  { %2178 = vmatpush.msra.mxu2 %v2159_v33 }
 0xd84   :  { %2179 = vmatpush.msra.mxu2 %v2158_v27 }
 0xd86   :  { %2180 = vmatpush.msra.mxu2 %v2157_v28 }
 0xd88   :  { %2181 = vmatpush.msra.mxu2 %v2156_v31 }
 0xd8a   :  { %2182 = vmatpush.msra.mxu2 %v2155_v32 }
 0xd8c   :  { %2183 = vmatpush.msra.mxu2 %v2154_v40 }
 0xd8e   :  { %2184 = vmatpush.msra.mxu2 %v2153_v20  ;;  %v2210_v20 = vld [vmem:[#allocation5 + $0x430] sm:$0xff] }
 0xd90   :  { %2185 = vmatpush.msra.mxu2 %v2152_v52  ;;  %v2208_v52 = vld [vmem:[#allocation5 + $0x420] sm:$0xff] }
 0xdf4   :  { %v2055_v50 = vpop.f32.mrf.mxu2 }
 0xdf5   :  { %2128 = vmatmul.f32.vlgmr.msrb.gmra.mxu3 %v2055_v50  ;;  %v2216_v50 = vld [vmem:[#allocation5 + $0x460] sm:$0xff] }
 0xdf6   :  { %2245 = vmatpush.msra.mxu1 %v2216_v50  ;;  %v2409_v50 = vld [vmem:[#allocation7 + $0x7e8] sm:$0xff] }
 0xdf8   :  { %2246 = vmatpush.msra.mxu1 %v2214_v36  ;;  %v2407_v36 = vld [vmem:[#allocation7 + $0x7d8] sm:$0xff] }
 0xdfa   :  { %2247 = vmatpush.msra.mxu1 %v2212_v48  ;;  %v2403_v48 = vld [vmem:[#allocation7 + $0x7b8] sm:$0xff] }
 0xdfc   :  { %2248 = vmatpush.msra.mxu1 %v2210_v20 }
 0xdfe   :  { %2249 = vmatpush.msra.mxu1 %v2208_v52 }
 0xe00   :  { %2250 = vmatpush.msra.mxu1 %v2206_v57  ;;  %v3248_v57 = vld [vmem:[#allocation8 + $0xb0] ss:$0 sm:$0xff] }
 0xe02   :  { %2251 = vmatpush.msra.mxu1 %v2204_v17 }
 0xe78   :  { %v2129_v56 = vpop.f32.mrf.mxu3 }
 0xe79   :  { %v4125_v61 = vadd.f32 %v2129_v56, %v2110_v60  ;;  %v2211_v60 = vld [vmem:[#allocation5 + $0x438] sm:$0xff]  ;;  %v2209_v56 = vld [vmem:[#allocation5 + $0x428] sm:$0xff] }
 0xe7a   :  { %2268 = vmatpush.msra.mxu0 %v2211_v60  ;;  %v2398_v60 = vld [vmem:[#allocation7 + $0x790] sm:$0xff] }
 0xe7b   :  { %v3189_v4 = vmul.f32 -1.442695, %v4125_v61 }
 0xe7c   :  { %2269 = vmatpush.msra.mxu0 %v2209_v56 }
 0xe7d   :  { %3381 = vpow2.f32 %v3189_v4  ;;  %v3247_v4 = vld [vmem:[#allocation8 + $0xa0] ss:$0 sm:$0xff] }
 0xe7e   :  { %2270 = vmatpush.msra.mxu0 %v2207_v37  ;;  %v2397_v37 = vld [vmem:[#allocation7 + $0x788] sm:$0xff] }
 0xe80   :  { %2271 = vmatpush.msra.mxu0 %v2205_v22  ;;  %v2396_v22 = vld [vmem:[#allocation7 + $0x780] sm:$0xff] }
 0xe83   :  { %v3382_v63 = vpop.eup %3381 }
 0xe84   :  { %v2135_v47 = vadd.f32 1.0, %v3382_v63  ;;  %v2534_v63 = vld [vmem:[#allocation7 + $0x858] sm:$0xff] }
 0xe86   :  { %3383 = vrcp.f32 %v2135_v47  ;;  %v2147_v33 = vand.u32 2147483648, %v2135_v47  ;;  %v2145_v28 = vand.u32 2147483647, %v2135_v47  ;;  %vm2141_vm7 = vweird.f32 %v2135_v47 }
 0xe88   :  { %v2148_v32 = vor.u32 1.1754944e-38, %v2147_v33  ;;  %vm2146_vm9 = vcmp.eq.f32.partialorder %v2145_v28, 8.507059e+37  ;;  %v2193_v33 = vperm.slane %v2192_v13, 0  ;;  %v2197_v28 = vperm.slane %v2192_v13, 1 }
 0xe8c   :  { %v3384_v43 = vpop.eup %3383 }
 0xe8d   :  { %v2137_v19 = vmul.f32 %v3384_v43, %v2135_v47  ;;  %vm2142_vm6 = vweird.f32 %v3384_v43  ;;  %v2529_v47 = vld [vmem:[#allocation7 + $0x830] sm:$0xff] }
 0xe8e   :  { %vm2143_vm8 = vmor %vm2141_vm7, %vm2142_vm6 }
 0xe8f   :  { %v2138_v24 = vsub.f32 1.0, %v2137_v19  ;;  %v2404_v19 = vld [vmem:[#allocation7 + $0x7c0] sm:$0xff] }
 0xe91   :  { %v2139_v27 = vmul.f32 %v3384_v43, %v2138_v24  ;;  %v2402_v24 = vld [vmem:[#allocation7 + $0x7b0] sm:$0xff] }
 0xe93   :  { %v2140_v31 = vadd.f32 %v3384_v43, %v2139_v27  ;;  %v2401_v27 = vld [vmem:[#allocation7 + $0x7a8] sm:$0xff] }
 0xe95   :  { %v2144_v34 = vsel %vm2143_vm8, %v3384_v43, %v2140_v31  ;;  %v2405_v43 = vld [vmem:[#allocation7 + $0x7c8] sm:$0xff]  ;;  %v2400_v31 = vld [vmem:[#allocation7 + $0x7a0] sm:$0xff] }
 0xe96   :  { %v2149_v25 = vsel %vm2146_vm9, %v2148_v32, %v2144_v34  ;;  %v2194_v32 = vmul.f32 %v2193_v33, %v4068_v51  ;;  %v2399_v34 = vld [vmem:[#allocation7 + $0x798] sm:$0xff] }
 0xe97   :  { %v2151_v40 = vmul.f32 %v2149_v25, %v4125_v61  ;;  %v2198_v25 = vmul.f32 %v2197_v28, %v3767_v26 }
 0xe99   :  { %2186 = vmatmul.f32.vlgmr.msra.gmra.mxu2 %v2151_v40  ;;  %v2201_v52 = vadd.f32 %v2198_v25, %v2194_v32 }
 0xf1c   :  { %v2187_v55 = vpop.f32.mrf.mxu2 }
 0xf1d   :  { %v2188_v61 = vadd.f32 %v3247_v4, %v2187_v55  ;;  %v2195_v4 = vmul.f32 %v2193_v33, %v4072_v62 }
 0xf1f   :  { %v2190_v5 = vadd.f32 %v2188_v61, %v3965_v15  ;;  %v2536_v15 = vld [vmem:[#allocation7 + $0x868] sm:$0xff] }
 0xf21   :  { %v4131_v1 = vmul.f32 %v2190_v5, %v3856_v38  ;;  %v2199_v5 = vmul.f32 %v2197_v28, %v3771_v45 }
 0xf23   :  { %2252 = vmatmul.f32.vlgmr.msra.gmra.mxu1 %v4131_v1  ;;  %2272 = vmatmul.f32.vlgmr.msra.gmra.mxu0 %v4131_v1 }
 0xfa0   :  { %v2253_v6 = vpop.f32.mrf.mxu1  ;;  %v2273_v8 = vpop.f32.mrf.mxu0 }
 0xfa1   :  { %2291 = vmatpush.msra.mxu3 %v2273_v8  ;;  %2317 = vmatpush.msrb.mxu2 %v2253_v6 }
 0xfa2   :  { %3190 = vmatmul.msk.f32.vlgmr.msra.gmra.mxu3 %vm135_vm0, %v4002_v54  ;;  %3193 = vmatmul.msk.f32.vlgmr.msrb.gmra.mxu2 %vm135_vm0, %v4050_v29  ;;  %v2532_v54 = vld [vmem:[#allocation7 + $0x848] sm:$0xff]  ;;  %v2530_v29 = vld [vmem:[#allocation7 + $0x838] sm:$0xff] }
 0xfa3   :  { %2557 = vmatpush.msra.mxu2 %v2538_v53  ;;  %v2202_v53 = vadd.f32 %v2199_v5, %v2195_v4 }
 0xfa5   :  { %2558 = vmatpush.msra.mxu2 %v2537_v35 }
 0xfa7   :  { %2559 = vmatpush.msra.mxu2 %v2536_v15 }
 0xfa9   :  { %2560 = vmatpush.msra.mxu2 %v2535_v42  ;;  %v2196_v42 = vmul.f32 %v2193_v33, %v4076_v46 }
 0xfaa   :  { %3191 = vmatmul.msk.f32.gmra.mxu3 %vm135_vm0, %v4009_v49  ;;  %3194 = vmatmul.msk.f32.gmra.mxu2 %vm135_vm0, %v4057_v18  ;;  %v2528_v49 = vld [vmem:[#allocation7 + $0x828] sm:$0xff]  ;;  %v2526_v18 = vld [vmem:[#allocation7 + $0x818] sm:$0xff] }
 0xfab   :  { %2561 = vmatpush.msra.mxu2 %v2534_v63 }
 0xfad   :  { %2562 = vmatpush.msra.mxu2 %v2533_v11 }
 0xfaf   :  { %2563 = vmatpush.msra.mxu2 %v2532_v54  ;;  %v2200_v54 = vmul.f32 %v2197_v28, %v3775_v58 }
 0xfb1   :  { %2564 = vmatpush.msra.mxu2 %v2531_v3 }
 0xfb2   :  { %3192 = vmatmul.msk.f32.gmra.mxu3 %vm135_vm0, %v4016_v59  ;;  %3195 = vmatmul.msk.f32.gmra.mxu2 %vm135_vm0, %v4064_v30  ;;  %v2411_v59 = vld [vmem:[#allocation7 + $0x7f8] sm:$0xff]  ;;  %v2410_v30 = vld [vmem:[#allocation7 + $0x7f0] sm:$0xff] }
 0xfb3   :  { %2565 = vmatpush.msra.mxu2 %v2530_v29  ;;  %2414 = vmatpush.msrb.mxu3 %v2411_v59 }
 0xfb5   :  { %2566 = vmatpush.msra.mxu2 %v2529_v47  ;;  %2415 = vmatpush.msrb.mxu3 %v2410_v30 }
 0xfb7   :  { %2567 = vmatpush.msra.mxu2 %v2528_v49  ;;  %2416 = vmatpush.msrb.mxu3 %v2409_v50 }
 0xfb9   :  { %2568 = vmatpush.msra.mxu2 %v2527_v14  ;;  %2417 = vmatpush.msrb.mxu3 %v2408_v2  ;;  %v2203_v14 = vadd.f32 %v2200_v54, %v2196_v42 }
 0xfbb   :  { %2569 = vmatpush.msra.mxu2 %v2526_v18  ;;  %2418 = vmatpush.msrb.mxu3 %v2407_v36 }
 0xfbd   :  { %2570 = vmatpush.msra.mxu2 %v2525_v0  ;;  %2419 = vmatpush.msrb.mxu3 %v2406_v10 }
 0xfbf   :  { %2571 = vmatpush.msra.mxu2 %v2524_v39  ;;  %2420 = vmatpush.msrb.mxu3 %v2405_v43 }
 0xfc1   :  { %2572 = vmatpush.msra.mxu2 %v2523_v12  ;;  %2421 = vmatpush.msrb.mxu3 %v2404_v19 }
 0xfc2   :  { %2573 = vmatmul.f32.vlgmr.msra.gmra.mxu2 %v4131_v1 }
 0xfc3   :  { %2422 = vmatpush.msrb.mxu3 %v2403_v48 }
 0xfc5   :  { %2423 = vmatpush.msrb.mxu3 %v2402_v24 }
 0xfc7   :  { %2424 = vmatpush.msrb.mxu3 %v2401_v27 }
 0xfc9   :  { %2425 = vmatpush.msrb.mxu3 %v2400_v31 }
 0xfcb   :  { %2426 = vmatpush.msrb.mxu3 %v2399_v34 }
 0xfcd   :  { %2427 = vmatpush.msrb.mxu3 %v2398_v60 }
 0xfcf   :  { %2428 = vmatpush.msrb.mxu3 %v2397_v37 }
 0xfd1   :  { %2429 = vmatpush.msrb.mxu3 %v2396_v22 }
0x1025   :  { %v2293_v40 = vpop.f32.mrf.mxu3  ;;  %v2319_v20 = vpop.f32.mrf.mxu2 }
0x1026   :  { %v2320_v56 = vadd.f32 %v2319_v20, %v2293_v40 }
0x1028   :  { %v2328_v17 = vadd.f32 %v2320_v56, %v2201_v52 }
0x102a   :  { %v2333_v55 = vadd.f32 %v3248_v57, %v2328_v17 }
0x102c   :  { %v3196_v61 = vmul.f32 -1.442695, %v2333_v55 }
0x102d   :  { %v2296_v6 = vpop.f32.mrf.mxu3  ;;  %v2322_v8 = vpop.f32.mrf.mxu2 }
0x102e   :  { %3385 = vpow2.f32 %v3196_v61  ;;  %v2323_v35 = vadd.f32 %v2322_v8, %v2296_v6 }
0x1030   :  { %v2329_v15 = vadd.f32 %v2323_v35, %v2202_v53 }
0x1032   :  { %v2334_v63 = vadd.f32 %v3248_v57, %v2329_v15 }
0x1034   :  { %v3386_v11 = vpop.eup %3385  ;;  %v3197_v3 = vmul.f32 -1.442695, %v2334_v63 }
0x1035   :  { %v2345_v29 = vadd.f32 1.0, %v3386_v11  ;;  %v2299_v47 = vpop.f32.mrf.mxu3  ;;  %v2325_v49 = vpop.f32.mrf.mxu2  ;;  %v3250_v11 = vld [vmem:[#allocation8 + $0xb8] ss:$0 sm:$0xff] }
0x1036   :  { %v2326_v18 = vadd.f32 %v2325_v49, %v2299_v47  ;;  %3387 = vpow2.f32 %v3197_v3 }
0x1037   :  { %3389 = vrcp.f32 %v2345_v29  ;;  %v2359_v10 = vand.u32 2147483648, %v2345_v29  ;;  %v2357_v19 = vand.u32 2147483647, %v2345_v29  ;;  %vm2353_vm11 = vweird.f32 %v2345_v29 }
0x1038   :  { %v2330_v0 = vadd.f32 %v2326_v18, %v2203_v14 }
0x1039   :  { %v2360_v33 = vor.u32 1.1754944e-38, %v2359_v10  ;;  %vm2358_vm13 = vcmp.eq.f32.partialorder %v2357_v19, 8.507059e+37  ;;  %v2552_v10 = vld [vmem:[#allocation7 + $0x8e8] sm:$0xff] }
0x103a   :  { %v2335_v39 = vadd.f32 %v3248_v57, %v2330_v0 }
0x103c   :  { %v3388_v12 = vpop.eup %3387  ;;  %v3198_v59 = vmul.f32 -1.442695, %v2335_v39 }
0x103d   :  { %v3390_v30 = vpop.eup %3389  ;;  %v2346_v50 = vadd.f32 1.0, %v3388_v12 }
0x103e   :  { %v2349_v2 = vmul.f32 %v3390_v30, %v2345_v29  ;;  %3391 = vpow2.f32 %v3198_v59  ;;  %vm2354_vm10 = vweird.f32 %v3390_v30 }
0x103f   :  { %3393 = vrcp.f32 %v2346_v50  ;;  %vm2355_vm12 = vmor %vm2353_vm11, %vm2354_vm10  ;;  %v2374_v40 = vand.u32 2147483648, %v2346_v50  ;;  %v2372_v60 = vand.u32 2147483647, %v2346_v50  ;;  %vm2368_vm15 = vweird.f32 %v2346_v50 }
0x1040   :  { %v2350_v36 = vsub.f32 1.0, %v2349_v2  ;;  %v2554_v2 = vld [vmem:[#allocation7 + $0x8f8] sm:$0xff] }
0x1041   :  { %v2375_v57 = vor.u32 1.1754944e-38, %v2374_v40  ;;  %vm2373_vm2 = vcmp.eq.f32.partialorder %v2372_v60, 8.507059e+37  ;;  %2577 = vmatpush.msrb.mxu0 %v2554_v2  ;;  %v2547_v60 = vld [vmem:[#allocation7 + $0x8c0] sm:$0xff]  ;;  %v2542_v2 = vld [vmem:[#allocation7 + $0x898] sm:$0xff] }
0x1042   :  { %v2351_v43 = vmul.f32 %v3390_v30, %v2350_v36  ;;  %v2553_v36 = vld [vmem:[#allocation7 + $0x8f0] sm:$0xff] }
0x1043   :  { %2578 = vmatpush.msrb.mxu0 %v2553_v36 }
0x1044   :  { %v3392_v48 = vpop.eup %3391  ;;  %v2352_v13 = vadd.f32 %v3390_v30, %v2351_v43 }
0x1045   :  { %v3394_v24 = vpop.eup %3393  ;;  %v2347_v27 = vadd.f32 1.0, %v3392_v48  ;;  %2579 = vmatpush.msrb.mxu0 %v2552_v10  ;;  %v2541_v10 = vld [vmem:[#allocation7 + $0x890] sm:$0xff] }
0x1046   :  { %v2356_v28 = vsel %vm2355_vm12, %v3390_v30, %v2352_v13  ;;  %v2364_v31 = vmul.f32 %v3394_v24, %v2346_v50  ;;  %vm2369_vm14 = vweird.f32 %v3394_v24 }
0x1047   :  { %v2361_v32 = vsel %vm2358_vm13, %v2360_v33, %v2356_v28  ;;  %3395 = vrcp.f32 %v2347_v27  ;;  %vm2370_vm1 = vmor %vm2368_vm15, %vm2369_vm14  ;;  %v2389_v5 = vand.u32 2147483648, %v2347_v27  ;;  %v2387_v6 = vand.u32 2147483647, %v2347_v27 }
0x1048   :  { %v2393_v34 = vmul.f32 %v2361_v32, %v2333_v55  ;;  %v2365_v25 = vsub.f32 1.0, %v2364_v31  ;;  %vm2383_vm5 = vweird.f32 %v2347_v27  ;;  %v2549_v32 = vld [vmem:[#allocation7 + $0x8d0] sm:$0xff] }
0x1049   :  { %v2390_v53 = vor.u32 1.1754944e-38, %v2389_v5  ;;  %vm2388_vm7 = vcmp.eq.f32.partialorder %v2387_v6, 8.507059e+37 }
0x104a   :  { %2430 = vmatmul.f32.vlgmr.msrb.gmra.mxu3 %v2393_v34  ;;  %v2366_v20 = vmul.f32 %v3394_v24, %v2365_v25  ;;  %v2548_v25 = vld [vmem:[#allocation7 + $0x8c8] sm:$0xff] }
0x104c   :  { %v2367_v52 = vadd.f32 %v3394_v24, %v2366_v20 }
0x104d   :  { %v3396_v56 = vpop.eup %3395 }
0x104e   :  { %v2371_v37 = vsel %vm2370_vm1, %v3394_v24, %v2367_v52  ;;  %v2379_v17 = vmul.f32 %v3396_v56, %v2347_v27  ;;  %vm2384_vm4 = vweird.f32 %v3396_v56  ;;  %v2551_v24 = vld [vmem:[#allocation7 + $0x8e0] sm:$0xff]  ;;  %v2550_v27 = vld [vmem:[#allocation7 + $0x8d8] sm:$0xff] }
0x104f   :  { %v2376_v22 = vsel %vm2373_vm2, %v2375_v57, %v2371_v37  ;;  %vm2385_vm6 = vmor %vm2383_vm5, %vm2384_vm4  ;;  %2580 = vmatpush.msrb.mxu0 %v2551_v24  ;;  %v2546_v37 = vld [vmem:[#allocation7 + $0x8b8] sm:$0xff] }
0x1050   :  { %v2394_v4 = vmul.f32 %v2376_v22, %v2334_v63  ;;  %v2380_v61 = vsub.f32 1.0, %v2379_v17 }
0x1051   :  { %2581 = vmatpush.msrb.mxu0 %v2550_v27  ;;  %v2631_v27 = vld [vmem:[#allocation7 + $0x970] sm:$0xff] }
0x1052   :  { %2433 = vmatmul.f32.gmra.mxu3 %v2394_v4  ;;  %v2381_v55 = vmul.f32 %v3396_v56, %v2380_v61 }
0x1053   :  { %2582 = vmatpush.msrb.mxu0 %v2549_v32  ;;  %v2628_v32 = vld [vmem:[#allocation7 + $0x958] sm:$0xff] }
0x1054   :  { %v2382_v8 = vadd.f32 %v3396_v56, %v2381_v55 }
0x1055   :  { %2583 = vmatpush.msrb.mxu0 %v2548_v25  ;;  %v2626_v25 = vld [vmem:[#allocation7 + $0x948] sm:$0xff] }
0x1056   :  { %v2386_v35 = vsel %vm2385_vm6, %v3396_v56, %v2382_v8  ;;  %v2545_v8 = vld [vmem:[#allocation7 + $0x8b0] sm:$0xff] }
0x1057   :  { %v2391_v15 = vsel %vm2388_vm7, %v2390_v53, %v2386_v35  ;;  %2584 = vmatpush.msrb.mxu0 %v2547_v60  ;;  %v2623_v60 = vld [vmem:[#allocation7 + $0x930] sm:$0xff] }
0x1058   :  { %v2395_v42 = vmul.f32 %v2391_v15, %v2335_v39 }
0x1059   :  { %2585 = vmatpush.msrb.mxu0 %v2546_v37  ;;  %v3249_v37 = vld [vmem:[#allocation8 + $0xc0] ss:$0 sm:$0xff] }
0x105a   :  { %2436 = vmatmul.f32.gmra.mxu3 %v2395_v42 }
0x105b   :  { %2586 = vmatpush.msrb.mxu0 %v2545_v8  ;;  %v2699_v8 = vld [vmem:[#allocation5 + $0x5f0] sm:$0xff] }
0x105c   :  { %2701 = vmatpush.msra.mxu3 %v2699_v8 }
0x10cd   :  { %v2431_v54 = vpop.f32.mrf.mxu3 }
0x10ce   :  { %v4154_v3 = vadd.f32 %v3250_v11, %v2431_v54  ;;  %v2544_v54 = vld [vmem:[#allocation7 + $0x8a8] sm:$0xff] }
0x10cf   :  { %2587 = vmatpush.msrb.mxu0 %v2544_v54  ;;  %v2696_v54 = vld [vmem:[#allocation5 + $0x5d8] sm:$0xff] }
0x10d0   :  { %v3199_v63 = vmul.f32 -1.442695, %v4154_v3 }
0x10d2   :  { %3397 = vpow2.f32 %v3199_v63 }
0x10d5   :  { %v2434_v29 = vpop.f32.mrf.mxu3 }
0x10d6   :  { %v4157_v47 = vadd.f32 %v3250_v11, %v2434_v29 }
0x10d8   :  { %v3398_v49 = vpop.eup %3397  ;;  %v3200_v14 = vmul.f32 -1.442695, %v4157_v47 }
0x10d9   :  { %v4160_v18 = vadd.f32 1.0, %v3398_v49 }
0x10da   :  { %3399 = vpow2.f32 %v3200_v14 }
0x10db   :  { %3401 = vrcp.f32 %v4160_v18  ;;  %vm2457_vm11 = vweird.f32 %v4160_v18  ;;  %v2461_v61 = vand.u32 2147483647, %v4160_v18  ;;  %v2463_v5 = vand.u32 2147483648, %v4160_v18 }
0x10dd   :  { %v2437_v0 = vpop.f32.mrf.mxu3  ;;  %v2464_v49 = vor.u32 1.1754944e-38, %v2463_v5  ;;  %vm2462_vm4 = vcmp.eq.f32.partialorder %v2461_v61, 8.507059e+37  ;;  %v2617_v5 = vld [vmem:[#allocation7 + $0x900] sm:$0xff] }
0x10de   :  { %v4162_v12 = vadd.f32 %v3250_v11, %v2437_v0  ;;  %v2543_v0 = vld [vmem:[#allocation7 + $0x8a0] sm:$0xff] }
0x10df   :  { %2588 = vmatpush.msrb.mxu0 %v2543_v0  ;;  %v2690_v0 = vld [vmem:[#allocation5 + $0x5a8] sm:$0xff] }
0x10e0   :  { %v3400_v39 = vpop.eup %3399  ;;  %v3201_v59 = vmul.f32 -1.442695, %v4162_v12 }
0x10e1   :  { %v2450_v30 = vadd.f32 1.0, %v3400_v39  ;;  %v4166_v50 = vpop.eup %3401  ;;  %2589 = vmatpush.msrb.mxu0 %v2542_v2 }
0x10e2   :  { %3403 = vpow2.f32 %v3201_v59  ;;  %v2453_v19 = vmul.f32 %v4166_v50, %v4160_v18  ;;  %vm2458_vm9 = vweird.f32 %v4166_v50 }
0x10e3   :  { %3405 = vrcp.f32 %v2450_v30  ;;  %v2478_v57 = vand.u32 2147483648, %v2450_v30  ;;  %vm2472_vm10 = vweird.f32 %v2450_v30  ;;  %v2476_v22 = vand.u32 2147483647, %v2450_v30  ;;  %vm4184_vm14 = vmor %vm2457_vm11, %vm2458_vm9  ;;  %2590 = vmatpush.msrb.mxu0 %v2541_v10  ;;  %v2683_v10 = vld [vmem:[#allocation5 + $0x570] sm:$0xff] }
0x10e4   :  { %v2454_v28 = vsub.f32 1.0, %v2453_v19 }
0x10e5   :  { %v2479_v11 = vor.u32 1.1754944e-38, %v2478_v57  ;;  %vm2477_vm15 = vcmp.eq.f32.partialorder %v2476_v22, 8.507059e+37  ;;  %v2620_v57 = vld [vmem:[#allocation7 + $0x918] sm:$0xff]  ;;  %v2619_v22 = vld [vmem:[#allocation7 + $0x910] sm:$0xff] }
0x10e6   :  { %v2455_v40 = vmul.f32 %v4166_v50, %v2454_v28  ;;  %v2630_v28 = vld [vmem:[#allocation7 + $0x968] sm:$0xff] }
0x10e8   :  { %v3404_v43 = vpop.eup %3403  ;;  %v2456_v17 = vadd.f32 %v4166_v50, %v2455_v40  ;;  %v2625_v40 = vld [vmem:[#allocation7 + $0x940] sm:$0xff] }
0x10e9   :  { %v3406_v48 = vpop.eup %3405  ;;  %v2451_v13 = vadd.f32 1.0, %v3404_v43 }
0x10ea   :  { %v2468_v33 = vmul.f32 %v3406_v48, %v2450_v30  ;;  %vm2473_vm8 = vweird.f32 %v3406_v48  ;;  %v2460_v63 = vsel %vm4184_vm14, %v4166_v50, %v2456_v17  ;;  %v2574_v17 = vpop.f32.mrf.mxu2 }
0x10eb   :  { %3407 = vrcp.f32 %v2451_v13  ;;  %vm4176_vm12 = vmor %vm2472_vm10, %vm2473_vm8  ;;  %v2493_v6 = vand.u32 2147483648, %v2451_v13  ;;  %v2491_v15 = vand.u32 2147483647, %v2451_v13  ;;  %vm2487_vm1 = vweird.f32 %v2451_v13 }
0x10ec   :  { %v2469_v31 = vsub.f32 1.0, %v2468_v33  ;;  %v2465_v59 = vsel %vm2462_vm4, %v2464_v49, %v2460_v63  ;;  %v2632_v33 = vld [vmem:[#allocation7 + $0x978] sm:$0xff]  ;;  %v2575_v61 = vadd.f32 %v3249_v37, %v2574_v17  ;;  %v2693_v63 = vld [vmem:[#allocation5 + $0x5c0] sm:$0xff]  ;;  %v2691_v49 = vld [vmem:[#allocation5 + $0x5b0] sm:$0xff] }
0x10ed   :  { %v2494_v18 = vor.u32 1.1754944e-38, %v2493_v6  ;;  %vm2492_vm5 = vcmp.eq.f32.partialorder %v2491_v15, 8.507059e+37  ;;  %v2497_v43 = vmul.f32 %v2465_v59, %v4154_v3  ;;  %v2698_v15 = vld [vmem:[#allocation5 + $0x5e8] sm:$0xff]  ;;  %v2687_v59 = vld [vmem:[#allocation5 + $0x590] sm:$0xff]  ;;  %v2673_v37 = vld [vmem:[#allocation5 + $0x520] sm:$0xff] }
0x10ee   :  { %v2470_v34 = vmul.f32 %v3406_v48, %v2469_v31  ;;  %v2629_v31 = vld [vmem:[#allocation7 + $0x960] sm:$0xff]  ;;  %v2674_v17 = vld [vmem:[#allocation5 + $0x528] sm:$0xff] }
0x10ef   :  { %v2500_v24 = vmul.f32 %v2497_v43, %v3841_v41  ;;  %v2684_v43 = vld [vmem:[#allocation5 + $0x578] sm:$0xff] }
0x10f0   :  { %v2471_v52 = vadd.f32 %v3406_v48, %v2470_v34  ;;  %v2627_v34 = vld [vmem:[#allocation7 + $0x950] sm:$0xff] }
0x10f1   :  { %v3408_v20 = vpop.eup %3407 }
0x10f2   :  { %v2483_v56 = vmul.f32 %v3408_v20, %v2451_v13  ;;  %v2475_v53 = vsel %vm4176_vm12, %v3406_v48, %v2471_v52  ;;  %vm2488_vm13 = vweird.f32 %v3408_v20  ;;  %v2540_v48 = vld [vmem:[#allocation7 + $0x888] sm:$0xff] }
0x10f3   :  { %v2480_v14 = vsel %vm2477_vm15, %v2479_v11, %v2475_v53  ;;  %vm2489_vm2 = vmor %vm2487_vm1, %vm2488_vm13  ;;  %2591 = vmatpush.msrb.mxu0 %v2540_v48  ;;  %v2622_v52 = vld [vmem:[#allocation7 + $0x928] sm:$0xff]  ;;  %v2700_v53 = vld [vmem:[#allocation5 + $0x5f8] sm:$0xff] }
0x10f4   :  { %v2484_v4 = vsub.f32 1.0, %v2483_v56  ;;  %v2498_v36 = vmul.f32 %v2480_v14, %v4157_v47  ;;  %v4197_v47 = vld [vmem:[#allocation2] sm:$0xff]  ;;  %v2621_v56 = vld [vmem:[#allocation7 + $0x920] sm:$0xff]  ;;  %2721 = vmatpush.msrb.mxu2 %v2700_v53  ;;  %v2695_v11 = vld [vmem:[#allocation5 + $0x5d0] sm:$0xff] }
0x10f5   :  { %v2692_v14 = vld [vmem:[#allocation5 + $0x5b8] sm:$0xff]  ;;  %v2682_v48 = vld [vmem:[#allocation5 + $0x568] sm:$0xff] }
0x10f6   :  { %v2485_v35 = vmul.f32 %v3408_v20, %v2484_v4  ;;  %v2501_v13 = vmul.f32 %v2498_v36, %v3822_v44  ;;  %v2618_v4 = vld [vmem:[#allocation7 + $0x908] sm:$0xff]  ;;  %2722 = vmatpush.msrb.mxu2 %v2698_v15  ;;  %v2685_v36 = vld [vmem:[#allocation5 + $0x580] sm:$0xff] }
0x10f8   :  { %v2486_v29 = vadd.f32 %v3408_v20, %v2485_v35  ;;  %v2697_v35 = vld [vmem:[#allocation5 + $0x5e0] sm:$0xff]  ;;  %2723 = vmatpush.msrb.mxu2 %v2696_v54  ;;  %v3468_v54 = vld [vmem:[%s4277_s3] sm:$0xff] }
0x10f9   :  { %2702 = vmatpush.msra.mxu3 %v2697_v35 }
0x10fa   :  { %v2490_v39 = vsel %vm2489_vm2, %v3408_v20, %v2486_v29  ;;  %v2624_v20 = vld [vmem:[#allocation7 + $0x938] sm:$0xff]  ;;  %v2694_v29 = vld [vmem:[#allocation5 + $0x5c8] sm:$0xff] }
0x10fb   :  { %v2495_v30 = vsel %vm2492_vm5, %v2494_v18, %v2490_v39  ;;  %2703 = vmatpush.msra.mxu3 %v2695_v11  ;;  %2724 = vmatpush.msrb.mxu2 %v2694_v29  ;;  %v2689_v18 = vld [vmem:[#allocation5 + $0x5a0] sm:$0xff]  ;;  %v3020_v11 = vld [vmem:[#allocation7 + $0xa78] sm:$0xff]  ;;  %v3018_v29 = vld [vmem:[#allocation7 + $0xa68] sm:$0xff] }
0x10fc   :  { %v2499_v50 = vmul.f32 %v2495_v30, %v4162_v12  ;;  %v2539_v12 = vld [vmem:[#allocation7 + $0x880] sm:$0xff]  ;;  %v2688_v30 = vld [vmem:[#allocation5 + $0x598] sm:$0xff] }
0x10fd   :  { %2592 = vmatpush.msrb.mxu0 %v2539_v12  ;;  %2704 = vmatpush.msra.mxu3 %v2693_v63  ;;  %v3469_v63 = vld [vmem:[%s4276_s2] sm:$0xff] }
0x10fe   :  { %v2502_v19 = vmul.f32 %v2499_v50, %v3835_v7  ;;  %2725 = vmatpush.msrb.mxu2 %v2692_v14  ;;  %v2686_v50 = vld [vmem:[#allocation5 + $0x588] sm:$0xff]  ;;  %v3016_v14 = vld [vmem:[#allocation7 + $0xa58] sm:$0xff] }
0x10ff   :  { %2705 = vmatpush.msra.mxu3 %v2691_v49  ;;  %v3017_v49 = vld [vmem:[#allocation7 + $0xa60] sm:$0xff] }
0x1100   :  { %2516 = vmatpush.msrb.mxu1 %v2502_v19  ;;  %2726 = vmatpush.msrb.mxu2 %v2690_v0  ;;  %v2681_v19 = vld [vmem:[#allocation5 + $0x560] sm:$0xff] }
0x1101   :  { %2706 = vmatpush.msra.mxu3 %v2689_v18  ;;  %v3470_v18 = vld [vmem:[%s4277_s3 + $0x8] sm:$0xff] }
0x1102   :  { %2517 = vmatpush.msrb.mxu1 %v2501_v13  ;;  %2727 = vmatpush.msrb.mxu2 %v2688_v30  ;;  %v2679_v13 = vld [vmem:[#allocation5 + $0x550] sm:$0xff]  ;;  %v3471_v0 = vld [vmem:[%s4276_s2 + $0x8] sm:$0xff] }
0x1103   :  { %2707 = vmatpush.msra.mxu3 %v2687_v59  ;;  %v3014_v59 = vld [vmem:[#allocation7 + $0xa48] sm:$0xff]  ;;  %v3013_v30 = vld [vmem:[#allocation7 + $0xa40] sm:$0xff] }
0x1104   :  { %2518 = vmatpush.msrb.mxu1 %v2500_v24  ;;  %2728 = vmatpush.msrb.mxu2 %v2686_v50  ;;  %v2680_v24 = vld [vmem:[#allocation5 + $0x558] sm:$0xff]  ;;  %v3473_v50 = vld [vmem:[%s4276_s2 + $0x10] sm:$0xff]  ;;  %s3611_s2 = smov [#allocation10]  }
0x1105   :  { %3202 = vmatmul.msk.f32.vlgmr.msrb.gmra.mxu1 %vm673_vm3, %v4197_v47  ;;  %2708 = vmatpush.msra.mxu3 %v2685_v36  ;;  %v3472_v36 = vld [vmem:[%s4277_s3 + $0x10] sm:$0xff]  ;;  %s3109_s3 = sshll.u32 %s3611_s2, 4  ;;  %s3110_s3 = int_to_ptr.vmem [resolvable:$true] %s3109_s3 }
0x1106   :  { %2635 = vmatpush.msra.mxu1 %v2632_v33  ;;  %2729 = vmatpush.msrb.mxu2 %v2684_v43  ;;  %v2677_v33 = vld [vmem:[#allocation5 + $0x540] sm:$0xff]  ;;  %v3010_v43 = vld [vmem:[#allocation7 + $0xa28] sm:$0xff] }
0x1107   :  { %2709 = vmatpush.msra.mxu3 %v2683_v10  ;;  %v3011_v10 = vld [vmem:[#allocation7 + $0xa30] sm:$0xff] }
0x1108   :  { %2636 = vmatpush.msra.mxu1 %v2631_v27  ;;  %2730 = vmatpush.msrb.mxu2 %v2682_v48  ;;  %v2678_v27 = vld [vmem:[#allocation5 + $0x548] sm:$0xff]  ;;  %v3008_v48 = vld [vmem:[#allocation7 + $0xa18] sm:$0xff] }
0x1109   :  { %2710 = vmatpush.msra.mxu3 %v2681_v19  ;;  %v3009_v19 = vld [vmem:[#allocation7 + $0xa20] sm:$0xff] }
0x110a   :  { %2637 = vmatpush.msra.mxu1 %v2630_v28  ;;  %2731 = vmatpush.msrb.mxu2 %v2680_v24  ;;  %v3006_v24 = vld [vmem:[#allocation7 + $0xa08] sm:$0xff] }
0x110b   :  { %2711 = vmatpush.msra.mxu3 %v2679_v13  ;;  %v3007_v13 = vld [vmem:[#allocation7 + $0xa10] sm:$0xff] }
0x110c   :  { %2638 = vmatpush.msra.mxu1 %v2629_v31  ;;  %2732 = vmatpush.msrb.mxu2 %v2678_v27  ;;  %v2875_v27 = vld [vmem:[#allocation7 + $0x9f0] sm:$0xff] }
0x110d   :  { %2712 = vmatpush.msra.mxu3 %v2677_v33  ;;  %v2876_v33 = vld [vmem:[#allocation7 + $0x9f8] sm:$0xff] }
0x110e   :  { %2639 = vmatpush.msra.mxu1 %v2628_v32 }
0x1110   :  { %2640 = vmatpush.msra.mxu1 %v2627_v34 }
0x1112   :  { %2641 = vmatpush.msra.mxu1 %v2626_v25 }
0x1114   :  { %2642 = vmatpush.msra.mxu1 %v2625_v40 }
0x1116   :  { %2643 = vmatpush.msra.mxu1 %v2624_v20 }
0x1118   :  { %2644 = vmatpush.msra.mxu1 %v2623_v60 }
0x111a   :  { %2645 = vmatpush.msra.mxu1 %v2622_v52 }
0x111c   :  { %2646 = vmatpush.msra.mxu1 %v2621_v56  ;;  %v2675_v56 = vld [vmem:[#allocation5 + $0x530] sm:$0xff] }
0x111d   :  { %2713 = vmatpush.msra.mxu3 %v2675_v56 }
0x111e   :  { %2647 = vmatpush.msra.mxu1 %v2620_v57  ;;  %v2676_v57 = vld [vmem:[#allocation5 + $0x538] sm:$0xff] }
0x111f   :  { %2733 = vmatpush.msrb.mxu2 %v2676_v57  ;;  %2714 = vmatpush.msra.mxu3 %v2673_v37  ;;  %v2866_v57 = vld [vmem:[#allocation7 + $0x9a8] sm:$0xff] }
0x1120   :  { %2648 = vmatpush.msra.mxu1 %v2619_v22  ;;  %v2671_v22 = vld [vmem:[#allocation5 + $0x510] sm:$0xff] }
0x1121   :  { %2734 = vmatpush.msrb.mxu2 %v2674_v17  ;;  %2715 = vmatpush.msra.mxu3 %v2671_v22  ;;  %v2865_v17 = vld [vmem:[#allocation7 + $0x9a0] sm:$0xff] }
0x1122   :  { %2649 = vmatpush.msra.mxu1 %v2618_v4  ;;  %v2672_v4 = vld [vmem:[#allocation5 + $0x518] sm:$0xff] }
0x1123   :  { %2735 = vmatpush.msrb.mxu2 %v2672_v4  ;;  %v2864_v4 = vld [vmem:[#allocation7 + $0x998] sm:$0xff] }
0x1124   :  { %2650 = vmatpush.msra.mxu1 %v2617_v5  ;;  %v2670_v5 = vld [vmem:[#allocation5 + $0x508] sm:$0xff] }
0x1125   :  { %2736 = vmatpush.msrb.mxu2 %v2670_v5 }
0x1182   :  { %v2520_v3 = vpop.f32.mrf.mxu1 }
0x1183   :  { %2593 = vmatmul.f32.vlgmr.msrb.gmra.mxu0 %v2520_v3 }
0x1200   :  { %v2594_v55 = vpop.f32.mrf.mxu0 }
0x1201   :  { %v4201_v6 = vadd.f32 %v2594_v55, %v2575_v61  ;;  %v2669_v61 = vld [vmem:[#allocation5 + $0x500] sm:$0xff]  ;;  %v3251_v55 = vld [vmem:[#allocation8 + $0xc8] ss:$0 sm:$0xff] }
0x1202   :  { %2716 = vmatpush.msra.mxu3 %v2669_v61 }
0x1203   :  { %v3203_v42 = vmul.f32 -1.442695, %v4201_v6 }
0x1205   :  { %3409 = vpow2.f32 %v3203_v42 }
0x120b   :  { %v3410_v39 = vpop.eup %3409 }
0x120c   :  { %v2600_v2 = vadd.f32 1.0, %v3410_v39  ;;  %v3015_v39 = vld [vmem:[#allocation7 + $0xa50] sm:$0xff] }
0x120e   :  { %3411 = vrcp.f32 %v2600_v2  ;;  %v2612_v31 = vand.u32 2147483648, %v2600_v2  ;;  %v2610_v34 = vand.u32 2147483647, %v2600_v2  ;;  %vm2606_vm7 = vweird.f32 %v2600_v2 }
0x1210   :  { %v2613_v40 = vor.u32 1.1754944e-38, %v2612_v31  ;;  %vm2611_vm9 = vcmp.eq.f32.partialorder %v2610_v34, 8.507059e+37  ;;  %v2873_v31 = vld [vmem:[#allocation7 + $0x9e0] sm:$0xff]  ;;  %v2871_v34 = vld [vmem:[#allocation7 + $0x9d0] sm:$0xff] }
0x1214   :  { %v3412_v12 = vpop.eup %3411 }
0x1215   :  { %v2602_v3 = vmul.f32 %v3412_v12, %v2600_v2  ;;  %vm2607_vm6 = vweird.f32 %v3412_v12  ;;  %v3012_v2 = vld [vmem:[#allocation7 + $0xa38] sm:$0xff] }
0x1216   :  { %vm2608_vm8 = vmor %vm2606_vm7, %vm2607_vm6 }
0x1217   :  { %v2603_v28 = vsub.f32 1.0, %v2602_v3 }
0x1219   :  { %v2604_v32 = vmul.f32 %v3412_v12, %v2603_v28  ;;  %v2874_v28 = vld [vmem:[#allocation7 + $0x9e8] sm:$0xff] }
0x121b   :  { %v2605_v25 = vadd.f32 %v3412_v12, %v2604_v32  ;;  %v2872_v32 = vld [vmem:[#allocation7 + $0x9d8] sm:$0xff] }
0x121d   :  { %v2609_v20 = vsel %vm2608_vm8, %v3412_v12, %v2605_v25  ;;  %v3005_v12 = vld [vmem:[#allocation7 + $0xa00] sm:$0xff]  ;;  %v2870_v25 = vld [vmem:[#allocation7 + $0x9c8] sm:$0xff] }
0x121e   :  { %v2614_v60 = vsel %vm2611_vm9, %v2613_v40, %v2609_v20  ;;  %v2869_v40 = vld [vmem:[#allocation7 + $0x9c0] sm:$0xff]  ;;  %v2868_v20 = vld [vmem:[#allocation7 + $0x9b8] sm:$0xff] }
0x121f   :  { %v2616_v52 = vmul.f32 %v2614_v60, %v4201_v6  ;;  %v2657_v60 = vld [vmem:[#allocation8 + $0xd0] sm:$0x3] }
0x1220   :  { %v2658_v56 = vperm.slane %v2657_v60, 0  ;;  %v2662_v37 = vperm.slane %v2657_v60, 1  ;;  %v3067_v60 = vld [vmem:[#allocation7 + $0xaa0] sm:$0xff] }
0x1221   :  { %2651 = vmatmul.f32.vlgmr.msra.gmra.mxu1 %v2616_v52  ;;  %v2867_v52 = vld [vmem:[#allocation7 + $0x9b0] sm:$0xff] }
0x1222   :  { %v2659_v22 = vmul.f32 %v2658_v56, %v4068_v51  ;;  %v2663_v61 = vmul.f32 %v2662_v37, %v3767_v26  ;;  %v3076_v26 = vld [vmem:[#allocation7 + $0xae8] sm:$0xff] }
0x129e   :  { %v2652_v8 = vpop.f32.mrf.mxu1 }
0x129f   :  { %v2653_v6 = vadd.f32 %v3251_v55, %v2652_v8  ;;  %v2863_v8 = vld [vmem:[#allocation7 + $0x990] sm:$0xff] }
0x12a1   :  { %v2655_v53 = vadd.f32 %v2653_v6, %v4131_v1  ;;  %v3019_v1 = vld [vmem:[#allocation7 + $0xa70] sm:$0xff]  ;;  %v2666_v6 = vadd.f32 %v2663_v61, %v2659_v22 }
0x12a2   :  { %v3065_v22 = vld [vmem:[#allocation7 + $0xa90] sm:$0xff] }
0x12a3   :  { %v2656_v35 = vmul.f32 %v2655_v53, %v3856_v38 }
0x12a5   :  { %2717 = vmatmul.f32.vlgmr.msra.gmra.mxu3 %v2656_v35  ;;  %2737 = vmatmul.f32.vlgmr.msrb.gmra.mxu2 %v2656_v35  ;;  %v3004_v3 = vmul.f32 %v2656_v35, %v3856_v38  ;;  %v3252_v35 = vld [vmem:[#allocation8 + $0xd8] ss:$0 sm:$0xff] }
0x1328   :  { %v2718_v15 = vpop.f32.mrf.mxu3  ;;  %v2738_v42 = vpop.f32.mrf.mxu2 }
0x1329   :  { %2756 = vmatpush.msra.mxu0 %v2738_v42  ;;  %2782 = vmatpush.msrb.mxu1 %v2718_v15  ;;  %v3078_v15 = vld [vmem:[#allocation7 + $0xaf8] sm:$0xff]  ;;  %v2862_v42 = vld [vmem:[#allocation7 + $0x988] sm:$0xff] }
0x132a   :  { %3204 = vmatmul.msk.f32.vlgmr.msra.gmra.mxu0 %vm135_vm0, %v3468_v54  ;;  %3207 = vmatmul.msk.f32.vlgmr.msrb.gmra.mxu1 %vm135_vm0, %v3469_v63  ;;  %v3077_v54 = vld [vmem:[#allocation7 + $0xaf0] sm:$0xff]  ;;  %v2861_v63 = vld [vmem:[#allocation7 + $0x980] sm:$0xff] }
0x132b   :  { %3023 = vmatpush.msra.mxu1 %v3020_v11  ;;  %2879 = vmatpush.msrb.mxu0 %v2876_v33 }
0x132c   :  { %3081 = vmatpush.msra.mxu2 %v3078_v15 }
0x132d   :  { %3024 = vmatpush.msra.mxu1 %v3019_v1  ;;  %2880 = vmatpush.msrb.mxu0 %v2875_v27  ;;  %v2660_v1 = vmul.f32 %v2658_v56, %v4072_v62 }
0x132e   :  { %3082 = vmatpush.msra.mxu2 %v3077_v54 }
0x132f   :  { %3025 = vmatpush.msra.mxu1 %v3018_v29  ;;  %2881 = vmatpush.msrb.mxu0 %v2874_v28 }
0x1330   :  { %3083 = vmatpush.msra.mxu2 %v3076_v26 }
0x1331   :  { %3026 = vmatpush.msra.mxu1 %v3017_v49  ;;  %2882 = vmatpush.msrb.mxu0 %v2873_v31  ;;  %v3070_v31 = vld [vmem:[#allocation7 + $0xab8] sm:$0xff] }
0x1332   :  { %3205 = vmatmul.msk.f32.gmra.mxu0 %vm135_vm0, %v3470_v18  ;;  %3208 = vmatmul.msk.f32.gmra.mxu1 %vm135_vm0, %v3471_v0  ;;  %v3075_v18 = vld [vmem:[#allocation7 + $0xae0] sm:$0xff] }
0x1333   :  { %3027 = vmatpush.msra.mxu1 %v3016_v14  ;;  %2883 = vmatpush.msrb.mxu0 %v2872_v32  ;;  %v2664_v14 = vmul.f32 %v2662_v37, %v3771_v45  ;;  %v2665_v45 = vmul.f32 %v2662_v37, %v3775_v58  ;;  %v3066_v37 = vld [vmem:[#allocation7 + $0xa98] sm:$0xff] }
0x1334   :  { %3084 = vmatpush.msra.mxu2 %v3075_v18 }
0x1335   :  { %3028 = vmatpush.msra.mxu1 %v3015_v39  ;;  %2884 = vmatpush.msrb.mxu0 %v2871_v34  ;;  %v3069_v34 = vld [vmem:[#allocation7 + $0xab0] sm:$0xff] }
0x1337   :  { %3029 = vmatpush.msra.mxu1 %v3014_v59  ;;  %2885 = vmatpush.msrb.mxu0 %v2870_v25  ;;  %v2667_v59 = vadd.f32 %v2664_v14, %v2660_v1 }
0x1339   :  { %3030 = vmatpush.msra.mxu1 %v3013_v30  ;;  %2886 = vmatpush.msrb.mxu0 %v2869_v40  ;;  %v3068_v40 = vld [vmem:[#allocation7 + $0xaa8] sm:$0xff] }
0x133a   :  { %3206 = vmatmul.msk.f32.gmra.mxu0 %vm135_vm0, %v3472_v36  ;;  %3209 = vmatmul.msk.f32.gmra.mxu1 %vm135_vm0, %v3473_v50  ;;  %v3073_v50 = vld [vmem:[#allocation7 + $0xad0] sm:$0xff] }
0x133b   :  { %3031 = vmatpush.msra.mxu1 %v3012_v2  ;;  %2887 = vmatpush.msrb.mxu0 %v2868_v20  ;;  %v3074_v2 = vld [vmem:[#allocation7 + $0xad8] sm:$0xff] }
0x133c   :  { %3085 = vmatpush.msra.mxu2 %v3074_v2 }
0x133d   :  { %3032 = vmatpush.msra.mxu1 %v3011_v10  ;;  %2888 = vmatpush.msrb.mxu0 %v2867_v52  ;;  %v2661_v10 = vmul.f32 %v2658_v56, %v4076_v46 }
0x133e   :  { %3086 = vmatpush.msra.mxu2 %v3073_v50 }
0x133f   :  { %3033 = vmatpush.msra.mxu1 %v3010_v43  ;;  %2889 = vmatpush.msrb.mxu0 %v2866_v57  ;;  %v2668_v27 = vadd.f32 %v2665_v45, %v2661_v10 }
0x1341   :  { %3034 = vmatpush.msra.mxu1 %v3009_v19  ;;  %2890 = vmatpush.msrb.mxu0 %v2865_v17  ;;  %v3072_v19 = vld [vmem:[#allocation7 + $0xac8] sm:$0xff] }
0x1342   :  { %3087 = vmatpush.msra.mxu2 %v3072_v19 }
0x1343   :  { %3035 = vmatpush.msra.mxu1 %v3008_v48  ;;  %2891 = vmatpush.msrb.mxu0 %v2864_v4 }
0x1345   :  { %3036 = vmatpush.msra.mxu1 %v3007_v13  ;;  %2892 = vmatpush.msrb.mxu0 %v2863_v8  ;;  %v3064_v8 = vld [vmem:[#allocation7 + $0xa88] sm:$0xff] }
0x1347   :  { %3037 = vmatpush.msra.mxu1 %v3006_v24  ;;  %2893 = vmatpush.msrb.mxu0 %v2862_v42  ;;  %v3071_v24 = vld [vmem:[#allocation7 + $0xac0] sm:$0xff] }
0x1348   :  { %3088 = vmatpush.msra.mxu2 %v3071_v24 }
0x1349   :  { %3038 = vmatpush.msra.mxu1 %v3005_v12  ;;  %2894 = vmatpush.msrb.mxu0 %v2861_v63 }
0x134a   :  { %3039 = vmatmul.f32.vlgmr.msra.gmra.mxu1 %v3004_v3  ;;  %3089 = vmatpush.msra.mxu2 %v3070_v31 }
0x134c   :  { %3090 = vmatpush.msra.mxu2 %v3069_v34 }
0x134e   :  { %3091 = vmatpush.msra.mxu2 %v3068_v40 }
0x1350   :  { %3092 = vmatpush.msra.mxu2 %v3067_v60 }
0x1352   :  { %3093 = vmatpush.msra.mxu2 %v3066_v37 }
0x1354   :  { %3094 = vmatpush.msra.mxu2 %v3065_v22 }
0x1356   :  { %3095 = vmatpush.msra.mxu2 %v3064_v8 }
0x13a7   :  { %v2758_v5 = vpop.f32.mrf.mxu0  ;;  %v2784_v55 = vpop.f32.mrf.mxu1 }
0x13a8   :  { %v2785_v53 = vadd.f32 %v2784_v55, %v2758_v5  ;;  %v3253_v55 = vld [vmem:[#allocation8 + $0xf0] ss:$0 sm:$0xff] }
0x13aa   :  { %v2793_v11 = vadd.f32 %v2785_v53, %v2666_v6 }
0x13ac   :  { %v4235_v29 = vadd.f32 %v3252_v35, %v2793_v11 }
0x13ae   :  { %v3210_v49 = vmul.f32 -1.442695, %v4235_v29 }
0x13af   :  { %v2761_v0 = vpop.f32.mrf.mxu0  ;;  %v2787_v39 = vpop.f32.mrf.mxu1 }
0x13b0   :  { %3413 = vpow2.f32 %v3210_v49  ;;  %v2788_v30 = vadd.f32 %v2787_v39, %v2761_v0 }
0x13b2   :  { %v2794_v36 = vadd.f32 %v2788_v30, %v2667_v59 }
0x13b4   :  { %v4240_v43 = vadd.f32 %v3252_v35, %v2794_v36 }
0x13b6   :  { %v3414_v48 = vpop.eup %3413  ;;  %v3211_v13 = vmul.f32 -1.442695, %v4240_v43 }
0x13b7   :  { %v2810_v12 = vadd.f32 1.0, %v3414_v48  ;;  %v2764_v3 = vpop.f32.mrf.mxu0  ;;  %v2790_v33 = vpop.f32.mrf.mxu1 }
0x13b8   :  { %v2791_v28 = vadd.f32 %v2790_v33, %v2764_v3  ;;  %3415 = vpow2.f32 %v3211_v13 }
0x13b9   :  { %3417 = vrcp.f32 %v2810_v12  ;;  %v2824_v4 = vand.u32 2147483648, %v2810_v12  ;;  %v2822_v5 = vand.u32 2147483647, %v2810_v12  ;;  %vm2818_vm10 = vweird.f32 %v2810_v12 }
0x13ba   :  { %v2795_v32 = vadd.f32 %v2791_v28, %v2668_v27 }
0x13bb   :  { %v2825_v42 = vor.u32 1.1754944e-38, %v2824_v4  ;;  %vm2823_vm12 = vcmp.eq.f32.partialorder %v2822_v5, 8.507059e+37  ;;  %v3254_v4 = vld [vmem:[#allocation8 + $0xe0] ss:$0 sm:$0xff] }
0x13bc   :  { %v4244_v25 = vadd.f32 %v3252_v35, %v2795_v32  ;;  %v3063_v35 = vld [vmem:[#allocation7 + $0xa80] sm:$0xff] }
0x13bd   :  { %3096 = vmatpush.msra.mxu2 %v3063_v35 }
0x13be   :  { %v3416_v58 = vpop.eup %3415  ;;  %v3212_v20 = vmul.f32 -1.442695, %v4244_v25 }
0x13bf   :  { %v3418_v52 = vpop.eup %3417  ;;  %v2811_v56 = vadd.f32 1.0, %v3416_v58 }
0x13c0   :  { %v2814_v57 = vmul.f32 %v3418_v52, %v2810_v12  ;;  %3419 = vpow2.f32 %v3212_v20  ;;  %vm2819_vm0 = vweird.f32 %v3418_v52 }
0x13c1   :  { %3421 = vrcp.f32 %v2811_v56  ;;  %vm2820_vm11 = vmor %vm2818_vm10, %vm2819_vm0  ;;  %v2839_v39 = vand.u32 2147483648, %v2811_v56  ;;  %v2837_v30 = vand.u32 2147483647, %v2811_v56  ;;  %vm2833_vm14 = vweird.f32 %v2811_v56 }
0x13c2   :  { %v2815_v17 = vsub.f32 1.0, %v2814_v57 }
0x13c3   :  { %v2840_v50 = vor.u32 1.1754944e-38, %v2839_v39  ;;  %vm2838_vm1 = vcmp.eq.f32.partialorder %v2837_v30, 8.507059e+37 }
0x13c4   :  { %v2816_v61 = vmul.f32 %v3418_v52, %v2815_v17 }
0x13c6   :  { %v3420_v6 = vpop.eup %3419  ;;  %v2817_v53 = vadd.f32 %v3418_v52, %v2816_v61 }
0x13c7   :  { %v3422_v15 = vpop.eup %3421  ;;  %v3040_v11 = vpop.f32.mrf.mxu1  ;;  %v2812_v54 = vadd.f32 1.0, %v3420_v6 }
0x13c8   :  { %v2821_v63 = vsel %vm2820_vm11, %v3418_v52, %v2817_v53  ;;  %v3041_v1 = vadd.f32 %v3253_v55, %v3040_v11  ;;  %v2829_v26 = vmul.f32 %v3422_v15, %v2811_v56  ;;  %vm2834_vm13 = vweird.f32 %v3422_v15 }
0x13c9   :  { %v2826_v49 = vsel %vm2823_vm12, %v2825_v42, %v2821_v63  ;;  %3423 = vrcp.f32 %v2812_v54  ;;  %vm2835_vm15 = vmor %vm2833_vm14, %vm2834_vm13  ;;  %v2854_v12 = vand.u32 2147483648, %v2812_v54  ;;  %v2852_v33 = vand.u32 2147483647, %v2812_v54 }
0x13ca   :  { %v2858_v14 = vmul.f32 %v2826_v49, %v4235_v29  ;;  %v3217_v18 = vmul.f32 -1.442695, %v3041_v1  ;;  %v2830_v0 = vsub.f32 1.0, %v2829_v26  ;;  %vm2848_vm4 = vweird.f32 %v2812_v54 }
0x13cb   :  { %v2855_v28 = vor.u32 1.1754944e-38, %v2854_v12  ;;  %vm2853_vm6 = vcmp.eq.f32.partialorder %v2852_v33, 8.507059e+37 }
0x13cc   :  { %3425 = vpow2.f32 %v3217_v18  ;;  %2895 = vmatmul.f32.vlgmr.msrb.gmra.mxu0 %v2858_v14  ;;  %v2831_v59 = vmul.f32 %v3422_v15, %v2830_v0 }
0x13ce   :  { %v2832_v2 = vadd.f32 %v3422_v15, %v2831_v59  ;;  %v3255_v59 = vld [vmem:[#allocation8 + $0xf8] ss:$0 sm:$0xff] }
0x13cf   :  { %v3424_v36 = vpop.eup %3423 }
0x13d0   :  { %v2836_v10 = vsel %vm2835_vm15, %v3422_v15, %v2832_v2  ;;  %v2844_v19 = vmul.f32 %v3424_v36, %v2812_v54  ;;  %vm2849_vm2 = vweird.f32 %v3424_v36 }
0x13d1   :  { %v2841_v48 = vsel %vm2838_vm1, %v2840_v50, %v2836_v10  ;;  %vm2850_vm5 = vmor %vm2848_vm4, %vm2849_vm2 }
0x13d2   :  { %v3426_v45 = vpop.eup %3425  ;;  %v2859_v29 = vmul.f32 %v2841_v48, %v4240_v43  ;;  %v2845_v13 = vsub.f32 1.0, %v2844_v19 }
0x13d3   :  { %v3046_v24 = vadd.f32 1.0, %v3426_v45 }
0x13d4   :  { %2898 = vmatmul.f32.gmra.mxu0 %v2859_v29  ;;  %v2846_v3 = vmul.f32 %v3424_v36, %v2845_v13 }
0x13d5   :  { %3427 = vrcp.f32 %v3046_v24  ;;  %v3058_v20 = vand.u32 2147483648, %v3046_v24  ;;  %v3056_v52 = vand.u32 2147483647, %v3046_v24  ;;  %vm3052_vm8 = vweird.f32 %v3046_v24 }
0x13d6   :  { %v2847_v27 = vadd.f32 %v3424_v36, %v2846_v3 }
0x13d7   :  { %v3059_v57 = vor.u32 1.1754944e-38, %v3058_v20  ;;  %vm3057_vm0 = vcmp.eq.f32.partialorder %v3056_v52, 8.507059e+37 }
0x13d8   :  { %v2851_v31 = vsel %vm2850_vm5, %v3424_v36, %v2847_v27 }
0x13d9   :  { %v2856_v32 = vsel %vm2853_vm6, %v2855_v28, %v2851_v31  ;;  %v3256_v31 = vld [vmem:[#allocation8 + $0xe8] ss:$0 sm:$0xff] }
0x13da   :  { %v2860_v34 = vmul.f32 %v2856_v32, %v4244_v25 }
0x13db   :  { %v3428_v40 = vpop.eup %3427 }
0x13dc   :  { %v3048_v58 = vmul.f32 %v3428_v40, %v3046_v24  ;;  %2901 = vmatmul.f32.gmra.mxu0 %v2860_v34  ;;  %vm3053_vm7 = vweird.f32 %v3428_v40 }
0x13dd   :  { %vm3054_vm9 = vmor %vm3052_vm8, %vm3053_vm7 }
0x13de   :  { %v3049_v43 = vsub.f32 1.0, %v3048_v58 }
0x13e0   :  { %v3050_v60 = vmul.f32 %v3428_v40, %v3049_v43 }
0x13e2   :  { %v3051_v56 = vadd.f32 %v3428_v40, %v3050_v60 }
0x13e4   :  { %v3055_v37 = vsel %vm3054_vm9, %v3428_v40, %v3051_v56 }
0x13e5   :  { %v3060_v17 = vsel %vm3057_vm0, %v3059_v57, %v3055_v37 }
0x13e6   :  { %v3062_v22 = vmul.f32 %v3060_v17, %v3041_v1 }
0x13e8   :  { %3097 = vmatmul.f32.vlgmr.msra.gmra.mxu2 %v3062_v22 }
0x1449   :  { %v2896_v61 = vpop.f32.mrf.mxu0 }
0x144a   :  { %v4250_v25 = vadd.f32 %v3254_v4, %v2896_v61 }
0x144c   :  { %v3213_v5 = vmul.f32 -1.442695, %v4250_v25 }
0x144e   :  { %3429 = vpow2.f32 %v3213_v5 }
0x1451   :  { %v2899_v55 = vpop.f32.mrf.mxu0 }
0x1452   :  { %v2900_v8 = vadd.f32 %v3254_v4, %v2899_v55 }
0x1454   :  { %v3214_v6 = vmul.f32 -1.442695, %v2900_v8  ;;  %v3430_v53 = vpop.eup %3429 }
0x1455   :  { %v2914_v35 = vadd.f32 1.0, %v3430_v53  ;;  %v1681_v53 = vadd.f32 1e-08, %v4076_v46 }
0x1456   :  { %3431 = vpow2.f32 %v3214_v6  ;;  %v1680_v6 = vadd.f32 1e-08, %v4072_v62 }
0x1457   :  { %3433 = vrcp.f32 %v2914_v35  ;;  %v2928_v60 = vand.u32 2147483648, %v2914_v35  ;;  %vm2922_vm4 = vweird.f32 %v2914_v35  ;;  %v2926_v56 = vand.u32 2147483647, %v2914_v35 }
0x1458   :  { %vm1701_vm8 = vcmp.eq.f32.partialorder %v1680_v6, inf  ;;  %vm1713_vm9 = vcmp.eq.f32.partialorder %v1681_v53, inf  ;;  %vm1703_vm0 = vcmp.eq.f32.partialorder %v1680_v6, 0.0 }
0x1459   :  { %v2902_v15 = vpop.f32.mrf.mxu0  ;;  %vm2927_vm7 = vcmp.eq.f32.partialorder %v2926_v56, 8.507059e+37 }
0x145a   :  { %v2903_v42 = vadd.f32 %v3254_v4, %v2902_v15  ;;  %v2929_v4 = vor.u32 1.1754944e-38, %v2928_v60 }
0x145c   :  { %v3432_v11 = vpop.eup %3431  ;;  %v3215_v54 = vmul.f32 -1.442695, %v2903_v42 }
0x145d   :  { %v2915_v63 = vadd.f32 1.0, %v3432_v11  ;;  %v3434_v1 = vpop.eup %3433 }
0x145e   :  { %3435 = vpow2.f32 %v3215_v54  ;;  %v2918_v0 = vmul.f32 %v3434_v1, %v2914_v35  ;;  %vm2923_vm15 = vweird.f32 %v3434_v1  ;;  %v1679_v35 = vadd.f32 1e-08, %v4068_v51 }
0x145f   :  { %3437 = vrcp.f32 %v2915_v63  ;;  %v2943_v30 = vand.u32 2147483648, %v2915_v63  ;;  %v2941_v36 = vand.u32 2147483647, %v2915_v63  ;;  %vm2937_vm11 = vweird.f32 %v2915_v63  ;;  %vm2924_vm6 = vmor %vm2922_vm4, %vm2923_vm15 }
0x1460   :  { %v2919_v10 = vsub.f32 1.0, %v2918_v0 }
0x1461   :  { %v2944_v29 = vor.u32 1.1754944e-38, %v2943_v30  ;;  %vm2942_vm13 = vcmp.eq.f32.partialorder %v2941_v36, 8.507059e+37 }
0x1462   :  { %v2920_v33 = vmul.f32 %v3434_v1, %v2919_v10 }
0x1464   :  { %v3436_v26 = vpop.eup %3435  ;;  %v2921_v43 = vadd.f32 %v3434_v1, %v2920_v33  ;;  %v1692_v33 = vand.u32 2147483648, %v1679_v35 }
0x1465   :  { %v3438_v49 = vpop.eup %3437  ;;  %v2916_v14 = vadd.f32 1.0, %v3436_v26 }
0x1466   :  { %v2933_v18 = vmul.f32 %v3438_v49, %v2915_v63  ;;  %vm2938_vm10 = vweird.f32 %v3438_v49  ;;  %v2925_v17 = vsel %vm2924_vm6, %v3434_v1, %v2921_v43 }
0x1467   :  { %3439 = vrcp.f32 %v2916_v14  ;;  %vm2939_vm12 = vmor %vm2937_vm11, %vm2938_vm10  ;;  %v2958_v32 = vand.u32 2147483648, %v2916_v14  ;;  %v2956_v40 = vand.u32 2147483647, %v2916_v14  ;;  %vm2952_vm1 = vweird.f32 %v2916_v14 }
0x1468   :  { %v2934_v39 = vsub.f32 1.0, %v2933_v18  ;;  %v2930_v5 = vsel %vm2927_vm7, %v2929_v4, %v2925_v17  ;;  %3441 = vrsqrt.f32 %v1680_v6  ;;  %vm1715_vm10 = vcmp.eq.f32.partialorder %v1681_v53, 0.0 }
0x1469   :  { %v2959_v52 = vor.u32 1.1754944e-38, %v2958_v32  ;;  %vm2957_vm5 = vcmp.eq.f32.partialorder %v2956_v40, 8.507059e+37  ;;  %v2962_v55 = vmul.f32 %v2930_v5, %v4250_v25  ;;  %3443 = vrsqrt.f32 %v1681_v53 }
0x146a   :  { %v2935_v2 = vmul.f32 %v3438_v49, %v2934_v39  ;;  %3445 = vrsqrt.f32 %v1679_v35  ;;  %vm1689_vm11 = vcmp.eq.f32.partialorder %v1679_v35, inf }
0x146b   :  { %v3098_v50 = vpop.f32.mrf.mxu2 }
0x146c   :  { %v2936_v19 = vadd.f32 %v3438_v49, %v2935_v2  ;;  %v3099_v48 = vadd.f32 %v3255_v59, %v3098_v50  ;;  %v1704_v50 = vand.u32 2147483648, %v1680_v6 }
0x146d   :  { %v3440_v45 = vpop.eup %3439 }
0x146e   :  { %v2940_v13 = vsel %vm2939_vm12, %v3438_v49, %v2936_v19  ;;  %v2948_v24 = vmul.f32 %v3440_v45, %v2916_v14  ;;  %v3101_v12 = vmul.f32 %v3099_v48, %v3856_v38  ;;  %vm2953_vm14 = vweird.f32 %v3440_v45  ;;  %v3442_v15 = vpop.eup %3441 }
0x146f   :  { %v2945_v3 = vsel %vm2942_vm13, %v2944_v29, %v2940_v13  ;;  %vm2954_vm2 = vmor %vm2952_vm1, %vm2953_vm14  ;;  %v3444_v11 = vpop.eup %3443  ;;  %v1716_v48 = vand.u32 2147483648, %v1681_v53  ;;  %vm1691_vm12 = vcmp.eq.f32.partialorder %v1679_v35, 0.0 }
0x1470   :  { %v2963_v27 = vmul.f32 %v2945_v3, %v2900_v8  ;;  %v2949_v28 = vsub.f32 1.0, %v2948_v24  ;;  %3102 = vst [vmem:[#allocation10] sm:$0xff] %v3101_v12  ;;  %v2967_v8 = vmul.f32 %v3256_v31, %v2962_v55  ;;  %v1707_v54 = vmul.f32 %v3444_v11, %v1681_v53  ;;  %v3446_v26 = vpop.eup %3445 }
0x1471   :  { %v1683_v14 = vmul.f32 %v3446_v26, %v1679_v35  ;;  %3114 = dma.vmem_to_hbm [thread:$0]  %s3110_s3, 128, %s3112_s28, [#allocation4]  }
0x1472   :  { %v2950_v34 = vmul.f32 %v3440_v45, %v2949_v28  ;;  %v2968_v58 = vmul.f32 %v3256_v31, %v2963_v27  ;;  %v1708_v1 = vmul.f32 %v3444_v11, %v1707_v54 }
0x1473   :  { %v1684_v62 = vmul.f32 %v3446_v26, %v1683_v14 }
0x1474   :  { %v2951_v20 = vadd.f32 %v3440_v45, %v2950_v34  ;;  %2972 = vadd.xlane.f32.xlu2 %v2968_v58  ;;  %v1709_v25 = vmul.f32 0.5, %v1708_v1 }
0x1475   :  { %v1685_v59 = vmul.f32 0.5, %v1684_v62 }
0x1476   :  { %v2955_v57 = vsel %vm2954_vm2, %v3440_v45, %v2951_v20  ;;  %v1710_v0 = vsub.f32 1.5, %v1709_v25 }
0x1477   :  { %v2960_v37 = vsel %vm2957_vm5, %v2959_v52, %v2955_v57  ;;  %v1686_v51 = vsub.f32 1.5, %v1685_v59 }
0x1478   :  { %v2964_v22 = vmul.f32 %v2960_v37, %v2903_v42  ;;  %v1695_v42 = vmul.f32 %v3442_v15, %v1680_v6  ;;  %v1711_v46 = vmul.f32 %v3444_v11, %v1710_v0 }
0x1479   :  { %v1687_v19 = vmul.f32 %v3446_v26, %v1686_v51 }
0x147a   :  { %v2969_v61 = vmul.f32 %v3256_v31, %v2964_v22  ;;  %v1696_v63 = vmul.f32 %v3442_v15, %v1695_v42  ;;  %v1712_v2 = vmul.f32 %v1711_v46, %v1681_v53 }
0x147b   :  { %v1688_v13 = vmul.f32 %v1687_v19, %v1679_v35 }
0x147c   :  { %2974 = vadd.xlane.f32.xlu1 %v2969_v61  ;;  %v1697_v49 = vmul.f32 0.5, %v1696_v63  ;;  %v1714_v10 = vsel %vm1713_vm9, %v1681_v53, %v1712_v2 }
0x147d   :  { %v1717_v29 = vsel %vm1715_vm10, %v1716_v48, %v1714_v10  ;;  %v1690_v3 = vsel %vm1689_vm11, %v1679_v35, %v1688_v13 }
0x147e   :  { %v1698_v18 = vsub.f32 1.5, %v1697_v49  ;;  %v1720_v12 = vadd.f32 1.0, %v1717_v29  ;;  %v1693_v27 = vsel %vm1691_vm12, %v1692_v33, %v1690_v3 }
0x147f   :  { %v1718_v28 = vadd.f32 1.0, %v1693_v27 }
0x1480   :  { %v1699_v39 = vmul.f32 %v3442_v15, %v1698_v18 }
0x1482   :  { %v1700_v30 = vmul.f32 %v1699_v39, %v1680_v6 }
0x1484   :  { %2970 = vadd.xlane.f32.xlu1 %v2967_v8  ;;  %v1702_v36 = vsel %vm1701_vm8, %v1680_v6, %v1700_v30 }
0x1485   :  { %v1705_v45 = vsel %vm1703_vm0, %v1704_v50, %v1702_v36 }
0x1486   :  { %v1719_v24 = vadd.f32 1.0, %v1705_v45 }
0x1488   :  { %3447 = vrcp.f32 %v1719_v24 }
0x1489   :  { %3449 = vrcp.f32 %v1720_v12 }
0x148a   :  { %3451 = vrcp.f32 %v1718_v28 }
0x148e   :  { %v3448_v31 = vpop.eup %3447 }
0x148f   :  { %v3450_v32 = vpop.eup %3449  ;;  %v1725_v40 = vmul.f32 %v3448_v31, %v4039_v16 }
0x1490   :  { %v1726_v58 = vmul.f32 %v3450_v32, %v4043_v23  ;;  %v3452_v56 = vpop.eup %3451 }
0x1491   :  { %v1724_v37 = vmul.f32 %v3452_v56, %v4035_v21 }
0x14e7   :  { %v2973_v34 = vpop.xlane.xlu2 %2972 }
0x14e8   :  { %v2977_v20 = vmul.f32 %v2973_v34, %v1725_v40 }
0x14ea   :  { %v2980_v57 = vmul.f32 %v2977_v20, %v3822_v44 }
0x14ef   :  { %v2975_v43 = vpop.xlane.xlu1 %2974 }
0x14f0   :  { %v2978_v60 = vmul.f32 %v2975_v43, %v1726_v58 }
0x14f2   :  { %v2981_v52 = vmul.f32 %v2978_v60, %v3835_v7 }
0x14f4   :  { %2995 = vmatpush.msrb.mxu3 %v2981_v52 }
0x14f6   :  { %2996 = vmatpush.msrb.mxu3 %v2980_v57 }
0x14f7   :  { %v2971_v17 = vpop.xlane.xlu1 %2970 }
0x14f8   :  { %v2976_v22 = vmul.f32 %v2971_v17, %v1724_v37 }
0x14fa   :  { %v2979_v4 = vmul.f32 %v2976_v22, %v3841_v41 }
0x14fc   :  { %2997 = vmatpush.msrb.mxu3 %v2979_v4 }
0x14fd   :  { %3216 = vmatmul.msk.f32.vlgmr.msrb.gmra.mxu3 %vm673_vm3, %v4197_v47 }
0x1580   :  { %v2999_v44 = vpop.f32.mrf.mxu3 }
0x1581   :  { %v3002_v7 = vadd.f32 %v2999_v44, %v4025_v9 }
0x1583   :  { %v3003_v21 = vmul.f32 %v3002_v7, %v3856_v38 }
0x1585   :  { %3103 = vst [vmem:[%s4285_s11] sm:$0xff] %v3003_v21 }
0x1586   :  { %3600 = dma.done.wait [#allocation4], 128  }
0x1587   :  { %3601 = vsyncadd [#allocation4], 4294967168 }
0x1588   :  { %3123 = vsyncpa [#allocation3], 1 }
0x1589   :  { %3124 = vsyncpa [#allocation6], 1 }
0x158a   :  { %3125 = vsyncpa [#allocation9], 1 }
0x158b   :  { %3126 = vsyncpa [#allocation4], 1 }

</bundles_post_ra>
